<compile_context>
chip_gen: v7x
topology: tpu7x:2x2x1
jax: 0.10.0
libtpu: 0.0.40
codegen_flags: <defaults>
</compile_context>

<pallas_src>
import functools

import jax
import jax.numpy as jnp
from jax import lax
from jax.experimental import pallas as pl
from jax.experimental.pallas import tpu as pltpu

_LANE = 128


# ----------------------------- Pallas kernel ------------------------------ #

def _fused_convnet_kernel(*refs, layer_dims, n_batch):
    """Fused stack of (VALID conv2d + bias + ReLU), all batch elems at once.

    refs = (patches0_ref, w0_ref, b0_ref, w1_ref, b1_ref, ..., o_ref)
      patches0_ref : (N*Ho0*Wo0, K0*K0*C0)   layer-0 im2col patches (VMEM)
      wi_ref       : (Ki*Ki*Cin_i, Cout_i)   im2col-flattened HWIO weights
                                             (last layer: Cout padded to 128)
      bi_ref       : (1, Cout_i)             (last layer: padded to 128)
      o_ref        : (N*Ho_last*Wo_last, Cpad)  lane-dense output slab
    layer_dims : static tuple of (K, Cin, Cout_stored, Ho, Wo) per layer,
                 where Ho/Wo are that layer's OUTPUT spatial dims.
    """
    p0_ref = refs[0]
    o_ref = refs[-1]
    wb_refs = refs[1:-1]

    n_layers = len(layer_dims)
    act = None
    y = None
    for li, (K, Cin, Cout, Ho, Wo) in enumerate(layer_dims):
        w = wb_refs[2 * li][...]                     # (K*K*Cin, Cout)
        b = wb_refs[2 * li + 1][...]                 # (1, Cout)
        if li == 0:
            # Layer-0 patches were prepared in the wrapper (folds the NCHW
            # input transpose + heaviest im2col out of the kernel).
            patches = p0_ref[...]                    # (N*Ho*Wo, K*K*Cin)
        else:
            # im2col for deeper layers: build the patch matrix once, then a
            # single MXU matmul of depth K*K*Cin (batch folded into M).
            cols = [act[:, kh:kh + Ho, kw:kw + Wo, :]
                    for kh in range(K) for kw in range(K)]
            patches = jnp.concatenate(cols, axis=-1)  # (N, Ho, Wo, K*K*Cin)
            patches = patches.reshape(n_batch * Ho * Wo, K * K * Cin)
        y = jnp.dot(patches, w, preferred_element_type=jnp.float32)
        y = jnp.maximum(y + b, 0.0)                  # bias + ReLU
        if li < n_layers - 1:
            # Intermediate activation stays on-chip (VMEM / vregs).
            act = y.reshape(n_batch, Ho, Wo, Cout)
    # Lane-dense store: Cpad is a multiple of 128 -> unmasked vst.
    o_ref[...] = y.astype(o_ref.dtype)


# ------------------------------ Host wrapper ------------------------------- #

def _im2col_layer0_nchw(x_nchw, K, Ho, Wo):
    """Layer-0 im2col straight from NCHW, feature order (kh, kw, cin).

    One XLA fusion that also absorbs the NCHW->NHWC layout change, so no
    standalone input-transpose op is emitted.
    """
    N, C, H, W = x_nchw.shape
    cols = []
    for kh in range(K):
        for kw in range(K):
            p = x_nchw[:, :, kh:kh + Ho, kw:kw + Wo]      # (N, C, Ho, Wo)
            cols.append(jnp.transpose(p, (0, 2, 3, 1)))   # (N, Ho, Wo, C)
    patches = jnp.concatenate(cols, axis=-1)              # (N, Ho, Wo, K*K*C)
    return patches.reshape(N * Ho * Wo, K * K * C)


def convnet2d_with_skip_forward(x_nchw, params):
    """Forward matching ConvNet2d_with_Skip.forward (NCHW in, NCHW out).

    params: list of (w_hwio (K,K,Cin,Cout), b (Cout,)) per layer.
    """
    N, C0, H, W = x_nchw.shape
    n_layers = len(params)

    layer_dims = []
    flat_wb = []
    Hc, Wc, Cc = H, W, C0
    for li, (w_hwio, b) in enumerate(params):
        K, K2, Cin, Cout = w_hwio.shape
        assert K == K2 and Cin == Cc
        Ho, Wo = Hc - K + 1, Wc - K + 1
        w2d = w_hwio.reshape(K * K * Cin, Cout)   # (kh, kw, cin) flattening
        b2d = b.reshape(1, Cout)
        c_store = Cout
        if li == n_layers - 1:
            # Pad the last layer's output channels to a multiple of 128 so the
            # kernel's store is lane-dense (padded bias is 0, ReLU(0)=0).
            c_store = max(_LANE, pl.cdiv(Cout, _LANE) * _LANE)
            if c_store != Cout:
                w2d = jnp.pad(w2d, ((0, 0), (0, c_store - Cout)))
                b2d = jnp.pad(b2d, ((0, 0), (0, c_store - Cout)))
        layer_dims.append((K, Cin, c_store, Ho, Wo))
        flat_wb += [w2d, b2d]
        Hc, Wc, Cc = Ho, Wo, Cout

    # Layer-0 patches built in XLA (absorbs the NCHW->NHWC transpose).
    K0, _, _, Ho0, Wo0 = layer_dims[0]
    patches0 = _im2col_layer0_nchw(x_nchw, K0, Ho0, Wo0)

    M_out = N * Hc * Wc
    C_pad = layer_dims[-1][2]

    kernel = functools.partial(_fused_convnet_kernel,
                               layer_dims=tuple(layer_dims), n_batch=N)

    in_specs = [pl.BlockSpec(patches0.shape, lambda i: (0, 0))]
    for (K, Cin, Cl, Ho, Wo) in layer_dims:
        in_specs.append(pl.BlockSpec((K * K * Cin, Cl), lambda i: (0, 0)))
        in_specs.append(pl.BlockSpec((1, Cl), lambda i: (0, 0)))

    out_padded = pl.pallas_call(
        kernel,
        out_shape=jax.ShapeDtypeStruct((M_out, C_pad), x_nchw.dtype),
        # Single grid step: batch folded into the matmul M dimension, so
        # single-TC chips (v5e/v6e) pay the fixed per-step cost exactly once.
        grid=(1,),
        in_specs=in_specs,
        out_specs=pl.BlockSpec((M_out, C_pad), lambda i: (0, 0)),
        compiler_params=pltpu.CompilerParams(
            dimension_semantics=("arbitrary",),
            # Working set is <1 MiB; fits comfortably on v5e/v6e/v7x.
            vmem_limit_bytes=32 * 1024 * 1024,
        ),
    )(patches0, *flat_wb)

    cout_last = params[-1][0].shape[-1]
    y = out_padded[:, :cout_last].reshape(N, Hc, Wc, cout_last)
    return jnp.transpose(y, (0, 3, 1, 2))       # NHWC -> NCHW (tiny XLA op)


# ------------------------------ Param init --------------------------------- #

def init_convnet_params(key, in_channels, hidden_channels, kernel_sizes):
    """Deterministic params, shaped like nn.Conv2d (PyTorch default-ish init)."""
    assert len(hidden_channels) == len(kernel_sizes)
    params = []
    c_in = in_channels
    for c_out, k in zip(hidden_channels, kernel_sizes):
        key, kw_key, kb_key = jax.random.split(key, 3)
        fan_in = c_in * k * k
        bound = 1.0 / jnp.sqrt(jnp.float32(fan_in))
        # HWIO layout (equivalent to PyTorch OIHW transposed).
        w = jax.random.uniform(kw_key, (k, k, c_in, c_out), jnp.float32,
                               minval=-bound, maxval=bound)
        b = jax.random.uniform(kb_key, (c_out,), jnp.float32,
                               minval=-bound, maxval=bound)
        params.append((w, b))
        c_in = c_out
    return params


def _reference_forward(x_nchw, params):
    """Plain-JAX reference (lax conv) for correctness checking."""
    x = jnp.transpose(x_nchw, (0, 2, 3, 1))
    for (w, b) in params:
        y = lax.conv_general_dilated(
            x, w, window_strides=(1, 1), padding="VALID",
            dimension_numbers=("NHWC", "HWIO", "NHWC"))
        x = jnp.maximum(y + b[None, None, None, :], 0.0)
    return jnp.transpose(x, (0, 3, 1, 2))


# ---------------------------------- Main ----------------------------------- #

if __name__ == "__main__":
    key = jax.random.PRNGKey(0)
    key, x_key, p_key = jax.random.split(key, 3)

    # Shapes consistent with:
    #   ConvNet2d_with_Skip(in_channels=4, hidden_channels=[8, 16],
    #                       kernel_sizes=[3, 3])
    N, C_in, H, W = 2, 4, 16, 16
    hidden_channels = [8, 16]
    kernel_sizes = [3, 3]

    x = jax.random.normal(x_key, (N, C_in, H, W), jnp.float32)   # NCHW input
    params = init_convnet_params(p_key, C_in, hidden_channels, kernel_sizes)

    out = jax.block_until_ready(convnet2d_with_skip_forward(x, params))

    # Shape check: 16 -> 14 -> 12 spatial, channels -> 16.
    assert out.shape == (N, hidden_channels[-1], 12, 12), out.shape

    ref = jax.block_until_ready(_reference_forward(x, params))
    assert jnp.allclose(out, ref, atol=1e-5, rtol=1e-5), \
        float(jnp.max(jnp.abs(out - ref)))

    print("KERNEL_OK")
</pallas_src>

<mosaic_0001>
module attributes {stable_mosaic.version = 11 : i64} {
  func.func @_fused_convnet_kernel(%arg0: i32, %arg1: memref<392x36xf32, #tpu.memory_space<vmem>>, %arg2: memref<36x8xf32, #tpu.memory_space<vmem>>, %arg3: memref<1x8xf32, #tpu.memory_space<vmem>>, %arg4: memref<72x128xf32, #tpu.memory_space<vmem>>, %arg5: memref<1x128xf32, #tpu.memory_space<vmem>>, %arg6: memref<288x128xf32, #tpu.memory_space<vmem>>) attributes {dimension_semantics = [#tpu.dimension_semantics<arbitrary>], iteration_bounds = array<i64: 1>, scalar_prefetch = 0 : i64, scratch_operands = 0 : i64, tpu.core_type = #tpu.core_type<tc>, window_params = [{pipeline_mode = #tpu.pipeline_mode<synchronous>, transform_indices = @transform_0, window_bounds = array<i64: 392, 36>}, {pipeline_mode = #tpu.pipeline_mode<synchronous>, transform_indices = @transform_1, window_bounds = array<i64: 36, 8>}, {pipeline_mode = #tpu.pipeline_mode<synchronous>, transform_indices = @transform_2, window_bounds = array<i64: 1, 8>}, {pipeline_mode = #tpu.pipeline_mode<synchronous>, transform_indices = @transform_3, window_bounds = array<i64: 72, 128>}, {pipeline_mode = #tpu.pipeline_mode<synchronous>, transform_indices = @transform_4, window_bounds = array<i64: 1, 128>}, {pipeline_mode = #tpu.pipeline_mode<synchronous>, transform_indices = @transform_5, window_bounds = array<i64: 288, 128>}]} {
    %c0 = arith.constant 0 : index
    %c0_0 = arith.constant 0 : index
    %0 = vector.load %arg2[%c0, %c0_0] : memref<36x8xf32, #tpu.memory_space<vmem>>, vector<36x8xf32>
    %c0_1 = arith.constant 0 : index
    %c0_2 = arith.constant 0 : index
    %1 = vector.load %arg3[%c0_1, %c0_2] : memref<1x8xf32, #tpu.memory_space<vmem>>, vector<1x8xf32>
    %c0_3 = arith.constant 0 : index
    %c0_4 = arith.constant 0 : index
    %2 = vector.load %arg1[%c0_3, %c0_4] : memref<392x36xf32, #tpu.memory_space<vmem>>, vector<392x36xf32>
    %cst = arith.constant dense<0.000000e+00> : vector<392x8xf32>
    %3 = tpu.matmul %2, %0, %cst {dimension_numbers = #tpu.dot_dimension_numbers<[1], [0], [0], [1], [0, 0, 1, 1], [], []>} : vector<392x36xf32>, vector<36x8xf32>, vector<392x8xf32> -> vector<392x8xf32>
    %4 = vector.broadcast %1 : vector<1x8xf32> to vector<392x8xf32>
    %5 = arith.addf %3, %4 : vector<392x8xf32>
    %cst_5 = arith.constant 0.000000e+00 : f32
    %6 = vector.broadcast %cst_5 : f32 to vector<392x8xf32>
    %7 = arith.maximumf %5, %6 : vector<392x8xf32>
    %8 = vector.shape_cast %7 : vector<392x8xf32> to vector<2x14x14x8xf32>
    %c0_6 = arith.constant 0 : index
    %c0_7 = arith.constant 0 : index
    %9 = vector.load %arg4[%c0_6, %c0_7] : memref<72x128xf32, #tpu.memory_space<vmem>>, vector<72x128xf32>
    %c0_8 = arith.constant 0 : index
    %c0_9 = arith.constant 0 : index
    %10 = vector.load %arg5[%c0_8, %c0_9] : memref<1x128xf32, #tpu.memory_space<vmem>>, vector<1x128xf32>
    %11 = vector.extract_strided_slice %8 {offsets = [0, 0, 0, 0], sizes = [2, 12, 12, 8], strides = [1, 1, 1, 1]} : vector<2x14x14x8xf32> to vector<2x12x12x8xf32>
    %12 = vector.extract_strided_slice %8 {offsets = [0, 0, 1, 0], sizes = [2, 12, 12, 8], strides = [1, 1, 1, 1]} : vector<2x14x14x8xf32> to vector<2x12x12x8xf32>
    %13 = vector.extract_strided_slice %8 {offsets = [0, 0, 2, 0], sizes = [2, 12, 12, 8], strides = [1, 1, 1, 1]} : vector<2x14x14x8xf32> to vector<2x12x12x8xf32>
    %14 = vector.extract_strided_slice %8 {offsets = [0, 1, 0, 0], sizes = [2, 12, 12, 8], strides = [1, 1, 1, 1]} : vector<2x14x14x8xf32> to vector<2x12x12x8xf32>
    %15 = vector.extract_strided_slice %8 {offsets = [0, 1, 1, 0], sizes = [2, 12, 12, 8], strides = [1, 1, 1, 1]} : vector<2x14x14x8xf32> to vector<2x12x12x8xf32>
    %16 = vector.extract_strided_slice %8 {offsets = [0, 1, 2, 0], sizes = [2, 12, 12, 8], strides = [1, 1, 1, 1]} : vector<2x14x14x8xf32> to vector<2x12x12x8xf32>
    %17 = vector.extract_strided_slice %8 {offsets = [0, 2, 0, 0], sizes = [2, 12, 12, 8], strides = [1, 1, 1, 1]} : vector<2x14x14x8xf32> to vector<2x12x12x8xf32>
    %18 = vector.extract_strided_slice %8 {offsets = [0, 2, 1, 0], sizes = [2, 12, 12, 8], strides = [1, 1, 1, 1]} : vector<2x14x14x8xf32> to vector<2x12x12x8xf32>
    %19 = vector.extract_strided_slice %8 {offsets = [0, 2, 2, 0], sizes = [2, 12, 12, 8], strides = [1, 1, 1, 1]} : vector<2x14x14x8xf32> to vector<2x12x12x8xf32>
    %20 = tpu.concatenate %11, %12, %13, %14, %15, %16, %17, %18, %19 in 3 : vector<2x12x12x8xf32>, vector<2x12x12x8xf32>, vector<2x12x12x8xf32>, vector<2x12x12x8xf32>, vector<2x12x12x8xf32>, vector<2x12x12x8xf32>, vector<2x12x12x8xf32>, vector<2x12x12x8xf32>, vector<2x12x12x8xf32> -> vector<2x12x12x72xf32>
    %21 = vector.shape_cast %20 : vector<2x12x12x72xf32> to vector<288x72xf32>
    %cst_10 = arith.constant dense<0.000000e+00> : vector<288x128xf32>
    %22 = tpu.matmul %21, %9, %cst_10 {dimension_numbers = #tpu.dot_dimension_numbers<[1], [0], [0], [1], [0, 0, 1, 1], [], []>} : vector<288x72xf32>, vector<72x128xf32>, vector<288x128xf32> -> vector<288x128xf32>
    %23 = vector.broadcast %10 : vector<1x128xf32> to vector<288x128xf32>
    %24 = arith.addf %22, %23 : vector<288x128xf32>
    %cst_11 = arith.constant 0.000000e+00 : f32
    %25 = vector.broadcast %cst_11 : f32 to vector<288x128xf32>
    %26 = arith.maximumf %24, %25 : vector<288x128xf32>
    %c0_12 = arith.constant 0 : index
    %c0_13 = arith.constant 0 : index
    %27 = vector.load %arg6[%c0_12, %c0_13] : memref<288x128xf32, #tpu.memory_space<vmem>>, vector<288x128xf32>
    tpu.vector_store %arg6[%c0_12, %c0_13], %26 {strides = array<i32>} : memref<288x128xf32, #tpu.memory_space<vmem>>, vector<288x128xf32>,
    return
  }
  func.func @transform_0(%arg0: i32) -> (i32, i32) {
    %c0_i32 = arith.constant 0 : i32
    %c0_i32_0 = arith.constant 0 : i32
    %c0_i32_1 = arith.constant 0 : i32
    return %c0_i32, %c0_i32_0 : i32, i32
  }
  func.func @transform_1(%arg0: i32) -> (i32, i32) {
    %c0_i32 = arith.constant 0 : i32
    %c0_i32_0 = arith.constant 0 : i32
    %c0_i32_1 = arith.constant 0 : i32
    return %c0_i32, %c0_i32_0 : i32, i32
  }
  func.func @transform_2(%arg0: i32) -> (i32, i32) {
    %c0_i32 = arith.constant 0 : i32
    %c0_i32_0 = arith.constant 0 : i32
    %c0_i32_1 = arith.constant 0 : i32
    return %c0_i32, %c0_i32_0 : i32, i32
  }
  func.func @transform_3(%arg0: i32) -> (i32, i32) {
    %c0_i32 = arith.constant 0 : i32
    %c0_i32_0 = arith.constant 0 : i32
    %c0_i32_1 = arith.constant 0 : i32
    return %c0_i32, %c0_i32_0 : i32, i32
  }
  func.func @transform_4(%arg0: i32) -> (i32, i32) {
    %c0_i32 = arith.constant 0 : i32
    %c0_i32_0 = arith.constant 0 : i32
    %c0_i32_1 = arith.constant 0 : i32
    return %c0_i32, %c0_i32_0 : i32, i32
  }
  func.func @transform_5(%arg0: i32) -> (i32, i32) {
    %c0_i32 = arith.constant 0 : i32
    %c0_i32_0 = arith.constant 0 : i32
    %c0_i32_1 = arith.constant 0 : i32
    return %c0_i32, %c0_i32_0 : i32, i32
  }
}

</mosaic_0001>

<bundles_post_ra>
// kernel: tpu_custom_call.1
= control target key start
LH: loop header
LB: loop body
LE: loop exit
PB: predicated region body
PF: predicated region fallthrough
CT: control target
= control target key end

     0   :  { %v5789_v3 = vmov 0.0|0.0   ;;  %vm5790_vm0 = vmmov 0   ;;  %v5791_v6 = vmov 0.0   ;;  %vm230_vm1 = vcmask 1043456   ;;  %s9932_s0 = inlined_call_operand.vmem [shape: f32[392,36], index: 0, kind: input, shape index: {}]   ;;  %s9933_s1 = inlined_call_operand.vmem [shape: f32[36,8], index: 1, kind: input, shape index: {}]   ;;  %s9934_s2 = inlined_call_operand.vmem [shape: f32[1,8], index: 2, kind: input, shape index: {}]   ;;  %s9935_s3 = inlined_call_operand.vmem [shape: f32[72,128], index: 3, kind: input, shape index: {}]   ;;  %s9936_s4 = inlined_call_operand.vmem [shape: f32[1,128], index: 4, kind: input, shape index: {}]   ;;  %s9937_s5 = inlined_call_operand.hbm [shape: f32[288,128], index: 5, kind: output, shape index: {}]  }
   0x1   :  { %v21_v0 = vld [vmem:[%s9933_s1] sm:$0xff]  ;;  %v22_v1 = vld [vmem:[%s9933_s1 + $0x8] sm:$0xff]  ;;  %v23_v2 = vld [vmem:[%s9933_s1 + $0x10] sm:$0xff]  ;;  %5722 = vmatprep.subr.bf16.mxu0 %v5789_v3  ;;  %5744 = vmatprep.subr.bf16.mxu1 %v5789_v3  ;;  %vm82_vm2 = vcmask 293888  }
   0x2   :  { %v5723_v4 = vpack.c.bf16 %v22_v1, %v21_v0  ;;  %v24_v5 = vld [vmem:[%s9933_s1 + $0x18] sm:$0xff]  ;;  %5503 = vmatprep.mubr.msk.f32.mxu0 %vm5790_vm0, %v5791_v6  ;;  %5605 = vmatprep.mubr.msk.f32.mxu1 %vm5790_vm0, %v5791_v6  ;;  %v25_v8 = vld [vmem:[%s9933_s1 + $0x20] sm:$0xf]  ;;  %v61_v10 = vld [vmem:[%s9932_s0 + $0x110] sm:$0xff] }
   0x3   :  { %v5726_v7 = vpack.c.bf16 %v24_v5, %v23_v2  ;;  %v27_v9 = vld [vmem:[%s9932_s0] sm:$0xff]  ;;  %v28_v11 = vld [vmem:[%s9932_s0 + $0x8] sm:$0xff]  ;;  %v62_v12 = vld [vmem:[%s9932_s0 + $0x118] sm:$0xff] }
   0x4   :  { %5724 = vmatpush3.bf16.msra.mxu0 %v5723_v4  ;;  %5747 = vmatpush3.bf16.msra.mxu1 %v5723_v4  ;;  %v29_v13 = vld [vmem:[%s9932_s0 + $0x10] sm:$0xff]  ;;  %v63_v14 = vld [vmem:[%s9932_s0 + $0x120] sm:$0xff] }
   0x5   :  { %5725 = vmatprep.subr.bf16.mxu0 %v5789_v3  ;;  %5745 = vmatprep.subr.bf16.mxu1 %v5789_v3 }
   0x8   :  { %5727 = vmatpush3.bf16.msra.mxu0 %v5726_v7  ;;  %5748 = vmatpush3.bf16.msra.mxu1 %v5726_v7 }
   0x9   :  { %5501 = vmatprep.subr.mxu0 %v5791_v6  ;;  %5746 = vmatprep.subr.mxu1 %v5791_v6 }
   0xc   :  { %5502 = vmatpush3.msk.msra.mxu0 %vm230_vm1, %v25_v8  ;;  %5749 = vmatpush3.msk.msra.mxu1 %vm230_vm1, %v25_v8 }
   0xd   :  { %5504 = vmatmul.mubr.msk.f32.vlgmr.msra.gmra.mrb[0].mxu0 %vm82_vm2, %v27_v9  ;;  %5606 = vmatmul.mubr.msk.f32.vlgmr.msra.gmra.mrb[0].mxu1 %vm82_vm2, %v61_v10 }
   0xe   :  { %5506 = vmatprep.mubr.msk.f32.mxu0 %vm5790_vm0, %v5791_v6  ;;  %5608 = vmatprep.mubr.msk.f32.mxu1 %vm5790_vm0, %v5791_v6 }
  0x11   :  { %5507 = vmatmul.mubr.msk.f32.gmra.mrb[2].mxu0 %vm82_vm2, %v28_v11  ;;  %5609 = vmatmul.mubr.msk.f32.gmra.mrb[2].mxu1 %vm82_vm2, %v62_v12 }
  0x12   :  { %5509 = vmatprep.mubr.msk.f32.mxu0 %vm5790_vm0, %v5791_v6  ;;  %5611 = vmatprep.mubr.msk.f32.mxu1 %vm5790_vm0, %v5791_v6 }
  0x13   :  { %10 = vsyncpa [#allocation3], 0  ;;  %v30_v15 = vld [vmem:[%s9932_s0 + $0x18] sm:$0xff]  ;;  %v64_v16 = vld [vmem:[%s9932_s0 + $0x128] sm:$0xff]  ;;  %v5792_v57 = vmov 1983009808   ;;  %v646_v59 = vlaneseq }
  0x14   :  { %v31_v17 = vld [vmem:[%s9932_s0 + $0x20] sm:$0xff]  ;;  %v65_v18 = vld [vmem:[%s9932_s0 + $0x130] sm:$0xff]  ;;  %v32_v19 = vld [vmem:[%s9932_s0 + $0x28] sm:$0xff]  ;;  %v644_v58 = vunpack.c.l.s4 %v5792_v57  ;;  %s5793_s22 = smov 24   ;;  %s5794_s23 = smov 16   ;;  %vm2325_vm3 = vcmask 1046528  }
  0x15   :  { %5510 = vmatmul.mubr.msk.f32.gmra.mrb[4].mxu0 %vm82_vm2, %v29_v13  ;;  %5612 = vmatmul.mubr.msk.f32.gmra.mrb[4].mxu1 %vm82_vm2, %v63_v14  ;;  %v66_v20 = vld [vmem:[%s9932_s0 + $0x138] sm:$0xff]  ;;  %v33_v21 = vld [vmem:[%s9932_s0 + $0x30] sm:$0xff]  ;;  %v67_v22 = vld [vmem:[%s9932_s0 + $0x140] sm:$0xff]  ;;  %v647_v62 = vshrl.u32 %v646_v59, 7  ;;  %s5795_s24 = smov 8   ;;  %s5796_s25 = smov 32  }
  0x16   :  { %5512 = vmatprep.mubr.msk.f32.mxu0 %vm5790_vm0, %v5791_v6  ;;  %5614 = vmatprep.mubr.msk.f32.mxu1 %vm5790_vm0, %v5791_v6  ;;  %v34_v23 = vld [vmem:[%s9932_s0 + $0x38] sm:$0xff]  ;;  %v68_v24 = vld [vmem:[%s9932_s0 + $0x148] sm:$0xff]  ;;  %v35_v25 = vld [vmem:[%s9932_s0 + $0x40] sm:$0xff]  ;;  %v645_v61 = vunpack.c.0.s8 %v644_v58  ;;  %s5798_s7 = smov 56   ;;  %s5799_s16 = smov 48   ;;  %vm4394_vm4 = vcmask 64512  }
  0x17   :  { %v69_v26 = vld [vmem:[%s9932_s0 + $0x150] sm:$0xff]  ;;  %v36_v27 = vld [vmem:[%s9932_s0 + $0x48] sm:$0xff]  ;;  %v70_v28 = vld [vmem:[%s9932_s0 + $0x158] sm:$0xff]  ;;  %s5800_s21 = smov 64   ;;  %vm4492_vm5 = vcmask 195584   ;;  %vm4443_vm6 = vcmask 130048  }
  0x18   :  { %v37_v29 = vld [vmem:[%s9932_s0 + $0x50] sm:$0xff]  ;;  %v71_v30 = vld [vmem:[%s9932_s0 + $0x160] sm:$0xff]  ;;  %v38_v31 = vld [vmem:[%s9932_s0 + $0x58] sm:$0xff]  ;;  %v6147_v5 = vsub.s32 %v645_v61, %v647_v62  ;;  %vm4541_vm7 = vcmask 261120   ;;  %vm4639_vm8 = vcmask 392192   ;;  %vm4590_vm9 = vcmask 326656  }
  0x19   :  { %5513 = vmatmul.mubr.msk.f32.gmra.mrb[6].mxu0 %vm82_vm2, %v30_v15  ;;  %5615 = vmatmul.mubr.msk.f32.gmra.mrb[6].mxu1 %vm82_vm2, %v64_v16  ;;  %v72_v32 = vld [vmem:[%s9932_s0 + $0x168] sm:$0xff]  ;;  %v39_v33 = vld [vmem:[%s9932_s0 + $0x60] sm:$0xff]  ;;  %v73_v34 = vld [vmem:[%s9932_s0 + $0x170] sm:$0xff]  ;;  %vm4688_vm10 = vcmask 457728   ;;  %vm4737_vm11 = vcmask 523264   ;;  %vm4900_vm12 = vcmask 588800  }
  0x1a   :  { %5515 = vmatprep.mubr.msk.f32.mxu0 %vm5790_vm0, %v5791_v6  ;;  %5617 = vmatprep.mubr.msk.f32.mxu1 %vm5790_vm0, %v5791_v6  ;;  %v40_v35 = vld [vmem:[%s9932_s0 + $0x68] sm:$0xff]  ;;  %v74_v36 = vld [vmem:[%s9932_s0 + $0x178] sm:$0xff]  ;;  %v41_v37 = vld [vmem:[%s9932_s0 + $0x70] sm:$0xff] }
  0x1b   :  { %v42_v38 = vld [vmem:[%s9932_s0 + $0x78] sm:$0xff]  ;;  %v43_v39 = vld [vmem:[%s9932_s0 + $0x80] sm:$0xff]  ;;  %v44_v40 = vld [vmem:[%s9932_s0 + $0x88] sm:$0xff] }
  0x1c   :  { %v45_v41 = vld [vmem:[%s9932_s0 + $0x90] sm:$0xff]  ;;  %v46_v42 = vld [vmem:[%s9932_s0 + $0x98] sm:$0xff]  ;;  %v47_v43 = vld [vmem:[%s9932_s0 + $0xa0] sm:$0xff] }
  0x1d   :  { %5516 = vmatmul.mubr.msk.f32.gmra.mrb[8].mxu0 %vm82_vm2, %v31_v17  ;;  %5618 = vmatmul.mubr.msk.f32.gmra.mrb[8].mxu1 %vm82_vm2, %v65_v18  ;;  %v48_v44 = vld [vmem:[%s9932_s0 + $0xa8] sm:$0xff]  ;;  %v49_v45 = vld [vmem:[%s9932_s0 + $0xb0] sm:$0xff]  ;;  %v50_v46 = vld [vmem:[%s9932_s0 + $0xb8] sm:$0xff] }
  0x1e   :  { %5518 = vmatprep.mubr.msk.f32.mxu0 %vm5790_vm0, %v5791_v6  ;;  %5620 = vmatprep.mubr.msk.f32.mxu1 %vm5790_vm0, %v5791_v6  ;;  %v51_v47 = vld [vmem:[%s9932_s0 + $0xc0] sm:$0xff]  ;;  %v52_v48 = vld [vmem:[%s9932_s0 + $0xc8] sm:$0xff]  ;;  %v53_v49 = vld [vmem:[%s9932_s0 + $0xd0] sm:$0xff] }
  0x1f   :  { %v54_v50 = vld [vmem:[%s9932_s0 + $0xd8] sm:$0xff]  ;;  %v55_v51 = vld [vmem:[%s9932_s0 + $0xe0] sm:$0xff]  ;;  %v56_v52 = vld [vmem:[%s9932_s0 + $0xe8] sm:$0xff] }
  0x20   :  { %v57_v53 = vld [vmem:[%s9932_s0 + $0xf0] sm:$0xff]  ;;  %v58_v54 = vld [vmem:[%s9932_s0 + $0xf8] sm:$0xff]  ;;  %v59_v55 = vld [vmem:[%s9932_s0 + $0x100] sm:$0xff] }
  0x21   :  { %5519 = vmatmul.mubr.msk.f32.gmra.mrb[10].mxu0 %vm82_vm2, %v32_v19  ;;  %5621 = vmatmul.mubr.msk.f32.gmra.mrb[10].mxu1 %vm82_vm2, %v66_v20  ;;  %v60_v56 = vld [vmem:[%s9932_s0 + $0x108] sm:$0xff]  ;;  %v6143_v60 = vld [vmem:[%s9934_s2] ss:$0 sm:$0xff] }
  0x22   :  { %5521 = vmatprep.mubr.msk.f32.mxu0 %vm5790_vm0, %v5791_v6  ;;  %5623 = vmatprep.mubr.msk.f32.mxu1 %vm5790_vm0, %v5791_v6 }
  0x25   :  { %5522 = vmatmul.mubr.msk.f32.gmra.mrb[12].mxu0 %vm82_vm2, %v33_v21  ;;  %5624 = vmatmul.mubr.msk.f32.gmra.mrb[12].mxu1 %vm82_vm2, %v67_v22 }
  0x26   :  { %5524 = vmatprep.mubr.msk.f32.mxu0 %vm5790_vm0, %v5791_v6  ;;  %5626 = vmatprep.mubr.msk.f32.mxu1 %vm5790_vm0, %v5791_v6 }
  0x29   :  { %5525 = vmatmul.mubr.msk.f32.gmra.mrb[14].mxu0 %vm82_vm2, %v34_v23  ;;  %5627 = vmatmul.mubr.msk.f32.gmra.mrb[14].mxu1 %vm82_vm2, %v68_v24 }
  0x2a   :  { %5527 = vmatprep.mubr.msk.f32.mxu0 %vm5790_vm0, %v5791_v6  ;;  %5629 = vmatprep.mubr.msk.f32.mxu1 %vm5790_vm0, %v5791_v6 }
  0x2d   :  { %5528 = vmatmul.mubr.msk.f32.gmra.mrb[16].mxu0 %vm82_vm2, %v35_v25  ;;  %5630 = vmatmul.mubr.msk.f32.gmra.mrb[16].mxu1 %vm82_vm2, %v69_v26 }
  0x2e   :  { %5530 = vmatprep.mubr.msk.f32.mxu0 %vm5790_vm0, %v5791_v6  ;;  %5632 = vmatprep.mubr.msk.f32.mxu1 %vm5790_vm0, %v5791_v6 }
  0x31   :  { %5531 = vmatmul.mubr.msk.f32.gmra.mrb[18].mxu0 %vm82_vm2, %v36_v27  ;;  %5633 = vmatmul.mubr.msk.f32.gmra.mrb[18].mxu1 %vm82_vm2, %v70_v28 }
  0x32   :  { %5533 = vmatprep.mubr.msk.f32.mxu0 %vm5790_vm0, %v5791_v6  ;;  %5635 = vmatprep.mubr.msk.f32.mxu1 %vm5790_vm0, %v5791_v6 }
  0x35   :  { %5534 = vmatmul.mubr.msk.f32.gmra.mrb[20].mxu0 %vm82_vm2, %v37_v29  ;;  %5636 = vmatmul.mubr.msk.f32.gmra.mrb[20].mxu1 %vm82_vm2, %v71_v30 }
  0x36   :  { %5536 = vmatprep.mubr.msk.f32.mxu0 %vm5790_vm0, %v5791_v6  ;;  %5638 = vmatprep.mubr.msk.f32.mxu1 %vm5790_vm0, %v5791_v6 }
  0x39   :  { %5537 = vmatmul.mubr.msk.f32.gmra.mrb[22].mxu0 %vm82_vm2, %v38_v31  ;;  %5639 = vmatmul.mubr.msk.f32.gmra.mrb[22].mxu1 %vm82_vm2, %v72_v32 }
  0x3a   :  { %5539 = vmatprep.mubr.msk.f32.mxu0 %vm5790_vm0, %v5791_v6  ;;  %5641 = vmatprep.mubr.msk.f32.mxu1 %vm5790_vm0, %v5791_v6 }
  0x3d   :  { %5540 = vmatmul.mubr.msk.f32.gmra.mrb[24].mxu0 %vm82_vm2, %v39_v33  ;;  %5642 = vmatmul.mubr.msk.f32.gmra.mrb[24].mxu1 %vm82_vm2, %v73_v34 }
  0x3e   :  { %5542 = vmatprep.mubr.msk.f32.mxu0 %vm5790_vm0, %v5791_v6  ;;  %5644 = vmatprep.mubr.msk.f32.mxu1 %vm5790_vm0, %v5791_v6 }
  0x41   :  { %5543 = vmatmul.mubr.msk.f32.gmra.mrb[26].mxu0 %vm82_vm2, %v40_v35  ;;  %5645 = vmatmul.mubr.msk.f32.gmra.mrb[26].mxu1 %vm82_vm2, %v74_v36 }
  0x42   :  { %5545 = vmatprep.mubr.msk.f32.mxu0 %vm5790_vm0, %v5791_v6  ;;  %5647 = vmatprep.mubr.msk.f32.mxu1 %vm5790_vm0, %v5791_v6 }
  0x45   :  { %5546 = vmatmul.mubr.msk.f32.gmra.mrb[28].mxu0 %vm82_vm2, %v41_v37 }
  0x46   :  { %5548 = vmatprep.mubr.msk.f32.mxu0 %vm5790_vm0, %v5791_v6 }
  0x49   :  { %5549 = vmatmul.mubr.msk.f32.gmra.mrb[30].mxu0 %vm82_vm2, %v42_v38 }
  0x4a   :  { %5551 = vmatprep.mubr.msk.f32.mxu0 %vm5790_vm0, %v5791_v6 }
  0x4d   :  { %5552 = vmatmul.mubr.msk.f32.gmra.mrb[32].mxu0 %vm82_vm2, %v43_v39 }
  0x4e   :  { %5554 = vmatprep.mubr.msk.f32.mxu0 %vm5790_vm0, %v5791_v6 }
  0x51   :  { %5555 = vmatmul.mubr.msk.f32.gmra.mrb[34].mxu0 %vm82_vm2, %v44_v40 }
  0x52   :  { %5557 = vmatprep.mubr.msk.f32.mxu0 %vm5790_vm0, %v5791_v6 }
  0x55   :  { %5558 = vmatmul.mubr.msk.f32.gmra.mrb[36].mxu0 %vm82_vm2, %v45_v41 }
  0x56   :  { %5560 = vmatprep.mubr.msk.f32.mxu0 %vm5790_vm0, %v5791_v6 }
  0x59   :  { %5561 = vmatmul.mubr.msk.f32.gmra.mrb[38].mxu0 %vm82_vm2, %v46_v42 }
  0x5a   :  { %5563 = vmatprep.mubr.msk.f32.mxu0 %vm5790_vm0, %v5791_v6 }
  0x5d   :  { %5564 = vmatmul.mubr.msk.f32.gmra.mrb[40].mxu0 %vm82_vm2, %v47_v43 }
  0x5e   :  { %5566 = vmatprep.mubr.msk.f32.mxu0 %vm5790_vm0, %v5791_v6 }
  0x61   :  { %5567 = vmatmul.mubr.msk.f32.gmra.mrb[42].mxu0 %vm82_vm2, %v48_v44 }
  0x62   :  { %5569 = vmatprep.mubr.msk.f32.mxu0 %vm5790_vm0, %v5791_v6 }
  0x65   :  { %5570 = vmatmul.mubr.msk.f32.gmra.mrb[44].mxu0 %vm82_vm2, %v49_v45 }
  0x66   :  { %5572 = vmatprep.mubr.msk.f32.mxu0 %vm5790_vm0, %v5791_v6 }
  0x69   :  { %5573 = vmatmul.mubr.msk.f32.gmra.mrb[46].mxu0 %vm82_vm2, %v50_v46 }
  0x6a   :  { %5575 = vmatprep.mubr.msk.f32.mxu0 %vm5790_vm0, %v5791_v6 }
  0x6d   :  { %5576 = vmatmul.mubr.msk.f32.gmra.mrb[48].mxu0 %vm82_vm2, %v51_v47 }
  0x6e   :  { %5578 = vmatprep.mubr.msk.f32.mxu0 %vm5790_vm0, %v5791_v6 }
  0x71   :  { %5579 = vmatmul.mubr.msk.f32.gmra.mrb[50].mxu0 %vm82_vm2, %v52_v48 }
  0x72   :  { %5581 = vmatprep.mubr.msk.f32.mxu0 %vm5790_vm0, %v5791_v6 }
  0x75   :  { %5582 = vmatmul.mubr.msk.f32.gmra.mrb[52].mxu0 %vm82_vm2, %v53_v49 }
  0x76   :  { %5584 = vmatprep.mubr.msk.f32.mxu0 %vm5790_vm0, %v5791_v6 }
  0x79   :  { %5585 = vmatmul.mubr.msk.f32.gmra.mrb[54].mxu0 %vm82_vm2, %v54_v50 }
  0x7a   :  { %5587 = vmatprep.mubr.msk.f32.mxu0 %vm5790_vm0, %v5791_v6 }
  0x7d   :  { %5588 = vmatmul.mubr.msk.f32.gmra.mrb[56].mxu0 %vm82_vm2, %v55_v51 }
  0x7e   :  { %5590 = vmatprep.mubr.msk.f32.mxu0 %vm5790_vm0, %v5791_v6 }
  0x81   :  { %5591 = vmatmul.mubr.msk.f32.gmra.mrb[58].mxu0 %vm82_vm2, %v56_v52 }
  0x82   :  { %5593 = vmatprep.mubr.msk.f32.mxu0 %vm5790_vm0, %v5791_v6 }
  0x85   :  { %5594 = vmatmul.mubr.msk.f32.gmra.mrb[60].mxu0 %vm82_vm2, %v57_v53 }
  0x86   :  { %5596 = vmatprep.mubr.msk.f32.mxu0 %vm5790_vm0, %v5791_v6 }
  0x89   :  { %5597 = vmatmul.mubr.msk.f32.gmra.mrb[62].mxu0 %vm82_vm2, %v58_v54 }
  0x8a   :  { %5599 = vmatprep.mubr.msk.f32.mxu0 %vm5790_vm0, %v5791_v6 }
  0x8d   :  { %5600 = vmatmul.mubr.msk.f32.gmra.mrb[64].mxu0 %vm82_vm2, %v59_v55 }
  0x8e   :  { %5602 = vmatprep.mubr.msk.f32.mxu0 %vm5790_vm0, %v5791_v6 }
  0x91   :  { %5603 = vmatmul.mubr.msk.f32.gmra.mrb[66].mxu0 %vm82_vm2, %v60_v56 }
  0xe0   :  { %v300_v63 = vpop.f32.mrb[0].mxu0  ;;  %v470_v0 = vpop.f32.mrb[0].mxu1 }
  0xe1   :  { %v471_v1 = vadd.f32 %v6143_v60, %v470_v0  ;;  %v5505_v2 = vpop.f32.mrb[1].mxu0  ;;  %v5607_v3 = vpop.f32.mrb[1].mxu1  ;;  %v301_v4 = vadd.f32 %v6143_v60, %v300_v63 }
  0xe3   :  { %v578_v6 = vmax.f32 %v471_v1, 0.0  ;;  %v544_v11 = vmax.f32 %v301_v4, 0.0 }
  0xe4   :  { %v305_v7 = vpop.f32.mrb[2].mxu0  ;;  %v475_v8 = vpop.f32.mrb[2].mxu1 }
  0xe5   :  { %v5508_v9 = vpop.f32.mrb[3].mxu0  ;;  %v5610_v10 = vpop.f32.mrb[3].mxu1  ;;  %v306_v12 = vadd.f32 %v6143_v60, %v305_v7  ;;  %v476_v13 = vadd.f32 %v6143_v60, %v475_v8  ;;  %v1220_v14 = vcombine.high %v578_v6, %v578_v6  ;;  %v6152_v15 = vrot.slane %v578_v6, %v6147_v5 }
  0xe6   :  { %v642_v24 = vcombine.high %v544_v11, %v544_v11  ;;  %v6170_v35 = vrot.slane %v544_v11, %v6147_v5 }
  0xe7   :  { %10222 = vst [vmem:[#allocation5_spill] sm:$0xff] %v6152_v15  ;;  %v545_v16 = vmax.f32 %v306_v12, 0.0  ;;  %v579_v17 = vmax.f32 %v476_v13, 0.0  ;;  %v1234_v27 = vrot.slane %v1220_v14, %v6147_v5  ;;  %v6159_v28 = vcombine.high %v6152_v15, %v6152_v15 }
  0xe8   :  { %v310_v18 = vpop.f32.mrb[4].mxu0  ;;  %v480_v19 = vpop.f32.mrb[4].mxu1  ;;  %v6185_v43 = vrot.slane %v642_v24, %v6147_v5  ;;  %v6196_v49 = vcombine.high %v6170_v35, %v6170_v35 }
  0xe9   :  { %v311_v20 = vadd.f32 %v6143_v60, %v310_v18  ;;  %v481_v21 = vadd.f32 %v6143_v60, %v480_v19  ;;  %v5511_v22 = vpop.f32.mrb[5].mxu0  ;;  %v5613_v23 = vpop.f32.mrb[5].mxu1  ;;  %v659_v25 = vcombine.high %v545_v16, %v545_v16  ;;  %v1237_v26 = vcombine.high %v579_v17, %v579_v17  ;;  %10223 = vst [vmem:[#allocation6_spill] sm:$0xff] %v6159_v28 }
  0xea   :  { %v666_v39 = vrot.slane %v545_v16, %v6147_v5  ;;  %v1927_v45 = vcombine.low %v6159_v28, %v1234_v27  ;;  %v6204_v54 = vrot.slane %v579_v17, %v6147_v5  ;;  %v1236_v59 = vcombine.high %v1234_v27, %v1234_v27 }
  0xeb   :  { %v6161_v29 = vmax.f32 %v311_v20, 0.0  ;;  %v580_v30 = vmax.f32 %v481_v21, 0.0  ;;  %v6164_v31 = vrot.slane %v659_v25, %v6147_v5  ;;  %v6167_v32 = vrot.slane %v1237_v26, %v6147_v5 }
  0xec   :  { %v315_v33 = vpop.f32.mrb[6].mxu0  ;;  %v485_v34 = vpop.f32.mrb[6].mxu1  ;;  %v6201_v53 = vcombine.high %v666_v39, %v666_v39  ;;  %v6211_v57 = vrot.slane %v1927_v45, %v6147_v5  ;;  %v6216_v61 = vcombine.high %v6185_v43, %v6185_v43  ;;  %v2984_v3 = vcombine.low %v1234_v27, %v1236_v59 }
  0xed   :  { %v6174_v36 = vrot.slane %v6161_v29, %v6147_v5  ;;  %v5616_v37 = vpop.f32.mrb[7].mxu1  ;;  %v5514_v38 = vpop.f32.mrb[7].mxu0  ;;  %v6179_v40 = vcombine.high %v6167_v32, %v6167_v32  ;;  %v1254_v41 = vcombine.high %v580_v30, %v580_v30  ;;  %v6182_v42 = vrot.slane %v580_v30, %v6147_v5 }
  0xee   :  { %v675_v44 = vcombine.high %v6164_v31, %v6164_v31  ;;  %v486_v56 = vadd.f32 %v6143_v60, %v485_v34  ;;  %10224 = vst [vmem:[#allocation7_spill] sm:$0xff] %v6211_v57  ;;  %3402 = vrot.lane.b32.xlu1 %v6211_v57, %s5793_s22  ;;  %v2542_v4 = vcombine.low %v6196_v49, %v6185_v43 }
  0xef   :  { %v2993_v46 = vcombine.low %v6179_v40, %v6182_v42  ;;  %v6207_v55 = vrot.slane %v1254_v41, %v6147_v5  ;;  %v2543_v6 = vcombine.low %v6216_v61, %v666_v39  ;;  %v1502_v9 = vcombine.low %v666_v39, %v6201_v53 }
  0xf0   :  { %v490_v47 = vpop.f32.mrb[8].mxu1  ;;  %v6192_v48 = vpop.f32.mrb[8].mxu0  ;;  %v6199_v50 = vcombine.low %v675_v44, %v6174_v36  ;;  %v581_v62 = vmax.f32 %v486_v56, 0.0  ;;  %v676_v10 = vcombine.high %v6161_v29, %v6161_v29  ;;  %v316_v11 = vadd.f32 %v6143_v60, %v315_v33 }
  0xf1   :  { %v5517_v51 = vpop.f32.mrb[9].mxu0  ;;  %v5619_v52 = vpop.f32.mrb[9].mxu1  ;;  %v491_v58 = vadd.f32 %v6143_v60, %v490_v47  ;;  %v1270_v63 = vcombine.high %v6207_v55, %v6207_v55  ;;  %v6237_v13 = vcombine.high %v6204_v54, %v6204_v54  ;;  %v6243_v16 = vrot.slane %v2984_v3, %v6147_v5 }
  0xf2   :  { %v1271_v12 = vcombine.high %v581_v62, %v581_v62  ;;  %v6240_v14 = vrot.slane %v581_v62, %v6147_v5  ;;  %v2550_v23 = vrot.slane %v2542_v4, %v6147_v5  ;;  %v2557_v24 = vrot.slane %v2543_v6, %v6147_v5 }
  0xf3   :  { %v6226_v2 = vmax.f32 %v491_v58, 0.0  ;;  %10225 = vst [vmem:[#allocation8_spill] sm:$0xff] %v6243_v16  ;;  %v2992_v21 = vcombine.low %v6237_v13, %v6167_v32  ;;  %3212 = vrot.lane.b32.xlu1 %v6243_v16, %s5794_s23  ;;  %v6266_v27 = vrot.slane %v676_v10, %v6147_v5  ;;  %v547_v29 = vmax.f32 %v316_v11, 0.0 }
  0xf4   :  { %v6220_v0 = vpop.f32.mrb[10].mxu0  ;;  %v6222_v1 = vpop.f32.mrb[10].mxu1  ;;  %v6246_v17 = vrot.slane %v1271_v12, %v6147_v5  ;;  %v6259_v22 = vcombine.low %v1270_v63, %v6240_v14  ;;  %v6273_v33 = vrot.slane %v1502_v9, %v6147_v5  ;;  %v2558_v34 = vcombine.low %v2550_v23, %v2557_v24 }
  0xf5   :  { %v5622_v7 = vpop.f32.mrb[11].mxu1  ;;  %v5520_v8 = vpop.f32.mrb[11].mxu0  ;;  %v6250_v18 = vrot.slane %v6226_v2, %v6147_v5  ;;  %v2275_v37 = vrot.slane %v1236_v59, %v6147_v5  ;;  %v693_v38 = vcombine.high %v547_v29, %v547_v29  ;;  %v2139_v41 = vrot.slane %v6164_v31, %v6147_v5 }
  0xf6   :  { %v6270_v30 = vcombine.high %v6246_v17, %v6246_v17  ;;  %10226 = vst [vmem:[#allocation9_spill] sm:$0xff] %v6273_v33  ;;  %v6286_v47 = vcombine.high %v6174_v36, %v6174_v36  ;;  %3142 = vrot.lane.b32.xlu0 %v2558_v34, %s5794_s23  ;;  %v3000_v52 = vrot.slane %v2992_v21, %v6147_v5 }
  0xf7   :  { %v2276_v51 = vcombine.low %v6211_v57, %v2275_v37  ;;  %v3007_v56 = vrot.slane %v2993_v46, %v6147_v5  ;;  %v1935_v62 = vcombine.low %v6204_v54, %v6237_v13  ;;  %v6296_v63 = vcombine.high %v6266_v27, %v6266_v27 }
  0xf8   :  { %v6252_v19 = vpop.f32.mrb[12].mxu1  ;;  %v6254_v20 = vpop.f32.mrb[12].mxu0  ;;  %v6299_v3 = vcombine.low %v6273_v33, %v2139_v41  ;;  %v2559_v4 = vcombine.low %v6201_v53, %v6164_v31  ;;  %v6304_v6 = vrot.slane %v547_v29, %v6147_v5  ;;  %v1486_v46 = vcombine.low %v6185_v43, %v6216_v61 }
  0xf9   :  { %v5523_v25 = vpop.f32.mrb[13].mxu0  ;;  %v5625_v26 = vpop.f32.mrb[13].mxu1  ;;  %v6308_v7 = vrot.slane %v2276_v51, 1  ;;  %v6310_v8 = vcombine.low %v3000_v52, %v3007_v56  ;;  %v1936_v54 = vcombine.low %v6167_v32, %v6179_v40  ;;  %v6315_v9 = vrot.slane %v693_v38, %v6147_v5 }
  0xfa   :  { %v2327_v10 = vrot.slane %v6299_v3, 1  ;;  %v321_v31 = vadd.f32 %v6143_v60, %v6192_v48  ;;  %v1485_v43 = vcombine.low %v6170_v35, %v6196_v49  ;;  %v1288_v61 = vcombine.high %v6226_v2, %v6226_v2 }
  0xfb   :  { %10227 = vst [vmem:[#allocation10_spill] sm:$0xff] %v6308_v7  ;;  %10228 = vst [vmem:[#allocation11_spill] sm:$0xff] %v6310_v8  ;;  %2468 = vrot.lane.b32.xlu1 %v6308_v7, %s5795_s24  ;;  %v1511_v32 = vcombine.low %v6286_v47, %v6266_v27  ;;  %v1269_v48 = vcombine.high %v6182_v42, %v6182_v42  ;;  %v6336_v13 = vcombine.high %v6240_v14, %v6240_v14 }
  0xfc   :  { %v6280_v44 = vpop.f32.mrb[14].mxu0  ;;  %v6282_v45 = vpop.f32.mrb[14].mxu1  ;;  %2400 = vrot.lane.b32.xlu0 %v2327_v10, %s5795_s24  ;;  %v2566_v35 = vrot.slane %v2559_v4, %v6147_v5  ;;  %v548_v49 = vmax.f32 %v321_v31, 0.0  ;;  %v1500_v2 = vrot.slane %v1486_v46, %v6147_v5  ;;  %v1518_v21 = vrot.slane %v6199_v50, %v6147_v5 }
  0xfd   :  { %v5526_v58 = vpop.f32.mrb[15].mxu0  ;;  %v5628_v59 = vpop.f32.mrb[15].mxu1  ;;  %v1525_v23 = vrot.slane %v1511_v32, %v6147_v5  ;;  %v1527_v24 = vcombine.low %v6296_v63, %v6304_v6  ;;  %v1943_v25 = vrot.slane %v1935_v62, %v6147_v5  ;;  %v709_v26 = vcombine.high %v6315_v9, %v6315_v9 }
  0xfe   :  { %v1950_v29 = vrot.slane %v1936_v54, %v6147_v5  ;;  %v6353_v34 = vrot.slane %v548_v49, %v6147_v5  ;;  %v1493_v50 = vrot.slane %v1485_v43, %v6147_v5  ;;  %v6361_v41 = vrot.slane %v1288_v61, %v6147_v5 }
  0xff   :  { %3144 = vrot.lane.b32.xlu1 %v2566_v35, %s5794_s23  ;;  %v6364_v51 = vcombine.low %v1518_v21, %v1525_v23  ;;  %v1961_v58 = vcombine.low %v6336_v13, %v6246_v17  ;;  %v3009_v59 = vcombine.low %v1269_v48, %v6207_v55  ;;  %v326_v4 = vadd.f32 %v6143_v60, %v6220_v0 }
 0x100   :  { %v6320_v53 = vpop.f32.mrb[16].mxu0  ;;  %v6322_v11 = vpop.f32.mrb[16].mxu1  ;;  %3214 = vrot.lane.b32.xlu0 %v6310_v8, %s5794_s23  ;;  %v2592_v62 = vcombine.low %v709_v26, %v6353_v34  ;;  %v1952_v46 = vcombine.low %v6182_v42, %v1269_v48  ;;  %v6375_v54 = vcombine.low %v1493_v50, %v1500_v2  ;;  %v710_v31 = vcombine.high %v548_v49, %v548_v49 }
 0x101   :  { %v5529_v40 = vpop.f32.mrb[17].mxu0  ;;  %v5631_v12 = vpop.f32.mrb[17].mxu1  ;;  %10229 = vst [vmem:[#allocation12_spill] sm:$0xff] %v6364_v51  ;;  %v6377_v43 = vcombine.low %v1943_v25, %v1950_v29  ;;  %v725_v61 = vcombine.high %v6353_v34, %v6353_v34  ;;  %v496_v32 = vadd.f32 %v6143_v60, %v6222_v1  ;;  %v2567_v42 = vcombine.low %v6174_v36, %v6286_v47 }
 0x102   :  { %10230 = vst [vmem:[#allocation13_spill] sm:$0xff] %v6375_v54  ;;  %v1968_v40 = vrot.slane %v6259_v22, %v6147_v5  ;;  %v2283_v48 = vrot.slane %v6207_v55, %v6147_v5  ;;  %v1535_v35 = vcombine.low %v6315_v9, %v709_v26  ;;  %v1304_v49 = vcombine.high %v6361_v41, %v6361_v41 }
 0x103   :  { %10231 = vst [vmem:[#allocation14_spill] sm:$0xff] %v6377_v43  ;;  %3568 = vrot.lane.b32.xlu1 %v6308_v7, %s5796_s25  ;;  %v6401_v2 = vrot.slane %v3009_v59, %v6147_v5  ;;  %v549_v36 = vmax.f32 %v326_v4, 0.0  ;;  %v583_v47 = vmax.f32 %v496_v32, 0.0  ;;  %v1975_v55 = vrot.slane %v1961_v58, %v6147_v5 }
 0x104   :  { %v6355_v37 = vpop.f32.mrb[18].mxu0  ;;  %v6357_v38 = vpop.f32.mrb[18].mxu1  ;;  %3404 = vrot.lane.b32.xlu0 %v6377_v43, %s5793_s22  ;;  %v2326_v9 = vrot.slane %v6375_v54, 1  ;;  %v6406_v21 = vrot.slane %v710_v31, %v6147_v5  ;;  %v6409_v23 = vrot.slane %v1952_v46, %v6147_v5  ;;  %v2568_v25 = vcombine.low %v6266_v27, %v6296_v63 }
 0x105   :  { %v5532_v52 = vpop.f32.mrb[19].mxu0  ;;  %v5634_v56 = vpop.f32.mrb[19].mxu1  ;;  %10232 = vst [vmem:[#allocation15_spill] sm:$0xff] %v6401_v2  ;;  %v1536_v26 = vcombine.low %v6353_v34, %v725_v61  ;;  %v727_v29 = vcombine.high %v549_v36, %v549_v36  ;;  %v6415_v50 = vrot.slane %v583_v47, %v6147_v5  ;;  %v1985_v59 = vcombine.low %v6361_v41, %v1304_v49 }
 0x106   :  { %10233 = vst [vmem:[#allocation16_spill] sm:$0xff] %v6409_v23  ;;  %v6417_v52 = vcombine.low %v1968_v40, %v1975_v55  ;;  %v2328_v27 = vsel %vm2325_vm3, %v2326_v9, %v2327_v10  ;;  %v2593_v34 = vcombine.low %v725_v61, %v6406_v21  ;;  %v1543_v31 = vrot.slane %v1535_v35, %v6147_v5 }
 0x107   :  { %3216 = vrot.lane.b32.xlu1 %v6401_v2, %s5794_s23  ;;  %v1305_v32 = vcombine.high %v583_v47, %v583_v47  ;;  %v3042_v40 = vcombine.low %v1304_v49, %v6415_v50  ;;  %v2575_v41 = vrot.slane %v2567_v42, %v6147_v5  ;;  %v6437_v3 = vrot.slane %v727_v29, %v6147_v5 }
 0x108   :  { %v6385_v12 = vpop.f32.mrb[20].mxu0  ;;  %v6387_v0 = vpop.f32.mrb[20].mxu1  ;;  %10234 = vst [vmem:[#allocation17_spill] sm:$0xff] %v6417_v52  ;;  %2398 = vrot.lane.b32.xlu0 %v2328_v27, %s5795_s24  ;;  %v2284_v10 = vcombine.low %v6409_v23, %v2283_v48  ;;  %v2607_v61 = vrot.slane %v2593_v34, %v6147_v5  ;;  %v1550_v35 = vrot.slane %v1536_v26, %v6147_v5 }
 0x109   :  { %v5535_v1 = vpop.f32.mrb[21].mxu0  ;;  %v5637_v22 = vpop.f32.mrb[21].mxu1  ;;  %v708_v49 = vcombine.high %v6304_v6, %v6304_v6  ;;  %v1993_v42 = vrot.slane %v1985_v59, %v6147_v5  ;;  %v6452_v48 = vrot.slane %v1305_v32, %v6147_v5  ;;  %v1320_v47 = vcombine.high %v6415_v50, %v6415_v50 }
 0x10a   :  { %v2582_v1 = vrot.slane %v2568_v25, %v6147_v5  ;;  %v2600_v22 = vrot.slane %v2592_v62, %v6147_v5  ;;  %v6458_v25 = vcombine.low %v1543_v31, %v1550_v35  ;;  %v6461_v26 = vrot.slane %v549_v36, %v6147_v5 }
 0x10b   :  { %3406 = vrot.lane.b32.xlu1 %v6409_v23, %s5793_s22  ;;  %v6469_v59 = vrot.slane %v1527_v24, %v6147_v5  ;;  %v331_v27 = vadd.f32 %v6143_v60, %v6254_v20  ;;  %v6473_v34 = vrot.slane %v2284_v10, 1  ;;  %v336_v36 = vadd.f32 %v6143_v60, %v6280_v44 }
 0x10c   :  { %v6419_v56 = vpop.f32.mrb[22].mxu0  ;;  %v6421_v58 = vpop.f32.mrb[22].mxu1  ;;  %3336 = vrot.lane.b32.xlu0 %v6364_v51, %s5793_s22  ;;  %v6456_v9 = vcombine.low %v2600_v22, %v2607_v61  ;;  %10236 = vst [vmem:[#allocation19_spill] sm:$0xff] %v6458_v25  ;;  %v6463_v29 = vcombine.low %v2575_v41, %v2582_v1  ;;  %v3050_v20 = vrot.slane %v3042_v40, %v6147_v5  ;;  %v2380_v44 = vrot.slane %v6377_v43, 1 }
 0x10d   :  { %v5538_v4 = vpop.f32.mrb[23].mxu0  ;;  %v5640_v46 = vpop.f32.mrb[23].mxu1  ;;  %10238 = vst [vmem:[#allocation21_spill] sm:$0xff] %v6469_v59  ;;  %10239 = vst [vmem:[#allocation22_spill] sm:$0xff] %v6473_v34  ;;  %v6486_v63 = vmax.f32 %v331_v27, 0.0  ;;  %v6491_v24 = vcombine.high %v6406_v21, %v6406_v21  ;;  %v341_v32 = vadd.f32 %v6143_v60, %v6320_v53  ;;  %v6498_v1 = vmax.f32 %v336_v36, 0.0 }
 0x10e   :  { %10235 = vst [vmem:[#allocation18_spill] sm:$0xff] %v6456_v9  ;;  %10237 = vst [vmem:[#allocation20_spill] sm:$0xff] %v6463_v29  ;;  %v6477_v4 = vcombine.high %v6437_v3, %v6437_v3  ;;  %v3043_v46 = vcombine.low %v1320_v47, %v6452_v48  ;;  %v346_v40 = vadd.f32 %v6143_v60, %v6355_v37 }
 0x10f   :  { %3338 = vrot.lane.b32.xlu1 %v6469_v59, %s5793_s22  ;;  %v2584_v10 = vcombine.low %v6304_v6, %v708_v49  ;;  %v1986_v61 = vcombine.low %v6415_v50, %v1320_v47  ;;  %v6507_v53 = vrot.slane %v6486_v63, %v6147_v5  ;;  %v552_v36 = vmax.f32 %v341_v32, 0.0 }
 0x110   :  { %v6442_v55 = vpop.f32.mrb[24].mxu0  ;;  %3146 = vrot.lane.b32.xlu0 %v6463_v29, %s5794_s23  ;;  %v3057_v22 = vrot.slane %v3043_v46, %v6147_v5  ;;  %v553_v46 = vmax.f32 %v346_v40, 0.0  ;;  %v6519_v6 = vsel %vm2325_vm3, %v2380_v44, %v6473_v34  ;;  %v2147_v37 = vrot.slane %v708_v49, %v6147_v5 }
 0x111   :  { %v5541_v62 = vpop.f32.mrb[25].mxu0  ;;  %10241 = vst [vmem:[#allocation24_spill] sm:$0xff] %v6519_v6  ;;  %v501_v50 = vadd.f32 %v6143_v60, %v6252_v19  ;;  %v778_v44 = vcombine.high %v552_v36, %v552_v36  ;;  %v2000_v49 = vrot.slane %v1986_v61, %v6147_v5  ;;  %v6542_v35 = vrot.slane %v552_v36, %v6147_v5 }
 0x112   :  { %v761_v62 = vcombine.high %v6498_v1, %v6498_v1  ;;  %v6513_v27 = vcombine.low %v3050_v20, %v3057_v22  ;;  %v6534_v22 = vrot.slane %v2584_v10, %v6147_v5  ;;  %v795_v40 = vcombine.high %v553_v46, %v553_v46 }
 0x113   :  { %2472 = vrot.lane.b32.xlu1 %v6473_v34, %s5795_s24  ;;  %v6549_v47 = vmax.f32 %v501_v50, 0.0  ;;  %v6552_v10 = vrot.slane %v778_v44, %v6147_v5  ;;  %v6554_v61 = vcombine.low %v1993_v42, %v2000_v49  ;;  %v6568_v44 = vrot.slane %v553_v46, %v6147_v5 }
 0x114   :  { %v6482_v31 = vpop.f32.mrb[26].mxu0  ;;  %10240 = vst [vmem:[#allocation23_spill] sm:$0xff] %v6513_v27  ;;  %2470 = vrot.lane.b32.xlu0 %v6519_v6, %s5795_s24  ;;  %v6531_v32 = vrot.slane %v761_v62, %v6147_v5  ;;  %10242 = vst [vmem:[#allocation25_spill] sm:$0xff] %v6534_v22  ;;  %v2148_v62 = vcombine.low %v6469_v59, %v2147_v37  ;;  %v6561_v2 = vrot.slane %v795_v40, %v6147_v5 }
 0x115   :  { %v5544_v41 = vpop.f32.mrb[27].mxu0  ;;  %10243 = vst [vmem:[#allocation26_spill] sm:$0xff] %v6554_v61  ;;  %v1322_v37 = vcombine.high %v6549_v47, %v6549_v47  ;;  %v794_v50 = vcombine.high %v6552_v10, %v6552_v10  ;;  %v3018_v42 = vcombine.low %v6246_v17, %v6270_v30  ;;  %v351_v49 = vadd.f32 %v6143_v60, %v6385_v12 }
 0x116   :  { %v6539_v19 = vcombine.high %v6531_v32, %v6531_v32  ;;  %v2330_v36 = vrot.slane %v2148_v62, 1  ;;  %v361_v46 = vadd.f32 %v6143_v60, %v6442_v55  ;;  %v6591_v12 = vcombine.high %v6561_v2, %v6561_v2 }
 0x117   :  { %3148 = vrot.lane.b32.xlu1 %v6534_v22, %s5794_s23  ;;  %v6581_v23 = vcombine.low %v794_v50, %v6568_v44  ;;  %v554_v17 = vmax.f32 %v351_v49, 0.0  ;;  %v356_v62 = vadd.f32 %v6143_v60, %v6419_v56  ;;  %v75_v50 = vld [vmem:[%s9932_s0 + $0x180] sm:$0xff]  ;;  %v6600_v55 = vcombine.high %v6250_v18, %v6250_v18 }
 0x118   :  { %v6515_v41 = vpop.f32.mrb[28].mxu0  ;;  %3570 = vrot.lane.b32.xlu0 %v6519_v6, %s5796_s25  ;;  %10244 = vst [vmem:[#allocation27_spill] sm:$0xff] %v6591_v12  ;;  %v6606_v49 = vmax.f32 %v361_v46, 0.0  ;;  %5648 = vmatmul.mubr.msk.f32.gmra.mrb[28].mxu1 %vm82_vm2, %v75_v50  ;;  %v3032_v56 = vrot.slane %v3018_v42, %v6147_v5  ;;  %v742_v6 = vcombine.high %v6461_v26, %v6461_v26 }
 0x119   :  { %v5547_v20 = vpop.f32.mrb[29].mxu0  ;;  %v812_v8 = vcombine.high %v554_v17, %v554_v17  ;;  %v6612_v16 = vrot.slane %v554_v17, %v6147_v5  ;;  %v10246_v42 = vcombine.low %v6270_v30, %v6250_v18  ;;  %v6636_v59 = vmax.f32 %v356_v62, 0.0 }
 0x11a   :  { %v846_v46 = vcombine.high %v6606_v49, %v6606_v49  ;;  %v366_v30 = vadd.f32 %v6143_v60, %v6482_v31  ;;  %v6693_v15 = vcombine.high %v6452_v48, %v6452_v48  ;;  %v10250_v29 = vcombine.low %v6477_v4, %v6507_v53 }
 0x11b   :  { %3572 = vrot.lane.b32.xlu1 %v6473_v34, %s5796_s25  ;;  %10245 = vst [vmem:[#allocation28_spill] sm:$0xff] %v6612_v16  ;;  %v6629_v17 = vrot.slane %v10246_v42, %v6147_v5  ;;  %v6632_v57 = vrot.slane %v812_v8, %v6147_v5  ;;  %v371_v42 = vadd.f32 %v6143_v60, %v6515_v41 }
 0x11c   :  { %v6544_v20 = vpop.f32.mrb[30].mxu0  ;;  %3408 = vrot.lane.b32.xlu0 %v6417_v52, %s5793_s22  ;;  %v2291_v8 = vrot.slane %v6600_v55, %v6147_v5  ;;  %v6680_v22 = vmax.f32 %v366_v30, 0.0  ;;  %v6698_v30 = vcombine.high %v6507_v53, %v6507_v53 }
 0x11d   :  { %v5550_v39 = vpop.f32.mrb[31].mxu0  ;;  %10247 = vst [vmem:[#allocation29_spill] sm:$0xff] %v6629_v17  ;;  %v6655_v62 = vcombine.high %v6632_v57, %v6632_v57  ;;  %v376_v7 = vadd.f32 %v6143_v60, %v6544_v20 }
 0x11e   :  { %v3017_v39 = vcombine.low %v6240_v14, %v6336_v13  ;;  %v506_v14 = vadd.f32 %v6143_v60, %v6282_v45  ;;  %v2329_v45 = vrot.slane %v6364_v51, 1  ;;  %v6672_v51 = vpop.f32.mrb[24].mxu1  ;;  %10249 = vst [vmem:[#allocation31_spill] sm:$0xff] %v6680_v22 }
 0x11f   :  { %2404 = vrot.lane.b32.xlu1 %v2330_v36, %s5795_s24  ;;  %v559_v20 = vmax.f32 %v376_v7, 0.0  ;;  %v2383_v7 = vrot.slane %v6417_v52, 1 }
 0x120   :  { %v6576_v40 = vpop.f32.mrb[32].mxu0  ;;  %v3025_v34 = vrot.slane %v3017_v39, %v6147_v5  ;;  %v6622_v50 = vmax.f32 %v506_v14, 0.0  ;;  %v6639_v14 = vrot.slane %v846_v46, %v6147_v5  ;;  %v6659_v46 = vrot.slane %v6636_v59, %v6147_v5 }
 0x121   :  { %v5553_v13 = vpop.f32.mrb[33].mxu0 }
 0x122   :  { %v6604_v13 = vrot.slane %v1322_v37, %v6147_v5  ;;  %v2331_v37 = vsel %vm2325_vm3, %v2329_v45, %v2330_v36  ;;  %v6651_v33 = vcombine.low %v3025_v34, %v3032_v56  ;;  %v6665_v31 = vrot.slane %v6622_v50, %v6147_v5 }
 0x123   :  { %3502 = vrot.lane.b32.xlu0 %v2331_v37, %s5796_s25  ;;  %3410 = vrot.lane.b32.xlu1 %v6629_v17, %s5793_s22  ;;  %v1560_v34 = vcombine.low %v742_v6, %v6437_v3  ;;  %v6676_v54 = vcombine.high %v6639_v14, %v6639_v14  ;;  %v5643_v6 = vpop.f32.mrb[25].mxu1  ;;  %v2292_v56 = vcombine.low %v6629_v17, %v2291_v8 }
 0x124   :  { %v6614_v43 = vpop.f32.mrb[34].mxu0  ;;  %10248 = vst [vmem:[#allocation30_spill] sm:$0xff] %v6651_v33  ;;  %v1575_v17 = vrot.slane %v10250_v29, %v6147_v5  ;;  %v897_v6 = vcombine.high %v559_v20, %v559_v20 }
 0x125   :  { %v5556_v39 = vpop.f32.mrb[35].mxu0 }
 0x126   :  { %v6643_v39 = vcombine.high %v6604_v13, %v6604_v13  ;;  %v6747_v52 = vrot.slane %v897_v6, %v6147_v5 }
 0x127   :  { %3218 = vrot.lane.b32.xlu0 %v6651_v33, %s5794_s23  ;;  %v6686_v33 = vrot.slane %v6549_v47, %v6147_v5  ;;  %3504 = vrot.lane.b32.xlu1 %v2330_v36, %s5796_s25  ;;  %v6702_v47 = vrot.slane %v6680_v22, %v6147_v5  ;;  %v1568_v36 = vrot.slane %v1560_v34, %v6147_v5 }
 0x128   :  { %v390_v45 = vpop.f32.mrb[36].mxu0  ;;  %v3034_v22 = vcombine.low %v6250_v18, %v6600_v55  ;;  %v6733_v18 = vrot.slane %v559_v20, %v6147_v5  ;;  %10257 = vst [vmem:[#allocation38_spill] sm:$0xff] %v6747_v52  ;;  %v913_v12 = vcombine.high %v6747_v52, %v6747_v52  ;;  %v386_v20 = vadd.f32 %v6143_v60, %v6614_v43 }
 0x129   :  { %v5559_v41 = vpop.f32.mrb[37].mxu0  ;;  %v6735_v55 = vcombine.low %v1568_v36, %v1575_v17  ;;  %v381_v17 = vadd.f32 %v6143_v60, %v6576_v40  ;;  %v2155_v52 = vrot.slane %v6461_v26, %v6147_v5 }
 0x12a   :  { %v6682_v41 = vmax.f32 %v371_v42, 0.0  ;;  %10254 = vst [vmem:[#allocation35_spill] sm:$0xff] %v6733_v18 }
 0x12b   :  { %3150 = vrot.lane.b32.xlu0 %v6456_v9, %s5794_s23  ;;  %v6723_v9 = vrot.slane %v2292_v56, 1  ;;  %2402 = vrot.lane.b32.xlu1 %v2331_v37, %s5795_s24  ;;  %10255 = vst [vmem:[#allocation36_spill] sm:$0xff] %v6735_v55  ;;  %v2618_v56 = vcombine.low %v6507_v53, %v6698_v30  ;;  %v6744_v37 = vrot.slane %v3034_v22, %v6147_v5  ;;  %v560_v6 = vmax.f32 %v381_v17, 0.0 }
 0x12c   :  { %v395_v28 = vpop.f32.mrb[38].mxu0  ;;  %v880_v42 = vcombine.high %v6682_v41, %v6682_v41  ;;  %v1552_v22 = vcombine.low %v6406_v21, %v6491_v24  ;;  %v561_v17 = vmax.f32 %v386_v20, 0.0 }
 0x12d   :  { %v5562_v8 = vpop.f32.mrb[39].mxu0  ;;  %10252 = vst [vmem:[#allocation33_spill] sm:$0xff] %v6723_v9  ;;  %10256 = vst [vmem:[#allocation37_spill] sm:$0xff] %v6744_v37  ;;  %v914_v18 = vcombine.high %v560_v6, %v560_v6  ;;  %v6772_v21 = vrot.slane %v560_v6, %v6147_v5 }
 0x12e   :  { %v6720_v16 = vrot.slane %v880_v42, %v6147_v5  ;;  %v6741_v8 = vpop.f32.mrb[26].mxu1 }
 0x12f   :  { %3340 = vrot.lane.b32.xlu0 %v6458_v25, %s5793_s22  ;;  %v5646_v36 = vpop.f32.mrb[27].mxu1  ;;  %3220 = vrot.lane.b32.xlu1 %v6744_v37, %s5794_s23  ;;  %v391_v37 = vadd.f32 %v6143_v60, %v390_v45  ;;  %10259 = vst [vmem:[#allocation40_spill] sm:$0xff] %v6772_v21  ;;  %v6787_v45 = vcombine.low %v913_v12, %v6772_v21 }
 0x130   :  { %10251 = vst [vmem:[#allocation32_spill] sm:$0xff] %v6720_v16  ;;  %v6725_v34 = vpop.f32.mrb[40].mxu0  ;;  %v6730_v29 = vcombine.high %v6720_v16, %v6720_v16  ;;  %v2632_v36 = vrot.slane %v2618_v56, %v6147_v5  ;;  %v931_v56 = vcombine.high %v561_v17, %v561_v17 }
 0x131   :  { %v5565_v42 = vpop.f32.mrb[41].mxu0  ;;  %10262 = vst [vmem:[#allocation43_spill] sm:$0xff] %v6787_v45 }
 0x132   :  { %10253 = vst [vmem:[#allocation34_spill] sm:$0xff] %v6730_v29  ;;  %v6755_v42 = vsel %vm2325_vm3, %v2383_v7, %v6723_v9  ;;  %v2617_v7 = vcombine.low %v6437_v3, %v6477_v4  ;;  %v396_v29 = vadd.f32 %v6143_v60, %v395_v28  ;;  %v6781_v3 = vrot.slane %v1552_v22, %v6147_v5 }
 0x133   :  { %10258 = vst [vmem:[#allocation39_spill] sm:$0xff] %v6755_v42  ;;  %2474 = vrot.lane.b32.xlu0 %v6755_v42, %s5795_s24  ;;  %2476 = vrot.lane.b32.xlu1 %v6723_v9, %s5795_s24  ;;  %v6784_v4 = vrot.slane %v914_v18, %v6147_v5  ;;  %v6792_v28 = vrot.slane %v561_v17, %v6147_v5 }
 0x134   :  { %v405_v53 = vpop.f32.mrb[42].mxu0  ;;  %v2625_v43 = vrot.slane %v2617_v7, %v6147_v5  ;;  %10260 = vst [vmem:[#allocation41_spill] sm:$0xff] %v6781_v3  ;;  %v10265_v22 = vcombine.low %v6491_v24, %v6461_v26  ;;  %v6807_v7 = vrot.slane %v931_v56, %v6147_v5  ;;  %v563_v17 = vmax.f32 %v396_v29, 0.0 }
 0x135   :  { %v5568_v40 = vpop.f32.mrb[43].mxu0  ;;  %10261 = vst [vmem:[#allocation42_spill] sm:$0xff] %v6784_v4  ;;  %10263 = vst [vmem:[#allocation44_spill] sm:$0xff] %v6792_v28  ;;  %v6804_v12 = vcombine.high %v6784_v4, %v6784_v4  ;;  %v401_v29 = vadd.f32 %v6143_v60, %v6725_v34 }
 0x136   :  { %v562_v40 = vmax.f32 %v391_v37, 0.0  ;;  %v6794_v37 = vcombine.low %v2625_v43, %v2632_v36  ;;  %v6800_v18 = vrot.slane %v10265_v22, %v6147_v5  ;;  %v2156_v43 = vcombine.low %v6781_v3, %v2155_v52 }
 0x137   :  { %3574 = vrot.lane.b32.xlu0 %v6755_v42, %s5796_s25  ;;  %10267 = vst [vmem:[#allocation47_spill] sm:$0xff] %v6804_v12  ;;  %v6817_v26 = vcombine.high %v6807_v7, %v6807_v7  ;;  %v2332_v52 = vrot.slane %v6458_v25, 1 }
 0x138   :  { %v410_v16 = vpop.f32.mrb[44].mxu0  ;;  %10264 = vst [vmem:[#allocation45_spill] sm:$0xff] %v6794_v37  ;;  %v948_v6 = vcombine.high %v562_v40, %v562_v40  ;;  %10266 = vst [vmem:[#allocation46_spill] sm:$0xff] %v6800_v18  ;;  %3152 = vrot.lane.b32.xlu1 %v6800_v18, %s5794_s23  ;;  %v6822_v56 = vrot.slane %v562_v40, %v6147_v5  ;;  %v6834_v18 = vrot.slane %v563_v17, %v6147_v5 }
 0x139   :  { %v5571_v20 = vpop.f32.mrb[45].mxu0  ;;  %v6838_v40 = vrot.slane %v2156_v43, 1  ;;  %v411_v34 = vadd.f32 %v6143_v60, %v410_v16 }
 0x13a   :  { %v6810_v20 = vrot.slane %v948_v6, %v6147_v5  ;;  %v965_v6 = vcombine.high %v563_v17, %v563_v17  ;;  %10270 = vst [vmem:[#allocation50_spill] sm:$0xff] %v6834_v18  ;;  %v2002_v17 = vcombine.low %v6452_v48, %v6693_v15 }
 0x13b   :  { %3222 = vrot.lane.b32.xlu0 %v6513_v27, %s5794_s23  ;;  %10271 = vst [vmem:[#allocation51_spill] sm:$0xff] %v6838_v40  ;;  %v406_v27 = vadd.f32 %v6143_v60, %v405_v53 }
 0x13c   :  { %10268 = vst [vmem:[#allocation48_spill] sm:$0xff] %v6810_v20  ;;  %v415_v36 = vpop.f32.mrb[46].mxu0  ;;  %v6831_v42 = vcombine.high %v6810_v20, %v6810_v20  ;;  %3342 = vrot.lane.b32.xlu1 %v6781_v3, %s5793_s22  ;;  %v1337_v3 = vcombine.high %v6686_v33, %v6686_v33 }
 0x13d   :  { %v5574_v22 = vpop.f32.mrb[47].mxu0  ;;  %v565_v12 = vmax.f32 %v406_v27, 0.0  ;;  %v6876_v27 = vmax.f32 %v411_v34, 0.0  ;;  %v744_v34 = vcombine.high %v6486_v63, %v6486_v63 }
 0x13e   :  { %10269 = vst [vmem:[#allocation49_spill] sm:$0xff] %v6831_v42  ;;  %v6841_v22 = vrot.slane %v965_v6, %v6147_v5  ;;  %v6856_v6 = vmax.f32 %v401_v29, 0.0 }
 0x13f   :  { %3412 = vrot.lane.b32.xlu0 %v6554_v61, %s5793_s22  ;;  %v999_v29 = vcombine.high %v565_v12, %v565_v12  ;;  %v6874_v16 = vrot.slane %v565_v12, %v6147_v5  ;;  %10277 = vst [vmem:[#allocation57_spill] sm:$0xff] %v6876_v27  ;;  %v416_v12 = vadd.f32 %v6143_v60, %v415_v36 }
 0x140   :  { %v420_v24 = vpop.f32.mrb[48].mxu0  ;;  %10272 = vst [vmem:[#allocation52_spill] sm:$0xff] %v6841_v22  ;;  %v6854_v43 = vcombine.high %v6841_v22, %v6841_v22  ;;  %10274 = vst [vmem:[#allocation54_spill] sm:$0xff] %v6856_v6  ;;  %3576 = vrot.lane.b32.xlu1 %v6723_v9, %s5796_s25  ;;  %v6869_v42 = vrot.slane %v6856_v6, %v6147_v5  ;;  %v2299_v6 = vrot.slane %v6686_v33, %v6147_v5 }
 0x141   :  { %v5577_v25 = vpop.f32.mrb[49].mxu0  ;;  %10276 = vst [vmem:[#allocation56_spill] sm:$0xff] %v6874_v16  ;;  %v6882_v48 = vrot.slane %v999_v29, %v6147_v5  ;;  %v6904_v9 = vrot.slane %v6876_v27, %v6147_v5  ;;  %v10283_v36 = vcombine.low %v6693_v15, %v6686_v33  ;;  %v6918_v20 = vmax.f32 %v416_v12, 0.0 }
 0x142   :  { %10273 = vst [vmem:[#allocation53_spill] sm:$0xff] %v6854_v43  ;;  %v6863_v25 = vsel %vm2325_vm3, %v2332_v52, %v6838_v40  ;;  %v2010_v52 = vcombine.low %v1337_v3, %v6604_v13  ;;  %v6896_v3 = vrot.slane %v2002_v17, %v6147_v5  ;;  %v6922_v45 = vrot.slane %v744_v34, %v6147_v5 }
 0x143   :  { %10275 = vst [vmem:[#allocation55_spill] sm:$0xff] %v6863_v25  ;;  %2406 = vrot.lane.b32.xlu0 %v6863_v25, %s5795_s24  ;;  %10278 = vst [vmem:[#allocation58_spill] sm:$0xff] %v6882_v48  ;;  %v6900_v29 = vcombine.high %v6882_v48, %v6882_v48  ;;  %v6914_v17 = vrot.slane %v10283_v36, %v6147_v5  ;;  %v1033_v15 = vcombine.high %v6918_v20, %v6918_v20 }
 0x144   :  { %v425_v53 = vpop.f32.mrb[50].mxu0  ;;  %2408 = vrot.lane.b32.xlu1 %v6838_v40, %s5795_s24  ;;  %10280 = vst [vmem:[#allocation60_spill] sm:$0xff] %v6896_v3  ;;  %10282 = vst [vmem:[#allocation62_spill] sm:$0xff] %v6904_v9  ;;  %v2018_v27 = vrot.slane %v2010_v52, %v6147_v5  ;;  %v2300_v63 = vcombine.low %v6896_v3, %v2299_v6  ;;  %v10286_v33 = vcombine.low %v6643_v39, %v6665_v31 }
 0x145   :  { %v5580_v28 = vpop.f32.mrb[51].mxu0  ;;  %10281 = vst [vmem:[#allocation61_spill] sm:$0xff] %v6900_v29  ;;  %10284 = vst [vmem:[#allocation63_spill] sm:$0xff] %v6914_v17  ;;  %v421_v52 = vadd.f32 %v6143_v60, %v420_v24  ;;  %v426_v34 = vadd.f32 %v6143_v60, %v425_v53  ;;  %v6938_v43 = vrot.slane %v1033_v15, %v6147_v5 }
 0x146   :  { %v6888_v28 = vcombine.high %v6874_v16, %v6874_v16  ;;  %10285 = vst [vmem:[#allocation64_spill] sm:$0xff] %v6918_v20  ;;  %v2025_v12 = vrot.slane %v10286_v33, %v6147_v5  ;;  %v6945_v33 = vrot.slane %v2300_v63, 1  ;;  %v1577_v24 = vcombine.low %v6698_v30, %v6922_v45 }
 0x147   :  { %3506 = vrot.lane.b32.xlu0 %v6863_v25, %s5796_s25  ;;  %10287 = vst [vmem:[#allocation65_spill] sm:$0xff] %v6938_v43  ;;  %v568_v25 = vmax.f32 %v421_v52, 0.0  ;;  %v569_v20 = vmax.f32 %v426_v34, 0.0  ;;  %v6951_v53 = vcombine.high %v6938_v43, %v6938_v43 }
 0x148   :  { %10279 = vst [vmem:[#allocation59_spill] sm:$0xff] %v6888_v28  ;;  %v430_v22 = vpop.f32.mrb[52].mxu0  ;;  %3224 = vrot.lane.b32.xlu1 %v6914_v17, %s5794_s23  ;;  %v6940_v6 = vcombine.low %v2018_v27, %v2025_v12  ;;  %v2386_v17 = vrot.slane %v6554_v61, 1  ;;  %10289 = vst [vmem:[#allocation67_spill] sm:$0xff] %v6945_v33  ;;  %v760_v27 = vcombine.high %v6922_v45, %v6922_v45 }
 0x149   :  { %v5583_v16 = vpop.f32.mrb[53].mxu0  ;;  %10290 = vst [vmem:[#allocation68_spill] sm:$0xff] %v6951_v53  ;;  %v1050_v12 = vcombine.high %v568_v25, %v568_v25  ;;  %v1067_v63 = vcombine.high %v569_v20, %v569_v20  ;;  %v431_v61 = vadd.f32 %v6143_v60, %v430_v22  ;;  %v768_v28 = vrot.slane %v6498_v1, %v6147_v5 }
 0x14a   :  { %10288 = vst [vmem:[#allocation66_spill] sm:$0xff] %v6940_v6 }
 0x14b   :  { %3344 = vrot.lane.b32.xlu0 %v6735_v55, %s5793_s22  ;;  %v6961_v52 = vrot.slane %v1050_v12, %v6147_v5 }
 0x14c   :  { %v435_v16 = vpop.f32.mrb[54].mxu0  ;;  %3414 = vrot.lane.b32.xlu1 %v6896_v3, %s5793_s22  ;;  %v6972_v3 = vrot.slane %v1577_v24, %v6147_v5 }
 0x14d   :  { %v5586_v36 = vpop.f32.mrb[55].mxu0  ;;  %v6980_v30 = vcombine.high %v6961_v52, %v6961_v52  ;;  %v436_v22 = vadd.f32 %v6143_v60, %v435_v16 }
 0x14e   :  { %v6958_v36 = vrot.slane %v568_v25, %v6147_v5  ;;  %10293 = vst [vmem:[#allocation71_spill] sm:$0xff] %v6972_v3  ;;  %v2163_v25 = vrot.slane %v760_v27, %v6147_v5 }
 0x14f   :  { %3154 = vrot.lane.b32.xlu0 %v6794_v37, %s5794_s23  ;;  %v570_v37 = vmax.f32 %v431_v61, 0.0  ;;  %v7005_v24 = vmax.f32 %v436_v22, 0.0 }
 0x150   :  { %v440_v48 = vpop.f32.mrb[56].mxu0  ;;  %10291 = vst [vmem:[#allocation69_spill] sm:$0xff] %v6958_v36  ;;  %3508 = vrot.lane.b32.xlu1 %v6838_v40, %s5796_s25  ;;  %v6983_v40 = vrot.slane %v569_v20, %v6147_v5  ;;  %v2164_v53 = vcombine.low %v6972_v3, %v2163_v25  ;;  %v2634_v25 = vcombine.low %v6922_v45, %v760_v27 }
 0x151   :  { %v5589_v15 = vpop.f32.mrb[57].mxu0  ;;  %v441_v36 = vadd.f32 %v6143_v60, %v440_v48  ;;  %v1084_v61 = vcombine.high %v570_v37, %v570_v37  ;;  %v7003_v16 = vrot.slane %v570_v37, %v6147_v5  ;;  %10295 = vst [vmem:[#allocation73_spill] sm:$0xff] %v7005_v24  ;;  %v2335_v37 = vrot.slane %v6735_v55, 1 }
 0x152   :  { %v6969_v15 = vsel %vm2325_vm3, %v2386_v17, %v6945_v33  ;;  %v6986_v17 = vrot.slane %v1067_v63, %v6147_v5  ;;  %v7022_v22 = vrot.slane %v2164_v53, 1  ;;  %v7034_v48 = vrot.slane %v7005_v24, %v6147_v5  ;;  %v7039_v53 = vld [vmem:[%s9934_s2] ss:$0 sm:$0xff]  ;;  %s5797_s2 = smov 40  }
 0x153   :  { %10292 = vst [vmem:[#allocation70_spill] sm:$0xff] %v6969_v15  ;;  %2478 = vrot.lane.b32.xlu0 %v6969_v15, %s5795_s24  ;;  %10297 = vst [vmem:[#allocation75_spill] sm:$0xff] %v7039_v53  ;;  %v3067_v55 = vcombine.low %v6604_v13, %v6643_v39 }
 0x154   :  { %v445_v34 = vpop.f32.mrb[58].mxu0  ;;  %3346 = vrot.lane.b32.xlu1 %v6972_v3, %s5793_s22  ;;  %v7000_v63 = vcombine.high %v6986_v17, %v6986_v17  ;;  %v7008_v3 = vmax.f32 %v441_v36, 0.0  ;;  %10296 = vst [vmem:[#allocation74_spill] sm:$0xff] %v7022_v22 }
 0x155   :  { %v5592_v12 = vpop.f32.mrb[59].mxu0  ;;  %v446_v20 = vadd.f32 %v6143_v60, %v445_v34  ;;  %v7012_v60 = vcombine.high %v6665_v31, %v6665_v31 }
 0x156   :  { %10294 = vst [vmem:[#allocation72_spill] sm:$0xff] %v7000_v63  ;;  %v1118_v45 = vcombine.high %v7008_v3, %v7008_v3 }
 0x157   :  { %3578 = vrot.lane.b32.xlu0 %v6969_v15, %s5796_s25  ;;  %v573_v27 = vmax.f32 %v446_v20, 0.0  ;;  %v511_v20 = vadd.f32 %v7039_v53, %v6322_v11  ;;  %v3068_v24 = vcombine.low %v6665_v31, %v7012_v60  ;;  %v7059_v11 = vsel %vm2325_vm3, %v2335_v37, %v7022_v22 }
 0x158   :  { %v450_v12 = vpop.f32.mrb[60].mxu0  ;;  %2480 = vrot.lane.b32.xlu1 %v6945_v33, %s5795_s24  ;;  %v7047_v15 = vrot.slane %v1118_v45, %v6147_v5  ;;  %10300 = vst [vmem:[#allocation78_spill] sm:$0xff] %v7059_v11  ;;  %v1339_v31 = vcombine.high %v6622_v50, %v6622_v50 }
 0x159   :  { %v5595_v43 = vpop.f32.mrb[61].mxu0  ;;  %v1135_v45 = vcombine.high %v573_v27, %v573_v27  ;;  %v7066_v13 = vrot.slane %v573_v27, %v6147_v5  ;;  %v586_v63 = vmax.f32 %v511_v20, 0.0  ;;  %v3082_v50 = vrot.slane %v3068_v24, %v6147_v5 }
 0x15a   :  { %v7015_v43 = vrot.slane %v1084_v61, %v6147_v5  ;;  %10299 = vst [vmem:[#allocation77_spill] sm:$0xff] %v7047_v15  ;;  %v451_v20 = vadd.f32 %v7039_v53, %v450_v12 }
 0x15b   :  { %3416 = vrot.lane.b32.xlu0 %v6940_v6, %s5793_s22  ;;  %10302 = vst [vmem:[#allocation80_spill] sm:$0xff] %v7066_v13  ;;  %v1356_v9 = vcombine.high %v586_v63, %v586_v63  ;;  %v7080_v27 = vrot.slane %v1135_v45, %v6147_v5 }
 0x15c   :  { %v455_v34 = vpop.f32.mrb[62].mxu0  ;;  %v7030_v61 = vcombine.high %v7015_v43, %v7015_v43  ;;  %v574_v24 = vmax.f32 %v451_v20, 0.0 }
 0x15d   :  { %v5598_v36 = vpop.f32.mrb[63].mxu0  ;;  %10303 = vst [vmem:[#allocation81_spill] sm:$0xff] %v7080_v27  ;;  %v7092_v1 = vrot.slane %v1356_v9, %v6147_v5  ;;  %v456_v45 = vadd.f32 %v7039_v53, %v455_v34  ;;  %v1151_v12 = vcombine.high %v7080_v27, %v7080_v27 }
 0x15e   :  { %v7044_v36 = vrot.slane %v2634_v25, %v6147_v5  ;;  %v7063_v25 = vcombine.high %v7047_v15, %v7047_v15  ;;  %v7104_v9 = vrot.slane %v574_v24, %v6147_v5 }
 0x15f   :  { %2410 = vrot.lane.b32.xlu0 %v7059_v11, %s5795_s24 }
 0x160   :  { %10298 = vst [vmem:[#allocation76_spill] sm:$0xff] %v7044_v36  ;;  %v460_v29 = vpop.f32.mrb[64].mxu0  ;;  %3156 = vrot.lane.b32.xlu1 %v7044_v36, %s5794_s23  ;;  %10301 = vst [vmem:[#allocation79_spill] sm:$0xff] %v7063_v25  ;;  %v3075_v36 = vrot.slane %v3067_v55, %v6147_v5  ;;  %v7087_v55 = vrot.slane %v1339_v31, %v6147_v5  ;;  %v575_v31 = vmax.f32 %v456_v45, 0.0 }
 0x161   :  { %v5601_v39 = vpop.f32.mrb[65].mxu0  ;;  %10306 = vst [vmem:[#allocation84_spill] sm:$0xff] %v7104_v9 }
 0x162   :  { %v516_v39 = vadd.f32 %v7039_v53, %v6357_v38  ;;  %v7099_v38 = vpop.permute.xlu1 %3402  ;;  %v7123_v45 = vrot.slane %v575_v31, %v6147_v5  ;;  %v1169_v27 = vcombine.high %v575_v31, %v575_v31 }
 0x163   :  { %3510 = vrot.lane.b32.xlu0 %v7059_v11, %s5796_s25  ;;  %10305 = vst [vmem:[#allocation83_spill] sm:$0xff] %v7099_v38  ;;  %v1152_v11 = vcombine.high %v574_v24, %v574_v24  ;;  %v2027_v24 = vcombine.low %v7012_v60, %v7087_v55 }
 0x164   :  { %v465_v15 = vpop.f32.mrb[66].mxu0  ;;  %3580 = vrot.lane.b32.xlu1 %v6945_v33, %s5796_s25  ;;  %v7095_v33 = vcombine.low %v3075_v36, %v3082_v50  ;;  %v587_v13 = vmax.f32 %v516_v39, 0.0  ;;  %v7109_v36 = vcombine.high %v7092_v1, %v7092_v1  ;;  %v7120_v39 = vcombine.low %v1151_v12, %v7104_v9  ;;  %10309 = vst [vmem:[#allocation87_spill] sm:$0xff] %v7123_v45 }
 0x165   :  { %v5604_v37 = vpop.f32.mrb[67].mxu0  ;;  %v7117_v20 = vrot.slane %v1152_v11, %v6147_v5  ;;  %v1586_v12 = vcombine.low %v6531_v32, %v6539_v19  ;;  %v7140_v60 = vrot.slane %v2027_v24, %v6147_v5 }
 0x166   :  { %10304 = vst [vmem:[#allocation82_spill] sm:$0xff] %v7095_v33  ;;  %v776_v37 = vcombine.high %v768_v28, %v768_v28  ;;  %v7114_v50 = vrot.slane %v587_v13, %v6147_v5  ;;  %10308 = vst [vmem:[#allocation86_spill] sm:$0xff] %v7120_v39  ;;  %v7133_v25 = vpop.permute.xlu1 %3212  ;;  %v1373_v39 = vcombine.high %v587_v13, %v587_v13 }
 0x167   :  { %3226 = vrot.lane.b32.xlu0 %v7095_v33, %s5794_s23  ;;  %10307 = vst [vmem:[#allocation85_spill] sm:$0xff] %v7117_v20  ;;  %v7131_v33 = vcombine.high %v7117_v20, %v7117_v20  ;;  %10311 = vst [vmem:[#allocation89_spill] sm:$0xff] %v7133_v25  ;;  %v7146_v20 = vrot.slane %v1169_v27, %v6147_v5  ;;  %v466_v13 = vadd.f32 %v7039_v53, %v465_v15 }
 0x168   :  { %2412 = vrot.lane.b32.xlu1 %v7022_v22, %s5795_s24  ;;  %v2642_v34 = vcombine.low %v776_v37, %v6531_v32  ;;  %v1585_v11 = vcombine.low %v768_v28, %v776_v37  ;;  %10312 = vst [vmem:[#allocation90_spill] sm:$0xff] %v7140_v60  ;;  %v7143_v31 = vpop.permute.xlu0 %3142  ;;  %v10315_v28 = vcombine.low %v6539_v19, %v6542_v35 }
 0x169   :  { %10310 = vst [vmem:[#allocation88_spill] sm:$0xff] %v7131_v33  ;;  %10313 = vst [vmem:[#allocation91_spill] sm:$0xff] %v7143_v31  ;;  %v461_v32 = vadd.f32 %v7039_v53, %v460_v29  ;;  %v1600_v25 = vrot.slane %v1586_v12, %v6147_v5  ;;  %v7163_v19 = vrot.slane %v586_v63, %v6147_v5  ;;  %v7181_v63 = vmax.f32 %v466_v13, 0.0 }
 0x16a   :  { %v2650_v38 = vrot.slane %v2642_v34, %v6147_v5  ;;  %10314 = vst [vmem:[#allocation92_spill] sm:$0xff] %v7146_v20  ;;  %v2657_v37 = vrot.slane %v10315_v28, %v6147_v5  ;;  %v521_v34 = vadd.f32 %v7039_v53, %v6387_v0  ;;  %v1593_v24 = vrot.slane %v1585_v11, %v6147_v5 }
 0x16b   :  { %v576_v27 = vmax.f32 %v461_v32, 0.0  ;;  %v7166_v29 = vrot.slane %v1373_v39, %v6147_v5  ;;  %v7172_v15 = vcombine.high %v7146_v20, %v7146_v20  ;;  %v1371_v13 = vcombine.high %v7163_v19, %v7163_v19 }
 0x16c   :  { %3418 = vrot.lane.b32.xlu1 %v7140_v60, %s5793_s22  ;;  %v7159_v9 = vcombine.low %v2650_v38, %v2657_v37  ;;  %v588_v28 = vmax.f32 %v521_v34, 0.0  ;;  %v7192_v34 = vcombine.low %v1593_v24, %v1600_v25 }
 0x16d   :  { %v7168_v31 = vpop.permute.xlu1 %2468  ;;  %10318 = vst [vmem:[#allocation95_spill] sm:$0xff] %v7172_v15  ;;  %v1186_v0 = vcombine.high %v576_v27, %v576_v27  ;;  %v7177_v38 = vrot.slane %v576_v27, %v6147_v5  ;;  %v1389_v39 = vcombine.high %v7166_v29, %v7166_v29  ;;  %v526_v27 = vadd.f32 %v7039_v53, %v6421_v58 }
 0x16e   :  { %10316 = vst [vmem:[#allocation93_spill] sm:$0xff] %v7159_v9  ;;  %10317 = vst [vmem:[#allocation94_spill] sm:$0xff] %v7168_v31  ;;  %3158 = vrot.lane.b32.xlu0 %v7159_v9, %s5794_s23  ;;  %v7179_v11 = vpop.permute.xlu0 %2400  ;;  %v1390_v12 = vcombine.high %v588_v28, %v588_v28  ;;  %v7199_v31 = vrot.slane %v588_v28, %v6147_v5  ;;  %v7214_v58 = vrot.slane %v7181_v63, %v6147_v5 }
 0x16f   :  { %10319 = vst [vmem:[#allocation96_spill] sm:$0xff] %v7177_v38  ;;  %10320 = vst [vmem:[#allocation97_spill] sm:$0xff] %v7179_v11  ;;  %v7188_v37 = vrot.slane %v1186_v0, %v6147_v5  ;;  %v1355_v0 = vcombine.high %v7087_v55, %v7087_v55  ;;  %v3092_v28 = vcombine.low %v1371_v13, %v7092_v1 }
 0x170   :  { %3512 = vrot.lane.b32.xlu1 %v7022_v22, %s5796_s25  ;;  %10322 = vst [vmem:[#allocation99_spill] sm:$0xff] %v7192_v34  ;;  %v7202_v11 = vrot.slane %v1390_v12, %v6147_v5  ;;  %10325 = vst [vmem:[#allocation102_spill] sm:$0xff] %v7214_v58  ;;  %v2060_v12 = vcombine.low %v1389_v39, %v7199_v31  ;;  %v7236_v39 = vcombine.high %v6568_v44, %v6568_v44 }
 0x171   :  { %10321 = vst [vmem:[#allocation98_spill] sm:$0xff] %v7188_v37  ;;  %v7206_v22 = vpop.permute.xlu1 %3144  ;;  %v7210_v25 = vcombine.high %v7188_v37, %v7188_v37  ;;  %v2307_v33 = vrot.slane %v1355_v0, %v6147_v5  ;;  %v3084_v45 = vcombine.low %v7087_v55, %v1355_v0  ;;  %v2389_v55 = vrot.slane %v6940_v6, 1 }
 0x172   :  { %10323 = vst [vmem:[#allocation100_spill] sm:$0xff] %v7206_v22  ;;  %3348 = vrot.lane.b32.xlu0 %v7192_v34, %s5793_s22  ;;  %v7218_v24 = vpop.permute.xlu0 %3214  ;;  %v589_v22 = vmax.f32 %v526_v27, 0.0  ;;  %v7226_v9 = vcombine.high %v7202_v11, %v7202_v11  ;;  %v3100_v0 = vrot.slane %v3092_v28, %v6147_v5  ;;  %v7265_v28 = vcombine.high %v7199_v31, %v7199_v31 }
 0x173   :  { %10324 = vst [vmem:[#allocation101_spill] sm:$0xff] %v7210_v25  ;;  %10326 = vst [vmem:[#allocation103_spill] sm:$0xff] %v7218_v24  ;;  %v793_v24 = vcombine.high %v6542_v35, %v6542_v35  ;;  %v7244_v58 = vrot.slane %v3084_v45, %v6147_v5  ;;  %v2308_v25 = vcombine.low %v7140_v60, %v2307_v33 }
 0x174   :  { %v7239_v32 = vrot.slane %v589_v22, %v6147_v5  ;;  %v1611_v33 = vcombine.low %v7236_v39, %v6561_v2  ;;  %v2036_v6 = vcombine.low %v7092_v1, %v7109_v36 }
 0x175   :  { %v7230_v20 = vpop.permute.xlu1 %3568  ;;  %10329 = vst [vmem:[#allocation106_spill] sm:$0xff] %v7244_v58  ;;  %3228 = vrot.lane.b32.xlu1 %v7244_v58, %s5794_s23  ;;  %v7253_v15 = vrot.slane %v2308_v25, 1  ;;  %v1602_v58 = vcombine.low %v6542_v35, %v793_v24 }
 0x176   :  { %10327 = vst [vmem:[#allocation104_spill] sm:$0xff] %v7230_v20  ;;  %v7241_v27 = vpop.permute.xlu0 %3404 }
 0x177   :  { %10328 = vst [vmem:[#allocation105_spill] sm:$0xff] %v7241_v27  ;;  %10330 = vst [vmem:[#allocation107_spill] sm:$0xff] %v7253_v15  ;;  %v10331_v27 = vcombine.low %v7109_v36, %v7114_v50  ;;  %v7272_v25 = vsel %vm2325_vm3, %v2389_v55, %v7253_v15  ;;  %v2061_v55 = vcombine.low %v7265_v28, %v7202_v11 }
 0x178   :  { %10334 = vst [vmem:[#allocation110_spill] sm:$0xff] %v7272_v25  ;;  %2482 = vrot.lane.b32.xlu0 %v7272_v25, %s5795_s24  ;;  %v7299_v36 = vrot.slane %v1602_v58, %v6147_v5 }
 0x179   :  { %v3107_v45 = vrot.slane %v10331_v27, %v6147_v5  ;;  %v7259_v37 = vpop.permute.xlu1 %3216  ;;  %v2659_v27 = vcombine.low %v793_v24, %v6552_v10  ;;  %2484 = vrot.lane.b32.xlu1 %v7253_v15, %s5795_s24  ;;  %v1618_v24 = vrot.slane %v6581_v23, %v6147_v5  ;;  %v1635_v23 = vcombine.low %v6632_v57, %v6655_v62 }
 0x17a   :  { %10332 = vst [vmem:[#allocation108_spill] sm:$0xff] %v7259_v37  ;;  %v7267_v20 = vpop.permute.xlu0 %2398  ;;  %v2035_v37 = vcombine.low %v7163_v19, %v1371_v13  ;;  %v2171_v19 = vrot.slane %v6552_v10, %v6147_v5  ;;  %10339 = vst [vmem:[#allocation115_spill] sm:$0xff] %v7299_v36  ;;  %v829_v13 = vcombine.high %v6636_v59, %v6636_v59 }
 0x17b   :  { %10333 = vst [vmem:[#allocation109_spill] sm:$0xff] %v7267_v20  ;;  %v7274_v60 = vcombine.low %v3100_v0, %v3107_v45  ;;  %v1407_v0 = vcombine.high %v589_v22, %v589_v22  ;;  %v1625_v20 = vrot.slane %v1611_v33, %v6147_v5  ;;  %v7296_v1 = vrot.slane %v2659_v27, %v6147_v5 }
 0x17c   :  { %3582 = vrot.lane.b32.xlu0 %v7272_v25, %s5796_s25  ;;  %v7311_v10 = vcombine.high %v6659_v46, %v6659_v46  ;;  %v2043_v33 = vrot.slane %v2035_v37, %v6147_v5  ;;  %v2068_v57 = vrot.slane %v2060_v12, %v6147_v5  ;;  %v2172_v37 = vcombine.low %v7299_v36, %v2171_v19 }
 0x17d   :  { %10335 = vst [vmem:[#allocation111_spill] sm:$0xff] %v7274_v60  ;;  %v7284_v35 = vpop.permute.xlu1 %3406  ;;  %10338 = vst [vmem:[#allocation114_spill] sm:$0xff] %v7296_v1  ;;  %v7305_v22 = vcombine.low %v1618_v24, %v1625_v20  ;;  %3160 = vrot.lane.b32.xlu1 %v7296_v1, %s5794_s23  ;;  %v7319_v59 = vrot.slane %v1407_v0, %v6147_v5  ;;  %v2050_v20 = vrot.slane %v2036_v6, %v6147_v5 }
 0x17e   :  { %10336 = vst [vmem:[#allocation112_spill] sm:$0xff] %v7284_v35  ;;  %v7288_v45 = vpop.permute.xlu0 %3336  ;;  %v2075_v24 = vrot.slane %v2061_v55, %v6147_v5  ;;  %v7328_v35 = vrot.slane %v6606_v49, %v6147_v5  ;;  %v531_v25 = vadd.f32 %v7039_v53, %v6672_v51  ;;  %v7334_v0 = vrot.slane %v829_v13, %v6147_v5 }
 0x17f   :  { %10337 = vst [vmem:[#allocation113_spill] sm:$0xff] %v7288_v45  ;;  %10340 = vst [vmem:[#allocation116_spill] sm:$0xff] %v7305_v22  ;;  %v7338_v6 = vrot.slane %v6682_v41, %v6147_v5  ;;  %v536_v49 = vadd.f32 %v7039_v53, %v6741_v8  ;;  %v1636_v55 = vcombine.low %v6659_v46, %v7311_v10  ;;  %v7366_v45 = vrot.slane %v2172_v37, 1 }
 0x180   :  { %3230 = vrot.lane.b32.xlu0 %v7274_v60, %s5794_s23  ;;  %v7342_v12 = vcombine.low %v2068_v57, %v2075_v24  ;;  %v861_v51 = vcombine.high %v7328_v35, %v7328_v35  ;;  %v1388_v19 = vcombine.high %v7114_v50, %v7114_v50  ;;  %v590_v13 = vmax.f32 %v531_v25, 0.0 }
 0x181   :  { %v7316_v58 = vpop.permute.xlu1 %3338  ;;  %3350 = vrot.lane.b32.xlu1 %v7299_v36, %s5793_s22  ;;  %v1643_v57 = vrot.slane %v1635_v23, %v6147_v5  ;;  %v7359_v8 = vcombine.high %v7319_v59, %v7319_v59  ;;  %v7361_v24 = vcombine.low %v2043_v33, %v2050_v20  ;;  %10348 = vst [vmem:[#allocation124_spill] sm:$0xff] %v7366_v45 }
 0x182   :  { %10341 = vst [vmem:[#allocation117_spill] sm:$0xff] %v7316_v58  ;;  %v7322_v27 = vpop.permute.xlu0 %3146  ;;  %10343 = vst [vmem:[#allocation119_spill] sm:$0xff] %v7342_v12  ;;  %v591_v58 = vmax.f32 %v536_v49, 0.0  ;;  %v1424_v1 = vcombine.high %v590_v13, %v590_v13  ;;  %v7369_v36 = vrot.slane %v590_v13, %v6147_v5  ;;  %v7373_v25 = vcombine.high %v6702_v47, %v6702_v47 }
 0x183   :  { %10342 = vst [vmem:[#allocation118_spill] sm:$0xff] %v7322_v27  ;;  %10345 = vst [vmem:[#allocation121_spill] sm:$0xff] %v7359_v8  ;;  %v2338_v27 = vrot.slane %v7192_v34, 1  ;;  %v7377_v23 = vcombine.high %v7338_v6, %v7338_v6  ;;  %v2052_v37 = vcombine.low %v7114_v50, %v1388_v19  ;;  %v2667_v53 = vcombine.low %v6568_v44, %v7236_v39 }
 0x184   :  { %10346 = vst [vmem:[#allocation122_spill] sm:$0xff] %v7361_v24  ;;  %3420 = vrot.lane.b32.xlu0 %v7361_v24, %s5793_s22  ;;  %v1441_v33 = vcombine.high %v591_v58, %v591_v58  ;;  %v7382_v20 = vrot.slane %v591_v58, %v6147_v5  ;;  %v7390_v13 = vrot.slane %v1424_v1, %v6147_v5 }
 0x185   :  { %v7354_v41 = vpop.permute.xlu1 %2472  ;;  %3584 = vrot.lane.b32.xlu1 %v7253_v15, %s5796_s25  ;;  %v3311_v58 = vcombine.low %v7319_v59, %v7359_v8  ;;  %v2693_v1 = vcombine.low %v7311_v10, %v7334_v0  ;;  %v1660_v8 = vcombine.low %v861_v51, %v6639_v14 }
 0x186   :  { %10344 = vst [vmem:[#allocation120_spill] sm:$0xff] %v7354_v41  ;;  %v7363_v60 = vpop.permute.xlu0 %2470  ;;  %10349 = vst [vmem:[#allocation125_spill] sm:$0xff] %v7382_v20  ;;  %v7394_v41 = vcombine.high %v7369_v36, %v7369_v36  ;;  %v7403_v50 = vrot.slane %v1441_v33, %v6147_v5  ;;  %v1456_v15 = vcombine.high %v7382_v20, %v7382_v20 }
 0x187   :  { %10347 = vst [vmem:[#allocation123_spill] sm:$0xff] %v7363_v60  ;;  %v3109_v60 = vcombine.low %v1388_v19, %v7166_v29  ;;  %v2707_v59 = vrot.slane %v2693_v1, %v6147_v5  ;;  %v2718_v20 = vcombine.low %v6702_v47, %v7373_v25 }
 0x188   :  { %10352 = vst [vmem:[#allocation128_spill] sm:$0xff] %v7403_v50  ;;  %v3312_v33 = vcombine.low %v7369_v36, %v7394_v41  ;;  %v7425_v10 = vcombine.low %v1456_v15, %v7403_v50 }
 0x189   :  { %v7387_v49 = vpop.permute.xlu1 %3148  ;;  %2416 = vrot.lane.b32.xlu1 %v7366_v45, %s5795_s24  ;;  %v7455_v15 = vrot.slane %v3109_v60, %v6147_v5  ;;  %v7474_v60 = vcombine.high %v6772_v21, %v6772_v21 }
 0x18a   :  { %10350 = vst [vmem:[#allocation126_spill] sm:$0xff] %v7387_v49  ;;  %v7400_v34 = vpop.permute.xlu0 %3570  ;;  %v7411_v49 = vsel %vm2325_vm3, %v2338_v27, %v7366_v45  ;;  %10355 = vst [vmem:[#allocation131_spill] sm:$0xff] %v7425_v10  ;;  %v10356_v27 = vcombine.low %v6655_v62, %v6659_v46  ;;  %v1650_v10 = vrot.slane %v1636_v55, %v6147_v5  ;;  %v10358_v46 = vld [vmem:[#allocation32_spill] sm:$0xff] }
 0x18b   :  { %10351 = vst [vmem:[#allocation127_spill] sm:$0xff] %v7400_v34  ;;  %10353 = vst [vmem:[#allocation129_spill] sm:$0xff] %v7411_v49  ;;  %v7418_v34 = vcombine.high %v7390_v13, %v7390_v13  ;;  %2414 = vrot.lane.b32.xlu0 %v7411_v49, %s5795_s24  ;;  %v2717_v62 = vcombine.low %v6639_v14, %v6676_v54  ;;  %v2742_v1 = vcombine.low %v7377_v23, %v10358_v46 }
 0x18c   :  { %v2700_v19 = vrot.slane %v10356_v27, %v6147_v5  ;;  %v10359_v27 = vld [vmem:[#allocation27_spill] sm:$0xff]  ;;  %v7458_v55 = vrot.slane %v2052_v37, %v6147_v5  ;;  %v7460_v14 = vcombine.low %v1643_v57, %v1650_v10  ;;  %10364 = vst [vmem:[#allocation135_spill] sm:$0xff] %v7474_v60  ;;  %v1668_v37 = vrot.slane %v1660_v8, %v6147_v5 }
 0x18d   :  { %10354 = vst [vmem:[#allocation130_spill] sm:$0xff] %v7418_v34  ;;  %v7437_v38 = vpop.permute.xlu1 %3572  ;;  %v2668_v44 = vcombine.low %v6561_v2, %v10359_v27  ;;  %10361 = vst [vmem:[#allocation27_spill] sm:$0xff] %v7455_v15  ;;  %v3319_v2 = vrot.slane %v3311_v58, %v6147_v5  ;;  %3232 = vrot.lane.b32.xlu1 %v7455_v15, %s5794_s23  ;;  %v10366_v58 = vcombine.low %v6676_v54, %v6702_v47 }
 0x18e   :  { %10357 = vst [vmem:[#allocation132_spill] sm:$0xff] %v7437_v38  ;;  %v7448_v39 = vpop.permute.xlu0 %3408  ;;  %v7450_v51 = vcombine.low %v2700_v19, %v2707_v59  ;;  %v2315_v38 = vrot.slane %v7166_v29, %v6147_v5  ;;  %10362 = vst [vmem:[#allocation133_spill] sm:$0xff] %v7458_v55  ;;  %v3326_v59 = vrot.slane %v3312_v33, %v6147_v5 }
 0x18f   :  { %10360 = vst [vmem:[#allocation32_spill] sm:$0xff] %v7448_v39  ;;  %10363 = vst [vmem:[#allocation134_spill] sm:$0xff] %v7460_v14  ;;  %3514 = vrot.lane.b32.xlu0 %v7411_v49, %s5796_s25  ;;  %v7470_v29 = vcombine.high %v7334_v0, %v7334_v0  ;;  %v1675_v33 = vrot.slane %v10366_v58, %v6147_v5  ;;  %v2675_v10 = vrot.slane %v2667_v53, %v6147_v5 }
 0x190   :  { %v2682_v19 = vrot.slane %v2668_v44, %v6147_v5  ;;  %v7489_v49 = vcombine.low %v3319_v2, %v3326_v59  ;;  %v2316_v8 = vcombine.low %v7458_v55, %v2315_v38  ;;  %v2725_v47 = vrot.slane %v2717_v62, %v6147_v5  ;;  %v10372_v38 = vld [vmem:[#allocation35_spill] sm:$0xff] }
 0x191   :  { %v7478_v57 = vpop.permute.xlu1 %2404  ;;  %v7497_v54 = vcombine.low %v1668_v37, %v1675_v33  ;;  %v2732_v53 = vrot.slane %v2718_v20, %v6147_v5  ;;  %v1711_v44 = vcombine.low %v7474_v60, %v6784_v4  ;;  %3422 = vrot.lane.b32.xlu1 %v7458_v55, %s5793_s22  ;;  %v963_v37 = vcombine.high %v6822_v56, %v6822_v56  ;;  %v10376_v55 = vld [vmem:[#allocation28_spill] sm:$0xff] }
 0x192   :  { %10365 = vst [vmem:[#allocation136_spill] sm:$0xff] %v7478_v57  ;;  %10368 = vst [vmem:[#allocation138_spill] sm:$0xff] %v7489_v49  ;;  %v2750_v57 = vrot.slane %v2742_v1, %v6147_v5  ;;  %v10371_v1 = vld [vmem:[#allocation34_spill] sm:$0xff]  ;;  %v980_v62 = vcombine.high %v6834_v18, %v6834_v18  ;;  %v7515_v20 = vcombine.low %v2675_v10, %v2682_v19  ;;  %v7524_v50 = vrot.slane %v2316_v8, 1  ;;  %v10379_v19 = vld [vmem:[#allocation43_spill] sm:$0xff] }
 0x193   :  { %3352 = vrot.lane.b32.xlu0 %v7305_v22, %s5793_s22  ;;  %10369 = vst [vmem:[#allocation139_spill] sm:$0xff] %v7497_v54  ;;  %v10373_v59 = vcombine.low %v10371_v1, %v10372_v38  ;;  %v7519_v15 = vcombine.low %v2725_v47, %v2732_v53  ;;  %v1735_v4 = vcombine.low %v6807_v7, %v6817_v26  ;;  %v10380_v53 = vld [vmem:[#allocation48_spill] sm:$0xff] }
 0x194   :  { %10374 = vst [vmem:[#allocation34_spill] sm:$0xff] %v7515_v20  ;;  %10377 = vst [vmem:[#allocation28_spill] sm:$0xff] %v7524_v50  ;;  %v7532_v10 = vcombine.high %v6869_v42, %v6869_v42  ;;  %v1718_v47 = vrot.slane %v10379_v19, %v6147_v5  ;;  %v1082_v8 = vcombine.high %v6983_v40, %v6983_v40 }
 0x195   :  { %v7487_v39 = vpop.permute.xlu0 %3502  ;;  %v7505_v2 = vpop.permute.xlu1 %3410  ;;  %v2757_v58 = vrot.slane %v10373_v59, %v6147_v5  ;;  %3516 = vrot.lane.b32.xlu1 %v7366_v45, %s5796_s25  ;;  %v1725_v7 = vrot.slane %v1711_v44, %v6147_v5  ;;  %v10388_v45 = vld [vmem:[#allocation53_spill] sm:$0xff] }
 0x196   :  { %10367 = vst [vmem:[#allocation137_spill] sm:$0xff] %v7487_v39  ;;  %10370 = vst [vmem:[#allocation140_spill] sm:$0xff] %v7505_v2  ;;  %v827_v2 = vcombine.high %v10376_v55, %v10376_v55  ;;  %v2392_v39 = vrot.slane %v7361_v24, 1  ;;  %v10382_v24 = vld [vmem:[#allocation52_spill] sm:$0xff] }
 0x197   :  { %v7526_v59 = vcombine.low %v2750_v57, %v2757_v58  ;;  %10378 = vst [vmem:[#allocation141_spill] sm:$0xff] %v7532_v10  ;;  %3162 = vrot.lane.b32.xlu0 %v7515_v20, %s5794_s23  ;;  %v1736_v58 = vcombine.low %v6822_v56, %v963_v37  ;;  %v1760_v18 = vcombine.low %v980_v62, %v10382_v24 }
 0x198   :  { %v1203_v20 = vcombine.high %v7181_v63, %v7181_v63  ;;  %v7555_v21 = vsel %vm2325_vm3, %v2392_v39, %v7524_v50  ;;  %v1743_v62 = vrot.slane %v1735_v4, %v6147_v5  ;;  %v2817_v63 = vcombine.low %v10382_v24, %v10388_v45 }
 0x199   :  { %v7517_v33 = vpop.permute.xlu0 %3218  ;;  %v7543_v57 = vpop.permute.xlu1 %3504  ;;  %10384 = vst [vmem:[#allocation142_spill] sm:$0xff] %v7555_v21  ;;  %v10389_v39 = vcombine.low %v6817_v26, %v6822_v56  ;;  %v1750_v26 = vrot.slane %v1736_v58, %v6147_v5  ;;  %v1768_v56 = vrot.slane %v1760_v18, %v6147_v5 }
 0x19a   :  { %10375 = vst [vmem:[#allocation35_spill] sm:$0xff] %v7517_v33  ;;  %v2793_v33 = vcombine.low %v963_v37, %v10380_v53  ;;  %10381 = vst [vmem:[#allocation43_spill] sm:$0xff] %v7543_v57  ;;  %v2179_v53 = vrot.slane %v827_v2, %v6147_v5  ;;  %v10385_v57 = vcombine.low %v10359_v27, %v10376_v55 }
 0x19b   :  { %v7563_v37 = vcombine.low %v1718_v47, %v1725_v7  ;;  %2486 = vrot.lane.b32.xlu0 %v7555_v21, %s5795_s24  ;;  %v2800_v27 = vrot.slane %v10389_v39, %v6147_v5  ;;  %v1785_v47 = vcombine.low %v6961_v52, %v6980_v30  ;;  %v7585_v7 = vrot.slane %v1203_v20, %v6147_v5 }
 0x19c   :  { %v7561_v44 = vrot.slane %v10385_v57, %v6147_v5  ;;  %v1786_v57 = vcombine.low %v6983_v40, %v1082_v8  ;;  %v2807_v24 = vrot.slane %v2793_v33, %v6147_v5  ;;  %v2684_v39 = vcombine.low %v10376_v55, %v827_v2 }
 0x19d   :  { %v7550_v19 = vpop.permute.xlu0 %3150  ;;  %10387 = vst [vmem:[#allocation144_spill] sm:$0xff] %v7563_v37  ;;  %v7579_v4 = vpop.permute.xlu1 %2402  ;;  %v10393_v33 = vcombine.low %v10388_v45, %v6869_v42  ;;  %v7601_v20 = vcombine.low %v1743_v62, %v1750_v26  ;;  %v2825_v58 = vrot.slane %v2817_v63, %v6147_v5  ;;  %v2843_v55 = vcombine.low %v1082_v8, %v6986_v17 }
 0x19e   :  { %10383 = vst [vmem:[#allocation52_spill] sm:$0xff] %v7550_v19  ;;  %10386 = vst [vmem:[#allocation143_spill] sm:$0xff] %v7561_v44  ;;  %v2818_v19 = vcombine.low %v6869_v42, %v7532_v10  ;;  %3354 = vrot.lane.b32.xlu1 %v7561_v44, %s5793_s22  ;;  %v2180_v37 = vcombine.low %v7561_v44, %v2179_v53  ;;  %v7593_v60 = vcombine.low %v2800_v27, %v2807_v24 }
 0x19f   :  { %10390 = vst [vmem:[#allocation53_spill] sm:$0xff] %v7579_v4  ;;  %v1775_v52 = vrot.slane %v10393_v33, %v6147_v5  ;;  %3586 = vrot.lane.b32.xlu0 %v7555_v21, %s5796_s25  ;;  %10394 = vst [vmem:[#allocation147_spill] sm:$0xff] %v7601_v20  ;;  %v1793_v42 = vrot.slane %v1785_v47, %v6147_v5  ;;  %v1800_v45 = vrot.slane %v1786_v57, %v6147_v5  ;;  %v10446_v4 = vld [vmem:[#allocation86_spill] sm:$0xff] }
 0x1a0   :  { %10392 = vst [vmem:[#allocation146_spill] sm:$0xff] %v7593_v60  ;;  %v2832_v18 = vrot.slane %v2818_v19, %v6147_v5  ;;  %v7616_v62 = vcombine.high %v7585_v7, %v7585_v7  ;;  %v1099_v8 = vcombine.high %v7003_v16, %v7003_v16  ;;  %v7625_v27 = vrot.slane %v2684_v39, %v6147_v5 }
 0x1a1   :  { %v7587_v10 = vpop.permute.xlu0 %3340  ;;  %v7608_v2 = vpop.permute.xlu1 %3220  ;;  %v7610_v53 = vcombine.low %v1768_v56, %v1775_v52  ;;  %v2341_v24 = vrot.slane %v7305_v22, 1  ;;  %v7628_v26 = vrot.slane %v2180_v37, 1  ;;  %v7634_v57 = vcombine.high %v7034_v48, %v7034_v48 }
 0x1a2   :  { %10391 = vst [vmem:[#allocation145_spill] sm:$0xff] %v7587_v10  ;;  %2488 = vrot.lane.b32.xlu1 %v7524_v50, %s5795_s24  ;;  %10395 = vst [vmem:[#allocation148_spill] sm:$0xff] %v7608_v2  ;;  %v7620_v19 = vcombine.low %v2825_v58, %v2832_v18  ;;  %v10400_v56 = vcombine.low %v6980_v30, %v6983_v40  ;;  %v7647_v37 = vrot.slane %v2843_v55, %v6147_v5 }
 0x1a3   :  { %10396 = vst [vmem:[#allocation149_spill] sm:$0xff] %v7610_v53  ;;  %10398 = vst [vmem:[#allocation151_spill] sm:$0xff] %v7628_v26  ;;  %3424 = vrot.lane.b32.xlu0 %v7342_v12, %s5793_s22  ;;  %v2967_v33 = vcombine.low %v7585_v7, %v7616_v62  ;;  %v3117_v52 = vcombine.low %v7199_v31, %v7265_v28  ;;  %v3118_v58 = vcombine.low %v7202_v11, %v7226_v9 }
 0x1a4   :  { %v7644_v39 = vrot.slane %v10400_v56, %v6147_v5  ;;  %v7657_v2 = vcombine.low %v1793_v42, %v1800_v45  ;;  %v1810_v40 = vcombine.low %v1099_v8, %v7015_v43  ;;  %v7662_v30 = vsel %vm2325_vm3, %v2341_v24, %v7628_v26  ;;  %v10404_v56 = vld [vmem:[#allocation6_spill] sm:$0xff] }
 0x1a5   :  { %v7618_v63 = vpop.permute.xlu0 %2474  ;;  %v7638_v47 = vpop.permute.xlu1 %2476  ;;  %10403 = vst [vmem:[#allocation155_spill] sm:$0xff] %v7662_v30  ;;  %v2867_v31 = vcombine.low %v7015_v43, %v7030_v61  ;;  %v2868_v28 = vcombine.low %v7034_v48, %v7634_v57  ;;  %v3125_v42 = vrot.slane %v3117_v52, %v6147_v5  ;;  %v3132_v45 = vrot.slane %v3118_v58, %v6147_v5 }
 0x1a6   :  { %10397 = vst [vmem:[#allocation150_spill] sm:$0xff] %v7618_v63  ;;  %3164 = vrot.lane.b32.xlu1 %v7625_v27, %s5794_s23  ;;  %10399 = vst [vmem:[#allocation152_spill] sm:$0xff] %v7638_v47  ;;  %v10405_v47 = vld [vmem:[#allocation5_spill] sm:$0xff]  ;;  %v2975_v24 = vrot.slane %v2967_v33, %v6147_v5  ;;  %v10408_v43 = vcombine.low %v7226_v9, %v7239_v32  ;;  %v10410_v52 = vcombine.low %v7030_v61, %v7034_v48 }
 0x1a7   :  { %10402 = vst [vmem:[#allocation154_spill] sm:$0xff] %v7657_v2  ;;  %v2968_v63 = vcombine.low %v10405_v47, %v10404_v56  ;;  %2418 = vrot.lane.b32.xlu0 %v7662_v30, %s5795_s24  ;;  %v1422_v56 = vcombine.high %v7239_v32, %v7239_v32  ;;  %v2875_v21 = vrot.slane %v2867_v31, %v6147_v5 }
 0x1a8   :  { %v7689_v55 = vrot.slane %v10408_v43, %v6147_v5  ;;  %v1825_v58 = vrot.slane %v10410_v52, %v6147_v5  ;;  %v7709_v43 = vcombine.low %v3125_v42, %v3132_v45 }
 0x1a9   :  { %v7655_v18 = vpop.permute.xlu0 %3574  ;;  %v2982_v33 = vrot.slane %v2968_v63, %v6147_v5  ;;  %v2323_v52 = vrot.slane %v1422_v56, %v6147_v5  ;;  %v3134_v63 = vcombine.low %v7239_v32, %v1422_v56 }
 0x1aa   :  { %10401 = vst [vmem:[#allocation153_spill] sm:$0xff] %v7655_v18  ;;  %2420 = vrot.lane.b32.xlu1 %v7628_v26, %s5795_s24  ;;  %v7674_v11 = vpop.permute.xlu1 %3152  ;;  %10409 = vst [vmem:[#allocation156_spill] sm:$0xff] %v7689_v55  ;;  %v1818_v18 = vrot.slane %v1810_v40, %v6147_v5  ;;  %v7707_v40 = vrot.slane %v7008_v3, %v6147_v5 }
 0x1ab   :  { %10406 = vst [vmem:[#allocation6_spill] sm:$0xff] %v7674_v11  ;;  %3518 = vrot.lane.b32.xlu0 %v7662_v30, %s5796_s25  ;;  %10413 = vst [vmem:[#allocation159_spill] sm:$0xff] %v7709_v43  ;;  %v7713_v61 = vcombine.low %v2975_v24, %v2982_v33  ;;  %v2882_v11 = vrot.slane %v2868_v28, %v6147_v5  ;;  %v7734_v32 = vrot.slane %v3134_v63, %v6147_v5  ;;  %v10419_v24 = vld [vmem:[#allocation77_spill] sm:$0xff] }
 0x1ac   :  { %v7703_v9 = vcombine.low %v1818_v18, %v1825_v58  ;;  %v7731_v45 = vcombine.high %v7707_v40, %v7707_v40  ;;  %v2324_v31 = vcombine.low %v7689_v55, %v2323_v52  ;;  %v1652_v28 = vcombine.low %v7334_v0, %v7470_v29 }
 0x1ad   :  { %v7680_v8 = vpop.permute.xlu0 %3222  ;;  %10415 = vst [vmem:[#allocation161_spill] sm:$0xff] %v7713_v61  ;;  %v7725_v18 = vcombine.low %v2875_v21, %v2882_v11  ;;  %10418 = vst [vmem:[#allocation164_spill] sm:$0xff] %v7734_v32  ;;  %v2187_v58 = vrot.slane %v7328_v35, %v6147_v5  ;;  %v2395_v0 = vrot.slane %v7342_v12, 1  ;;  %v10429_v12 = vld [vmem:[#allocation79_spill] sm:$0xff] }
 0x1ae   :  { %10407 = vst [vmem:[#allocation5_spill] sm:$0xff] %v7680_v8  ;;  %3426 = vrot.lane.b32.xlu1 %v7689_v55, %s5793_s22  ;;  %v7701_v8 = vpop.permute.xlu1 %3342  ;;  %10412 = vst [vmem:[#allocation158_spill] sm:$0xff] %v7703_v9  ;;  %v2892_v21 = vcombine.low %v7731_v45, %v10419_v24  ;;  %v7751_v33 = vrot.slane %v2324_v31, 1  ;;  %v7755_v52 = vrot.slane %v1652_v28, %v6147_v5 }
 0x1af   :  { %10411 = vst [vmem:[#allocation157_spill] sm:$0xff] %v7701_v8  ;;  %3234 = vrot.lane.b32.xlu0 %v7709_v43, %s5794_s23  ;;  %v10428_v28 = vcombine.low %v7470_v29, %v7328_v35 }
 0x1b0   :  { %10422 = vst [vmem:[#allocation166_spill] sm:$0xff] %v7751_v33  ;;  %10423 = vst [vmem:[#allocation167_spill] sm:$0xff] %v7755_v52  ;;  %v2900_v63 = vrot.slane %v2892_v21, %v6147_v5  ;;  %v7770_v55 = vsel %vm2325_vm3, %v2395_v0, %v7751_v33  ;;  %v2188_v21 = vcombine.low %v7755_v52, %v2187_v58  ;;  %v2344_v58 = vrot.slane %v7460_v14, 1 }
 0x1b1   :  { %v7711_v48 = vpop.permute.xlu0 %3412  ;;  %10427 = vst [vmem:[#allocation169_spill] sm:$0xff] %v7770_v55  ;;  %v7776_v43 = vrot.slane %v10428_v28, %v6147_v5 }
 0x1b2   :  { %10414 = vst [vmem:[#allocation160_spill] sm:$0xff] %v7711_v48  ;;  %3520 = vrot.lane.b32.xlu1 %v7628_v26, %s5796_s25  ;;  %v7723_v3 = vpop.permute.xlu1 %3576  ;;  %v10425_v48 = vld [vmem:[#allocation31_spill] sm:$0xff]  ;;  %v7795_v28 = vrot.slane %v2188_v21, 1  ;;  %v3328_v21 = vcombine.low %v7390_v13, %v7418_v34 }
 0x1b3   :  { %10416 = vst [vmem:[#allocation162_spill] sm:$0xff] %v7723_v3  ;;  %3166 = vrot.lane.b32.xlu0 %v7450_v51, %s5794_s23 }
 0x1b4   :  { %10434 = vst [vmem:[#allocation170_spill] sm:$0xff] %v7795_v28  ;;  %v7828_v10 = vrot.slane %v3328_v21, %v6147_v5 }
 0x1b5   :  { %v7727_v42 = vpop.permute.xlu0 %2406 }
 0x1b6   :  { %10417 = vst [vmem:[#allocation163_spill] sm:$0xff] %v7727_v42  ;;  %3236 = vrot.lane.b32.xlu1 %v7734_v32, %s5794_s23  ;;  %v7745_v11 = vpop.permute.xlu1 %2408  ;;  %v863_v32 = vcombine.high %v10425_v48, %v10425_v48 }
 0x1b7   :  { %10420 = vst [vmem:[#allocation77_spill] sm:$0xff] %v7745_v11  ;;  %3356 = vrot.lane.b32.xlu0 %v7460_v14, %s5793_s22 }
 0x1b8   :  { %v877_v35 = vrot.slane %v863_v32, %v6147_v5 }
 0x1b9   :  { %v7747_v56 = vpop.permute.xlu0 %3506 }
 0x1ba   :  { %10421 = vst [vmem:[#allocation165_spill] sm:$0xff] %v7747_v56  ;;  %2492 = vrot.lane.b32.xlu1 %v7751_v33, %s5795_s24  ;;  %v7762_v3 = vpop.permute.xlu1 %3224  ;;  %v10441_v56 = vld [vmem:[#allocation85_spill] sm:$0xff] }
 0x1bb   :  { %10424 = vst [vmem:[#allocation168_spill] sm:$0xff] %v7762_v3  ;;  %v10430_v3 = vld [vmem:[#allocation80_spill] sm:$0xff]  ;;  %2490 = vrot.lane.b32.xlu0 %v7770_v55, %s5795_s24  ;;  %10442 = vst [vmem:[#allocation85_spill] sm:$0xff] %v7828_v10 }
 0x1bc   :  { %v10431_v11 = vcombine.low %v10429_v12, %v10430_v3 }
 0x1bd   :  { %v7766_v31 = vpop.permute.xlu0 %3344 }
 0x1be   :  { %10426 = vst [vmem:[#allocation31_spill] sm:$0xff] %v7766_v31  ;;  %v2907_v8 = vrot.slane %v10431_v11, %v6147_v5  ;;  %3168 = vrot.lane.b32.xlu1 %v7776_v43, %s5794_s23  ;;  %v7787_v48 = vpop.permute.xlu1 %3414  ;;  %v879_v31 = vcombine.high %v877_v35, %v877_v35 }
 0x1bf   :  { %10432 = vst [vmem:[#allocation79_spill] sm:$0xff] %v7787_v48  ;;  %3428 = vrot.lane.b32.xlu0 %v7489_v49, %s5793_s22 }
 0x1c0   :  { %v7789_v0 = vcombine.low %v2900_v63, %v2907_v8  ;;  %v10437_v8 = vld [vmem:[#allocation84_spill] sm:$0xff]  ;;  %v7811_v63 = vsel %vm2325_vm3, %v2344_v58, %v7795_v28  ;;  %v2195_v42 = vrot.slane %v879_v31, %v6147_v5 }
 0x1c1   :  { %v7792_v29 = vpop.permute.xlu0 %3154  ;;  %v7807_v32 = vcombine.high %v10437_v8, %v10437_v8  ;;  %10438 = vst [vmem:[#allocation84_spill] sm:$0xff] %v7811_v63 }
 0x1c2   :  { %10433 = vst [vmem:[#allocation80_spill] sm:$0xff] %v7792_v29  ;;  %3358 = vrot.lane.b32.xlu1 %v7755_v52, %s5793_s22  ;;  %v7801_v11 = vpop.permute.xlu1 %3508  ;;  %v1677_v29 = vcombine.low %v7373_v25, %v877_v35  ;;  %v1868_v52 = vrot.slane %v10446_v4, %v6147_v5  ;;  %v2734_v4 = vcombine.low %v877_v35, %v879_v31 }
 0x1c3   :  { %10435 = vst [vmem:[#allocation171_spill] sm:$0xff] %v7801_v11  ;;  %2422 = vrot.lane.b32.xlu0 %v7811_v63, %s5795_s24  ;;  %v1861_v58 = vcombine.low %v7807_v32, %v10441_v56 }
 0x1c4   :  { %v7831_v25 = vrot.slane %v1677_v29, %v6147_v5  ;;  %v7874_v31 = vrot.slane %v2734_v4, %v6147_v5  ;;  %v10456_v4 = vld [vmem:[#allocation98_spill] sm:$0xff] }
 0x1c5   :  { %v7803_v48 = vpop.permute.xlu0 %2478  ;;  %v1875_v21 = vrot.slane %v1861_v58, %v6147_v5 }
 0x1c6   :  { %10436 = vst [vmem:[#allocation172_spill] sm:$0xff] %v7803_v48  ;;  %2424 = vrot.lane.b32.xlu1 %v7795_v28, %s5795_s24  ;;  %v7820_v48 = vpop.permute.xlu1 %3346  ;;  %10443 = vst [vmem:[#allocation175_spill] sm:$0xff] %v7831_v25 }
 0x1c7   :  { %10439 = vst [vmem:[#allocation173_spill] sm:$0xff] %v7820_v48  ;;  %3522 = vrot.lane.b32.xlu0 %v7811_v63, %s5796_s25  ;;  %v2196_v48 = vcombine.low %v7831_v25, %v2195_v42  ;;  %v7851_v63 = vcombine.low %v1868_v52, %v1875_v21  ;;  %v2347_v42 = vrot.slane %v7497_v54, 1  ;;  %v1685_v52 = vcombine.low %v7338_v6, %v7377_v23  ;;  %v10454_v23 = vld [vmem:[#allocation38_spill] sm:$0xff] }
 0x1c8   :  { %v1686_v21 = vcombine.low %v10358_v46, %v10371_v1  ;;  %v2203_v46 = vrot.slane %v10454_v23, %v6147_v5 }
 0x1c9   :  { %v7822_v11 = vpop.permute.xlu0 %3578 }
 0x1ca   :  { %10440 = vst [vmem:[#allocation174_spill] sm:$0xff] %v7822_v11  ;;  %3430 = vrot.lane.b32.xlu1 %v7828_v10, %s5793_s22  ;;  %v7837_v34 = vpop.permute.xlu1 %2480 }
 0x1cb   :  { %10444 = vst [vmem:[#allocation176_spill] sm:$0xff] %v7837_v34  ;;  %3360 = vrot.lane.b32.xlu0 %v7497_v54, %s5793_s22  ;;  %v912_v34 = vcombine.high %v10372_v38, %v10372_v38  ;;  %v10457_v54 = vld [vmem:[#allocation95_spill] sm:$0xff] }
 0x1cd   :  { %v7839_v11 = vpop.permute.xlu0 %3416 }
 0x1ce   :  { %10445 = vst [vmem:[#allocation177_spill] sm:$0xff] %v7839_v11  ;;  %3524 = vrot.lane.b32.xlu1 %v7795_v28, %s5796_s25  ;;  %v7856_v11 = vrot.slane %v2196_v48, 1  ;;  %v10458_v28 = vld [vmem:[#allocation92_spill] sm:$0xff] }
 0x1cf   :  { %3170 = vrot.lane.b32.xlu0 %v7519_v15, %s5794_s23  ;;  %v1885_v26 = vcombine.low %v10458_v28, %v10457_v54 }
 0x1d0   :  { %10448 = vst [vmem:[#allocation178_spill] sm:$0xff] %v7856_v11  ;;  %v7871_v48 = vsel %vm2325_vm3, %v2347_v42, %v7856_v11  ;;  %v1693_v42 = vrot.slane %v1685_v52, %v6147_v5 }
 0x1d1   :  { %v7860_v58 = vpop.permute.xlu0 %2410  ;;  %10450 = vst [vmem:[#allocation180_spill] sm:$0xff] %v7871_v48 }
 0x1d2   :  { %v7849_v29 = vpop.permute.xlu1 %3156  ;;  %10449 = vst [vmem:[#allocation179_spill] sm:$0xff] %v7860_v58  ;;  %3362 = vrot.lane.b32.xlu1 %v7831_v25, %s5793_s22  ;;  %v10452_v58 = vld [vmem:[#allocation96_spill] sm:$0xff]  ;;  %v1700_v25 = vrot.slane %v1686_v21, %v6147_v5 }
 0x1d3   :  { %10447 = vst [vmem:[#allocation86_spill] sm:$0xff] %v7849_v29  ;;  %v1702_v29 = vcombine.low %v10372_v38, %v912_v34  ;;  %2426 = vrot.lane.b32.xlu0 %v7871_v48, %s5795_s24  ;;  %v1201_v38 = vcombine.high %v10452_v58, %v10452_v58  ;;  %v10461_v21 = vcombine.low %v10457_v54, %v10452_v58 }
 0x1d4   :  { %v7905_v14 = vcombine.low %v1693_v42, %v1700_v25 }
 0x1d5   :  { %v7885_v6 = vrot.slane %v1702_v29, %v6147_v5  ;;  %v7889_v1 = vpop.permute.xlu0 %3510  ;;  %v1886_v52 = vcombine.low %v10452_v58, %v1201_v38 }
 0x1d6   :  { %v7876_v35 = vpop.permute.xlu1 %3580  ;;  %3172 = vrot.lane.b32.xlu1 %v7874_v31, %s5794_s23  ;;  %10455 = vst [vmem:[#allocation38_spill] sm:$0xff] %v7889_v1  ;;  %v2759_v1 = vcombine.low %v912_v34, %v10454_v23  ;;  %10460 = vst [vmem:[#allocation95_spill] sm:$0xff] %v7905_v14  ;;  %v2350_v54 = vrot.slane %v7905_v14, 1  ;;  %v10466_v23 = vld [vmem:[#allocation121_spill] sm:$0xff] }
 0x1d7   :  { %10451 = vst [vmem:[#allocation181_spill] sm:$0xff] %v7876_v35  ;;  %10453 = vst [vmem:[#allocation96_spill] sm:$0xff] %v7885_v6  ;;  %v2943_v35 = vcombine.low %v1201_v38, %v10456_v4  ;;  %3526 = vrot.lane.b32.xlu0 %v7871_v48, %s5796_s25  ;;  %v2204_v44 = vcombine.low %v7885_v6, %v2203_v46  ;;  %v2950_v48 = vrot.slane %v10461_v21, %v6147_v5 }
 0x1d8   :  { %v1893_v46 = vrot.slane %v1885_v26, %v6147_v5  ;;  %v7922_v25 = vrot.slane %v2759_v1, %v6147_v5  ;;  %v10467_v26 = vcombine.low %v10466_v23, %v7369_v36 }
 0x1d9   :  { %v2957_v28 = vrot.slane %v2943_v35, %v6147_v5  ;;  %v7914_v30 = vpop.permute.xlu0 %3226  ;;  %v7924_v38 = vrot.slane %v2204_v44, 1  ;;  %v1900_v35 = vrot.slane %v1886_v52, %v6147_v5 }
 0x1da   :  { %2428 = vrot.lane.b32.xlu1 %v7856_v11, %s5795_s24  ;;  %v7900_v29 = vpop.permute.xlu1 %2412  ;;  %10462 = vst [vmem:[#allocation92_spill] sm:$0xff] %v7914_v30  ;;  %v3679_v42 = vrot.slane %v10467_v26, %v6147_v5  ;;  %v10477_v26 = vld [vmem:[#allocation47_spill] sm:$0xff] }
 0x1db   :  { %10459 = vst [vmem:[#allocation98_spill] sm:$0xff] %v7900_v29  ;;  %3174 = vrot.lane.b32.xlu0 %v7526_v59, %s5794_s23  ;;  %v7919_v34 = vcombine.low %v2950_v48, %v2957_v28  ;;  %10464 = vst [vmem:[#allocation183_spill] sm:$0xff] %v7924_v38  ;;  %v10468_v48 = vcombine.low %v7394_v41, %v7390_v13  ;;  %v7942_v44 = vcombine.low %v1893_v46, %v1900_v35  ;;  %v10472_v28 = vld [vmem:[#allocation44_spill] sm:$0xff]  ;;  %v10475_v13 = vld [vmem:[#allocation135_spill] sm:$0xff] }
 0x1dc   :  { %v946_v36 = vcombine.high %v10472_v28, %v10472_v28  ;;  %v7952_v23 = vsel %vm2325_vm3, %v2350_v54, %v7924_v38  ;;  %v10476_v46 = vld [vmem:[#allocation40_spill] sm:$0xff]  ;;  %v10479_v54 = vcombine.low %v10477_v26, %v10472_v28 }
 0x1dd   :  { %10463 = vst [vmem:[#allocation182_spill] sm:$0xff] %v7919_v34  ;;  %v3686_v21 = vrot.slane %v10468_v48, %v6147_v5  ;;  %10469 = vst [vmem:[#allocation121_spill] sm:$0xff] %v7942_v44  ;;  %v2767_v35 = vcombine.low %v10476_v46, %v10475_v13 }
 0x1de   :  { %3528 = vrot.lane.b32.xlu1 %v7856_v11, %s5796_s25  ;;  %v7927_v58 = vpop.permute.xlu1 %3418  ;;  %10473 = vst [vmem:[#allocation44_spill] sm:$0xff] %v7952_v23  ;;  %v2784_v29 = vcombine.low %v10472_v28, %v946_v36  ;;  %v10523_v11 = vld [vmem:[#allocation58_spill] sm:$0xff] }
 0x1df   :  { %10465 = vst [vmem:[#allocation184_spill] sm:$0xff] %v7927_v58  ;;  %3364 = vrot.lane.b32.xlu0 %v7905_v14, %s5793_s22  ;;  %v7944_v1 = vcombine.low %v3679_v42, %v3686_v21  ;;  %v10478_v42 = vld [vmem:[#allocation42_spill] sm:$0xff]  ;;  %v2211_v21 = vrot.slane %v946_v36, %v6147_v5  ;;  %v7969_v58 = vrot.slane %v10479_v54, %v6147_v5  ;;  %v10492_v36 = vld [vmem:[#allocation128_spill] sm:$0xff]  ;;  %v2359_v14 = vrot.slane %v7610_v53, 1 }
 0x1e0   :  { %v7946_v52 = vpop.permute.xlu0 %3158  ;;  %v2768_v48 = vcombine.low %v10478_v42, %v10477_v26  ;;  %v2775_v13 = vrot.slane %v2767_v35, %v6147_v5  ;;  %v10483_v26 = vld [vmem:[#allocation144_spill] sm:$0xff] }
 0x1e1   :  { %10470 = vst [vmem:[#allocation185_spill] sm:$0xff] %v7944_v1  ;;  %10471 = vst [vmem:[#allocation186_spill] sm:$0xff] %v7946_v52  ;;  %v2212_v1 = vcombine.low %v7969_v58, %v2211_v21  ;;  %v2353_v35 = vrot.slane %v10483_v26, 1 }
 0x1e2   :  { %3176 = vrot.lane.b32.xlu1 %v7922_v25, %s5794_s23  ;;  %v7958_v41 = vpop.permute.xlu1 %3512  ;;  %10480 = vst [vmem:[#allocation135_spill] sm:$0xff] %v7969_v58  ;;  %v2782_v46 = vrot.slane %v2768_v48, %v6147_v5 }
 0x1e3   :  { %2430 = vrot.lane.b32.xlu0 %v7952_v23, %s5795_s24  ;;  %10474 = vst [vmem:[#allocation187_spill] sm:$0xff] %v7958_v41  ;;  %v7994_v48 = vrot.slane %v2212_v1, 1 }
 0x1e4   :  { %v7973_v30 = vpop.permute.xlu0 %3348  ;;  %v7988_v52 = vcombine.low %v2775_v13, %v2782_v46  ;;  %v10489_v13 = vld [vmem:[#allocation49_spill] sm:$0xff]  ;;  %v10490_v46 = vld [vmem:[#allocation48_spill] sm:$0xff] }
 0x1e5   :  { %10481 = vst [vmem:[#allocation40_spill] sm:$0xff] %v7973_v30  ;;  %10487 = vst [vmem:[#allocation190_spill] sm:$0xff] %v7994_v48  ;;  %v8011_v1 = vsel %vm2325_vm3, %v2353_v35, %v7994_v48 }
 0x1e6   :  { %3366 = vrot.lane.b32.xlu1 %v7885_v6, %s5793_s22  ;;  %10485 = vst [vmem:[#allocation188_spill] sm:$0xff] %v7988_v52  ;;  %10493 = vst [vmem:[#allocation49_spill] sm:$0xff] %v8011_v1  ;;  %v8016_v6 = vrot.slane %v2784_v29, %v6147_v5  ;;  %v10498_v29 = vld [vmem:[#allocation50_spill] sm:$0xff] }
 0x1e7   :  { %3530 = vrot.lane.b32.xlu0 %v7952_v23, %s5796_s25  ;;  %v7979_v42 = vpop.permute.xlu1 %3228 }
 0x1e8   :  { %10482 = vst [vmem:[#allocation47_spill] sm:$0xff] %v7979_v42  ;;  %v10488_v42 = vld [vmem:[#allocation75_spill] sm:$0xff]  ;;  %10495 = vst [vmem:[#allocation128_spill] sm:$0xff] %v8016_v6 }
 0x1ea   :  { %2432 = vrot.lane.b32.xlu1 %v7924_v38, %s5795_s24  ;;  %v7986_v54 = vpop.permute.xlu0 %2482 }
 0x1eb   :  { %3368 = vrot.lane.b32.xlu0 %v10483_v26, %s5793_s22  ;;  %10484 = vst [vmem:[#allocation42_spill] sm:$0xff] %v7986_v54  ;;  %v7991_v30 = vpop.permute.xlu1 %2484  ;;  %v540_v21 = vpop.f32.mrb[28].mxu1 }
 0x1ec   :  { %10486 = vst [vmem:[#allocation189_spill] sm:$0xff] %v7991_v30  ;;  %v541_v41 = vadd.f32 %v10488_v42, %v540_v21  ;;  %v5649_v54 = vpop.f32.mrb[29].mxu1  ;;  %v8007_v30 = vcombine.high %v10492_v36, %v10492_v36 }
 0x1ee   :  { %3532 = vrot.lane.b32.xlu1 %v7924_v38, %s5796_s25  ;;  %v1752_v38 = vcombine.low %v10490_v46, %v10489_v13  ;;  %v8003_v28 = vpop.permute.xlu0 %3582  ;;  %v8018_v42 = vmax.f32 %v541_v41, 0.0  ;;  %v2219_v46 = vrot.slane %v10498_v29, %v6147_v5 }
 0x1ef   :  { %3178 = vrot.lane.b32.xlu0 %v7988_v52, %s5794_s23  ;;  %10491 = vst [vmem:[#allocation75_spill] sm:$0xff] %v8003_v28  ;;  %v8013_v52 = vpop.permute.xlu1 %3160 }
 0x1f0   :  { %10494 = vst [vmem:[#allocation48_spill] sm:$0xff] %v8013_v52  ;;  %v8026_v54 = vrot.slane %v8018_v42, %v6147_v5  ;;  %v8031_v35 = vrot.slane %v1752_v38, %v6147_v5  ;;  %v10501_v38 = vld [vmem:[#allocation54_spill] sm:$0xff] }
 0x1f2   :  { %3370 = vrot.lane.b32.xlu1 %v7969_v58, %s5793_s22  ;;  %v8028_v21 = vpop.permute.xlu0 %3230  ;;  %10497 = vst [vmem:[#allocation192_spill] sm:$0xff] %v8031_v35 }
 0x1f3   :  { %2434 = vrot.lane.b32.xlu0 %v8011_v1, %s5795_s24  ;;  %10496 = vst [vmem:[#allocation191_spill] sm:$0xff] %v8028_v21  ;;  %v8035_v41 = vpop.permute.xlu1 %3350  ;;  %v2220_v21 = vcombine.low %v8031_v35, %v2219_v46  ;;  %v10506_v46 = vcombine.low %v10489_v13, %v10498_v29  ;;  %v10511_v13 = vld [vmem:[#allocation141_spill] sm:$0xff] }
 0x1f4   :  { %10499 = vst [vmem:[#allocation50_spill] sm:$0xff] %v8035_v41 }
 0x1f5   :  { %v8056_v41 = vrot.slane %v2220_v21, 1 }
 0x1f6   :  { %3180 = vrot.lane.b32.xlu1 %v8016_v6, %s5794_s23  ;;  %v8043_v52 = vpop.permute.xlu0 %3420  ;;  %v982_v6 = vcombine.high %v10501_v38, %v10501_v38  ;;  %v8065_v38 = vrot.slane %v10506_v46, %v6147_v5 }
 0x1f7   :  { %3534 = vrot.lane.b32.xlu0 %v8011_v1, %s5796_s25  ;;  %10500 = vst [vmem:[#allocation193_spill] sm:$0xff] %v8043_v52  ;;  %v8048_v58 = vpop.permute.xlu1 %3584  ;;  %10504 = vst [vmem:[#allocation195_spill] sm:$0xff] %v8056_v41 }
 0x1f8   :  { %10502 = vst [vmem:[#allocation54_spill] sm:$0xff] %v8048_v58  ;;  %v996_v1 = vrot.slane %v982_v6, %v6147_v5  ;;  %10507 = vst [vmem:[#allocation197_spill] sm:$0xff] %v8065_v38  ;;  %v2356_v58 = vrot.slane %v7601_v20, 1 }
 0x1fa   :  { %2436 = vrot.lane.b32.xlu1 %v7994_v48, %s5795_s24  ;;  %v8076_v6 = vsel %vm2325_vm3, %v2356_v58, %v8056_v41  ;;  %v1777_v29 = vcombine.low %v10511_v13, %v996_v1  ;;  %v10515_v58 = vld [vmem:[#allocation57_spill] sm:$0xff] }
 0x1fb   :  { %3182 = vrot.lane.b32.xlu0 %v7593_v60, %s5794_s23  ;;  %v8059_v52 = vpop.permute.xlu1 %2416  ;;  %10509 = vst [vmem:[#allocation199_spill] sm:$0xff] %v8076_v6  ;;  %v1016_v13 = vcombine.high %v10515_v58, %v10515_v58  ;;  %v10522_v58 = vld [vmem:[#allocation61_spill] sm:$0xff] }
 0x1fc   :  { %10505 = vst [vmem:[#allocation196_spill] sm:$0xff] %v8059_v52  ;;  %v8091_v60 = vrot.slane %v1777_v29, %v6147_v5 }
 0x1fd   :  { %v8054_v28 = vpop.permute.xlu0 %2414  ;;  %v8117_v26 = vrot.slane %v1016_v13, %v6147_v5 }
 0x1fe   :  { %3536 = vrot.lane.b32.xlu1 %v7994_v48, %s5796_s25  ;;  %10503 = vst [vmem:[#allocation194_spill] sm:$0xff] %v8054_v28  ;;  %v998_v28 = vcombine.high %v996_v1, %v996_v1  ;;  %10514 = vst [vmem:[#allocation202_spill] sm:$0xff] %v8091_v60 }
 0x1ff   :  { %3372 = vrot.lane.b32.xlu0 %v7601_v20, %s5793_s22  ;;  %v8078_v52 = vpop.permute.xlu1 %3232  ;;  %v3486_v13 = vrot.slane %v8117_v26, %v6147_v5 }
 0x200   :  { %10510 = vst [vmem:[#allocation200_spill] sm:$0xff] %v8078_v52 }
 0x201   :  { %v8072_v21 = vpop.permute.xlu0 %3514 }
 0x202   :  { %3184 = vrot.lane.b32.xlu1 %v8065_v38, %s5794_s23  ;;  %10508 = vst [vmem:[#allocation198_spill] sm:$0xff] %v8072_v21  ;;  %v2227_v38 = vrot.slane %v998_v28, %v6147_v5 }
 0x203   :  { %2438 = vrot.lane.b32.xlu0 %v8076_v6, %s5795_s24  ;;  %v8088_v21 = vpop.permute.xlu1 %3422 }
 0x204   :  { %10513 = vst [vmem:[#allocation201_spill] sm:$0xff] %v8088_v21  ;;  %v2228_v29 = vcombine.low %v8091_v60, %v2227_v38  ;;  %v10520_v21 = vld [vmem:[#allocation59_spill] sm:$0xff] }
 0x205   :  { %v8085_v46 = vpop.permute.xlu0 %3352 }
 0x206   :  { %3374 = vrot.lane.b32.xlu1 %v8031_v35, %s5793_s22  ;;  %10512 = vst [vmem:[#allocation141_spill] sm:$0xff] %v8085_v46  ;;  %v10517_v35 = vld [vmem:[#allocation62_spill] sm:$0xff]  ;;  %v8126_v22 = vrot.slane %v2228_v29, 1 }
 0x207   :  { %3538 = vrot.lane.b32.xlu0 %v8076_v6, %s5796_s25  ;;  %v8103_v46 = vcombine.high %v10517_v35, %v10517_v35  ;;  %v8105_v20 = vpop.permute.xlu1 %3516  ;;  %v10521_v6 = vld [vmem:[#allocation56_spill] sm:$0xff] }
 0x208   :  { %10519 = vst [vmem:[#allocation203_spill] sm:$0xff] %v8105_v20  ;;  %v3286_v48 = vcombine.low %v10521_v6, %v10520_v21  ;;  %10526 = vst [vmem:[#allocation61_spill] sm:$0xff] %v8126_v22  ;;  %v8142_v29 = vsel %vm2325_vm3, %v2359_v14, %v8126_v22 }
 0x209   :  { %v8099_v52 = vpop.permute.xlu0 %3162  ;;  %10518 = vst [vmem:[#allocation62_spill] sm:$0xff] %v8103_v46  ;;  %v3303_v38 = vcombine.low %v10517_v35, %v8103_v46 }
 0x20a   :  { %2440 = vrot.lane.b32.xlu1 %v8056_v41, %s5795_s24  ;;  %10516 = vst [vmem:[#allocation57_spill] sm:$0xff] %v8099_v52  ;;  %v3287_v52 = vcombine.low %v10523_v11, %v10522_v58  ;;  %v3294_v6 = vrot.slane %v3286_v48, %v6147_v5 }
 0x20b   :  { %3376 = vrot.lane.b32.xlu0 %v7610_v53, %s5793_s22 }
 0x20c   :  { %v3301_v46 = vrot.slane %v3287_v52, %v6147_v5  ;;  %v2235_v52 = vrot.slane %v7003_v16, %v6147_v5 }
 0x20d   :  { %v8119_v23 = vpop.permute.xlu0 %2486 }
 0x20e   :  { %3540 = vrot.lane.b32.xlu1 %v8056_v41, %s5796_s25  ;;  %10524 = vst [vmem:[#allocation59_spill] sm:$0xff] %v8119_v23  ;;  %v2834_v41 = vcombine.low %v996_v1, %v998_v28 }
 0x20f   :  { %3186 = vrot.lane.b32.xlu0 %v7620_v19, %s5794_s23 }
 0x210   :  { %v8123_v20 = vpop.permute.xlu1 %3354  ;;  %v8147_v1 = vrot.slane %v2834_v41, %v6147_v5 }
 0x211   :  { %10525 = vst [vmem:[#allocation56_spill] sm:$0xff] %v8123_v20  ;;  %v8135_v23 = vpop.permute.xlu0 %3586  ;;  %v8138_v20 = vrot.slane %v3303_v38, %v6147_v5  ;;  %v10531_v38 = vld [vmem:[#allocation72_spill] sm:$0xff] }
 0x212   :  { %3378 = vrot.lane.b32.xlu1 %v8091_v60, %s5793_s22  ;;  %10527 = vst [vmem:[#allocation58_spill] sm:$0xff] %v8135_v23  ;;  %10529 = vst [vmem:[#allocation205_spill] sm:$0xff] %v8147_v1  ;;  %v1802_v23 = vcombine.low %v6986_v17, %v10531_v38  ;;  %v8160_v60 = vcombine.low %v3294_v6, %v3301_v46 }
 0x213   :  { %2442 = vrot.lane.b32.xlu0 %v8142_v29, %s5795_s24  ;;  %v3487_v41 = vcombine.low %v8138_v20, %v3486_v13 }
 0x214   :  { %v8144_v28 = vpop.permute.xlu1 %2488  ;;  %10533 = vst [vmem:[#allocation207_spill] sm:$0xff] %v8160_v60  ;;  %v3496_v46 = vrot.slane %v8160_v60, 1  ;;  %v8179_v13 = vrot.slane %v1802_v23, %v6147_v5 }
 0x215   :  { %10528 = vst [vmem:[#allocation204_spill] sm:$0xff] %v8144_v28  ;;  %v8154_v48 = vpop.permute.xlu0 %3424  ;;  %v8176_v6 = vrot.slane %v3487_v41, 1 }
 0x216   :  { %3188 = vrot.lane.b32.xlu1 %v8147_v1, %s5794_s23  ;;  %10530 = vst [vmem:[#allocation206_spill] sm:$0xff] %v8154_v48  ;;  %v10535_v48 = vld [vmem:[#allocation73_spill] sm:$0xff]  ;;  %10537 = vst [vmem:[#allocation209_spill] sm:$0xff] %v8179_v13  ;;  %v2236_v41 = vcombine.low %v8179_v13, %v2235_v52  ;;  %v10542_v52 = vcombine.low %v7644_v39, %v7647_v37 }
 0x217   :  { %3542 = vrot.lane.b32.xlu0 %v8142_v29, %s5796_s25  ;;  %v1101_v17 = vcombine.high %v10535_v48, %v10535_v48  ;;  %v8190_v48 = vsel %vm2325_vm3, %v3496_v46, %v8176_v6 }
 0x218   :  { %v8158_v14 = vpop.permute.xlu1 %3164 }
 0x219   :  { %10532 = vst [vmem:[#allocation72_spill] sm:$0xff] %v8158_v14  ;;  %v8169_v28 = vpop.permute.xlu0 %2418 }
 0x21a   :  { %2444 = vrot.lane.b32.xlu1 %v8126_v22, %s5795_s24  ;;  %10534 = vst [vmem:[#allocation208_spill] sm:$0xff] %v8169_v28  ;;  %v1115_v28 = vrot.slane %v1101_v17, %v6147_v5  ;;  %v2362_v17 = vrot.slane %v7657_v2, 1 }
 0x21b   :  { %3380 = vrot.lane.b32.xlu0 %v8160_v60, %s5793_s22  ;;  %v2363_v60 = vrot.slane %v2236_v41, 1  ;;  %v10545_v41 = vcombine.low %v10531_v38, %v7003_v16  ;;  %v10549_v16 = vld [vmem:[#allocation64_spill] sm:$0xff] }
 0x21c   :  { %v8173_v1 = vpop.permute.xlu1 %2420  ;;  %v1827_v46 = vcombine.low %v7634_v57, %v1115_v28  ;;  %v8236_v38 = vrot.slane %v10549_v16, %v6147_v5 }
 0x21d   :  { %10536 = vst [vmem:[#allocation73_spill] sm:$0xff] %v8173_v1  ;;  %v8185_v14 = vpop.permute.xlu0 %3518  ;;  %v2866_v2 = vrot.slane %v10545_v41, %v6147_v5  ;;  %v2365_v41 = vrot.slane %v7703_v9, 1 }
 0x21e   :  { %3544 = vrot.lane.b32.xlu1 %v8126_v22, %s5796_s25  ;;  %10538 = vst [vmem:[#allocation210_spill] sm:$0xff] %v8185_v14  ;;  %v1117_v22 = vcombine.high %v1115_v28, %v1115_v28  ;;  %v8221_v57 = vrot.slane %v1827_v46, %v6147_v5  ;;  %v8253_v16 = vcombine.high %v8236_v38, %v8236_v38 }
 0x21f   :  { %3546 = vrot.lane.b32.xlu0 %v8190_v48, %s5796_s25 }
 0x220   :  { %v8192_v1 = vpop.permute.xlu1 %3426  ;;  %10546 = vst [vmem:[#allocation216_spill] sm:$0xff] %v8221_v57  ;;  %v2243_v39 = vrot.slane %v1117_v22, %v6147_v5 }
 0x221   :  { %10539 = vst [vmem:[#allocation211_spill] sm:$0xff] %v8192_v1  ;;  %v8199_v23 = vpop.permute.xlu0 %3234 }
 0x222   :  { %3382 = vrot.lane.b32.xlu1 %v8138_v20, %s5793_s22  ;;  %10540 = vst [vmem:[#allocation212_spill] sm:$0xff] %v8199_v23  ;;  %v2364_v23 = vsel %vm2325_vm3, %v2362_v17, %v2363_v60  ;;  %v2244_v17 = vcombine.low %v8221_v57, %v2243_v39  ;;  %v2884_v39 = vcombine.low %v1115_v28, %v1117_v22 }
 0x223   :  { %3190 = vrot.lane.b32.xlu0 %v10542_v52, %s5794_s23  ;;  %v1835_v22 = vcombine.low %v7707_v40, %v7731_v45  ;;  %v1836_v28 = vcombine.low %v10419_v24, %v10429_v12  ;;  %v10556_v12 = vld [vmem:[#allocation65_spill] sm:$0xff] }
 0x224   :  { %v8201_v14 = vpop.permute.xlu1 %3520  ;;  %v3841_v45 = vcombine.low %v8253_v16, %v10556_v12 }
 0x225   :  { %10541 = vst [vmem:[#allocation213_spill] sm:$0xff] %v8201_v14  ;;  %v8211_v1 = vpop.permute.xlu0 %3166 }
 0x226   :  { %3548 = vrot.lane.b32.xlu1 %v8176_v6, %s5796_s25  ;;  %10543 = vst [vmem:[#allocation214_spill] sm:$0xff] %v8211_v1 }
 0x227   :  { %2446 = vrot.lane.b32.xlu0 %v2364_v23, %s5795_s24  ;;  %v1150_v23 = vcombine.high %v10430_v3, %v10430_v3 }
 0x228   :  { %v8214_v13 = vpop.permute.xlu1 %3236 }
 0x229   :  { %10544 = vst [vmem:[#allocation215_spill] sm:$0xff] %v8214_v13  ;;  %v8226_v37 = vpop.permute.xlu0 %3356  ;;  %v2366_v13 = vrot.slane %v2244_v17, 1 }
 0x22a   :  { %3192 = vrot.lane.b32.xlu1 %v2866_v2, %s5794_s23  ;;  %10547 = vst [vmem:[#allocation217_spill] sm:$0xff] %v8226_v37  ;;  %v3855_v37 = vrot.slane %v3841_v45, %v6147_v5 }
 0x22b   :  { %3384 = vrot.lane.b32.xlu0 %v7703_v9, %s5793_s22  ;;  %v2367_v17 = vsel %vm2325_vm3, %v2365_v41, %v2366_v13  ;;  %v8266_v9 = vrot.slane %v2884_v39, %v6147_v5  ;;  %v10557_v41 = vld [vmem:[#allocation81_spill] sm:$0xff] }
 0x22c   :  { %v8228_v52 = vpop.permute.xlu1 %2492  ;;  %v2251_v39 = vrot.slane %v10557_v41, %v6147_v5 }
 0x22d   :  { %10548 = vst [vmem:[#allocation218_spill] sm:$0xff] %v8228_v52  ;;  %v8240_v46 = vpop.permute.xlu0 %2490  ;;  %v1852_v52 = vcombine.low %v10430_v3, %v1150_v23  ;;  %10554 = vst [vmem:[#allocation222_spill] sm:$0xff] %v8266_v9  ;;  %v10555_v3 = vcombine.low %v10520_v21, %v10523_v11  ;;  %v1843_v21 = vrot.slane %v1835_v22, %v6147_v5 }
 0x22e   :  { %2448 = vrot.lane.b32.xlu1 %v2363_v60, %s5795_s24  ;;  %10550 = vst [vmem:[#allocation64_spill] sm:$0xff] %v8240_v46  ;;  %v1032_v60 = vcombine.high %v8117_v26, %v8117_v26 }
 0x22f   :  { %3194 = vrot.lane.b32.xlu0 %v7725_v18, %s5794_s23  ;;  %v8279_v24 = vrot.slane %v1852_v52, %v6147_v5  ;;  %v10561_v52 = vcombine.low %v10522_v58, %v10517_v35 }
 0x230   :  { %v8242_v2 = vpop.permute.xlu1 %3168  ;;  %v3840_v40 = vcombine.low %v1032_v60, %v8236_v38  ;;  %v1850_v60 = vrot.slane %v1836_v28, %v6147_v5  ;;  %v10562_v28 = vld [vmem:[#allocation68_spill] sm:$0xff] }
 0x231   :  { %10551 = vst [vmem:[#allocation219_spill] sm:$0xff] %v8242_v2  ;;  %v8256_v46 = vpop.permute.xlu0 %3428  ;;  %v3661_v1 = vrot.slane %v10561_v52, %v6147_v5  ;;  %v2252_v22 = vcombine.low %v8279_v24, %v2251_v39 }
 0x232   :  { %3386 = vrot.lane.b32.xlu1 %v8221_v57, %s5793_s22  ;;  %10552 = vst [vmem:[#allocation220_spill] sm:$0xff] %v8256_v46  ;;  %v3654_v46 = vrot.slane %v10555_v3, %v6147_v5  ;;  %v3848_v14 = vrot.slane %v3840_v40, %v6147_v5 }
 0x233   :  { %2450 = vrot.lane.b32.xlu0 %v2367_v17, %s5795_s24  ;;  %v8324_v45 = vrot.slane %v2252_v22, 1  ;;  %v10569_v22 = vld [vmem:[#allocation87_spill] sm:$0xff] }
 0x234   :  { %v8263_v57 = vpop.permute.xlu1 %3358 }
 0x235   :  { %10553 = vst [vmem:[#allocation221_spill] sm:$0xff] %v8263_v57  ;;  %v8283_v2 = vpop.permute.xlu0 %2422  ;;  %v10559_v57 = vld [vmem:[#allocation69_spill] sm:$0xff] }
 0x236   :  { %3196 = vrot.lane.b32.xlu1 %v8266_v9, %s5794_s23  ;;  %10558 = vst [vmem:[#allocation65_spill] sm:$0xff] %v8283_v2  ;;  %v8287_v11 = vcombine.high %v10559_v57, %v10559_v57  ;;  %v8299_v2 = vcombine.low %v3654_v46, %v3661_v1  ;;  %v10563_v9 = vcombine.low %v10562_v28, %v10559_v57 }
 0x237   :  { %3550 = vrot.lane.b32.xlu0 %v2367_v17, %s5796_s25  ;;  %v8316_v1 = vcombine.low %v1843_v21, %v1850_v60  ;;  %v2909_v46 = vcombine.low %v1150_v23, %v10557_v41  ;;  %v8332_v21 = vcombine.low %v3848_v14, %v3855_v37 }
 0x238   :  { %v8290_v3 = vpop.permute.xlu1 %2424  ;;  %v8310_v35 = vrot.slane %v10563_v9, %v6147_v5  ;;  %v4040_v58 = vrot.slane %v8287_v11, %v6147_v5 }
 0x239   :  { %10560 = vst [vmem:[#allocation81_spill] sm:$0xff] %v8290_v3  ;;  %v8304_v3 = vpop.permute.xlu0 %3522  ;;  %v8329_v39 = vrot.slane %v2909_v46, %v6147_v5  ;;  %v2368_v52 = vrot.slane %v8316_v1, 1  ;;  %v1184_v46 = vcombine.high %v10569_v22, %v10569_v22 }
 0x23a   :  { %2452 = vrot.lane.b32.xlu1 %v2366_v13, %s5795_s24  ;;  %v8335_v23 = vcombine.low %v8310_v35, %v4040_v58 }
 0x23b   :  { %3198 = vrot.lane.b32.xlu0 %v7789_v0, %s5794_s23  ;;  %10567 = vst [vmem:[#allocation224_spill] sm:$0xff] %v8329_v39  ;;  %v8349_v14 = vsel %vm2325_vm3, %v2368_v52, %v8324_v45 }
 0x23c   :  { %v8314_v17 = vpop.permute.xlu1 %3430  ;;  %v10185_v41 = vrot.slane %v8335_v23, 1 }
 0x23d   :  { %10564 = vst [vmem:[#allocation69_spill] sm:$0xff] %v8314_v17  ;;  %v8322_v40 = vpop.permute.xlu0 %3360  ;;  %v2917_v17 = vcombine.low %v10437_v8, %v7807_v32 }
 0x23e   :  { %3552 = vrot.lane.b32.xlu1 %v2366_v13, %s5796_s25  ;;  %10565 = vst [vmem:[#allocation68_spill] sm:$0xff] %v8322_v40  ;;  %v4050_v13 = vrot.slane %v8332_v21, 1 }
 0x23f   :  { %3388 = vrot.lane.b32.xlu0 %v8316_v1, %s5793_s22 }
 0x240   :  { %v8326_v9 = vpop.permute.xlu1 %3524  ;;  %v8356_v58 = vsel %vm2325_vm3, %v4050_v13, %v10185_v41 }
 0x241   :  { %10566 = vst [vmem:[#allocation223_spill] sm:$0xff] %v8326_v9  ;;  %v8343_v60 = vpop.permute.xlu0 %3170 }
 0x242   :  { %3200 = vrot.lane.b32.xlu1 %v8329_v39, %s5794_s23  ;;  %10568 = vst [vmem:[#allocation225_spill] sm:$0xff] %v8343_v60  ;;  %v10571_v60 = vld [vmem:[#allocation88_spill] sm:$0xff] }
 0x243   :  { %2454 = vrot.lane.b32.xlu0 %v8349_v14, %s5795_s24  ;;  %v2918_v52 = vcombine.low %v10441_v56, %v10571_v60  ;;  %v10574_v13 = vcombine.low %v10571_v60, %v10569_v22  ;;  %v2925_v56 = vrot.slane %v2917_v17, %v6147_v5  ;;  %v2371_v17 = vrot.slane %v7851_v63, 1 }
 0x244   :  { %v8351_v37 = vpop.permute.xlu1 %3362 }
 0x245   :  { %10570 = vst [vmem:[#allocation87_spill] sm:$0xff] %v8351_v37  ;;  %v8366_v9 = vpop.permute.xlu0 %2426  ;;  %v2259_v37 = vrot.slane %v1184_v46, %v6147_v5  ;;  %v8375_v41 = vrot.slane %v10574_v13, %v6147_v5  ;;  %v2932_v32 = vrot.slane %v2918_v52, %v6147_v5 }
 0x246   :  { %3390 = vrot.lane.b32.xlu1 %v8279_v24, %s5793_s22  ;;  %10572 = vst [vmem:[#allocation88_spill] sm:$0xff] %v8366_v9 }
 0x247   :  { %3554 = vrot.lane.b32.xlu0 %v8349_v14, %s5796_s25  ;;  %v8394_v13 = vcombine.low %v2925_v56, %v2932_v32 }
 0x248   :  { %v8369_v40 = vpop.permute.xlu1 %3172 }
 0x249   :  { %10573 = vst [vmem:[#allocation226_spill] sm:$0xff] %v8369_v40  ;;  %v8381_v8 = vpop.permute.xlu0 %3526  ;;  %v2260_v40 = vcombine.low %v8375_v41, %v2259_v37 }
 0x24a   :  { %2456 = vrot.lane.b32.xlu1 %v8324_v45, %s5795_s24  ;;  %10575 = vst [vmem:[#allocation227_spill] sm:$0xff] %v8381_v8  ;;  %v2934_v8 = vcombine.low %v10569_v22, %v1184_v46 }
 0x24b   :  { %3392 = vrot.lane.b32.xlu0 %v7851_v63, %s5793_s22  ;;  %v8400_v52 = vrot.slane %v2260_v40, 1 }
 0x24c   :  { %v8385_v9 = vpop.permute.xlu1 %2428  ;;  %v8417_v40 = vrot.slane %v2934_v8, %v6147_v5 }
 0x24d   :  { %10576 = vst [vmem:[#allocation228_spill] sm:$0xff] %v8385_v9  ;;  %v8392_v60 = vpop.permute.xlu0 %3174  ;;  %10579 = vst [vmem:[#allocation231_spill] sm:$0xff] %v8400_v52  ;;  %v10581_v9 = vld [vmem:[#allocation101_spill] sm:$0xff]  ;;  %v8412_v22 = vsel %vm2325_vm3, %v2371_v17, %v8400_v52 }
 0x24e   :  { %3556 = vrot.lane.b32.xlu1 %v8324_v45, %s5796_s25  ;;  %10577 = vst [vmem:[#allocation229_spill] sm:$0xff] %v8392_v60  ;;  %v1902_v56 = vcombine.low %v10456_v4, %v10581_v9  ;;  %10583 = vst [vmem:[#allocation233_spill] sm:$0xff] %v8417_v40  ;;  %v10586_v4 = vld [vmem:[#allocation102_spill] sm:$0xff] }
 0x24f   :  { %3202 = vrot.lane.b32.xlu0 %v8394_v13, %s5794_s23  ;;  %v2267_v17 = vrot.slane %v10586_v4, %v6147_v5 }
 0x250   :  { %v8397_v39 = vpop.permute.xlu1 %3528 }
 0x251   :  { %10578 = vst [vmem:[#allocation230_spill] sm:$0xff] %v8397_v39  ;;  %v8406_v37 = vpop.permute.xlu0 %3364  ;;  %v8426_v39 = vrot.slane %v1902_v56, %v6147_v5 }
 0x252   :  { %3394 = vrot.lane.b32.xlu1 %v8375_v41, %s5793_s22  ;;  %10580 = vst [vmem:[#allocation232_spill] sm:$0xff] %v8406_v37 }
 0x253   :  { %2458 = vrot.lane.b32.xlu0 %v8412_v22, %s5795_s24  ;;  %10585 = vst [vmem:[#allocation235_spill] sm:$0xff] %v8426_v39 }
 0x254   :  { %v8414_v46 = vpop.permute.xlu1 %3176 }
 0x255   :  { %10582 = vst [vmem:[#allocation101_spill] sm:$0xff] %v8414_v46  ;;  %v8423_v32 = vpop.permute.xlu0 %2430  ;;  %v2268_v46 = vcombine.low %v8426_v39, %v2267_v17  ;;  %v10593_v17 = vcombine.low %v10581_v9, %v10586_v4  ;;  %v1911_v9 = vcombine.low %v7616_v62, %v10405_v47 }
 0x256   :  { %3204 = vrot.lane.b32.xlu1 %v8417_v40, %s5794_s23  ;;  %10584 = vst [vmem:[#allocation234_spill] sm:$0xff] %v8423_v32 }
 0x257   :  { %3558 = vrot.lane.b32.xlu0 %v8412_v22, %s5796_s25  ;;  %v8449_v32 = vrot.slane %v2268_v46, 1 }
 0x258   :  { %v8430_v37 = vpop.permute.xlu1 %3366 }
 0x259   :  { %10587 = vst [vmem:[#allocation102_spill] sm:$0xff] %v8430_v37  ;;  %v8436_v8 = vpop.permute.xlu0 %3530  ;;  %v1218_v37 = vcombine.high %v10586_v4, %v10586_v4  ;;  %10591 = vst [vmem:[#allocation239_spill] sm:$0xff] %v8449_v32 }
 0x25a   :  { %2460 = vrot.lane.b32.xlu1 %v8400_v52, %s5795_s24  ;;  %10588 = vst [vmem:[#allocation236_spill] sm:$0xff] %v8436_v8  ;;  %v2374_v8 = vrot.slane %v7942_v44, 1 }
 0x25b   :  { %3206 = vrot.lane.b32.xlu0 %v7919_v34, %s5794_s23  ;;  %v1910_v46 = vcombine.low %v1218_v37, %v7585_v7  ;;  %v1925_v37 = vrot.slane %v1911_v9, %v6147_v5  ;;  %v10604_v9 = vld [vmem:[#allocation125_spill] sm:$0xff] }
 0x25c   :  { %v8439_v60 = vpop.permute.xlu1 %2432 }
 0x25d   :  { %10589 = vst [vmem:[#allocation237_spill] sm:$0xff] %v8439_v60  ;;  %v8445_v56 = vpop.permute.xlu0 %3368  ;;  %v8457_v60 = vrot.slane %v10593_v17, %v6147_v5  ;;  %v1918_v7 = vrot.slane %v1910_v46, %v6147_v5 }
 0x25e   :  { %3560 = vrot.lane.b32.xlu1 %v8400_v52, %s5796_s25  ;;  %10590 = vst [vmem:[#allocation238_spill] sm:$0xff] %v8445_v56 }
 0x25f   :  { %10594 = vst [vmem:[#allocation241_spill] sm:$0xff] %v8457_v60  ;;  %3396 = vrot.lane.b32.xlu0 %v7942_v44, %s5793_s22  ;;  %v10747_v44 = vld [vmem:[#allocation118_spill] sm:$0xff] }
 0x260   :  { %v8451_v40 = vpop.permute.xlu1 %3532 }
 0x261   :  { %10592 = vst [vmem:[#allocation240_spill] sm:$0xff] %v8451_v40  ;;  %v8464_v56 = vpop.permute.xlu0 %3178  ;;  %v8469_v40 = vsel %vm2325_vm3, %v2374_v8, %v8449_v32  ;;  %v8493_v8 = vcombine.low %v1918_v7, %v1925_v37  ;;  %v10607_v37 = vld [vmem:[#allocation10_spill] sm:$0xff] }
 0x262   :  { %3208 = vrot.lane.b32.xlu1 %v8457_v60, %s5794_s23  ;;  %10595 = vst [vmem:[#allocation242_spill] sm:$0xff] %v8464_v56  ;;  %10596 = vst [vmem:[#allocation243_spill] sm:$0xff] %v8469_v40 }
 0x263   :  { %2462 = vrot.lane.b32.xlu0 %v8469_v40, %s5795_s24  ;;  %10602 = vst [vmem:[#allocation249_spill] sm:$0xff] %v8493_v8  ;;  %v2377_v56 = vrot.slane %v8493_v8, 1 }
 0x264   :  { %v8471_v34 = vpop.permute.xlu1 %3370 }
 0x265   :  { %10597 = vst [vmem:[#allocation244_spill] sm:$0xff] %v8471_v34  ;;  %v8479_v4 = vpop.permute.xlu0 %2434 }
 0x266   :  { %3398 = vrot.lane.b32.xlu1 %v8426_v39, %s5793_s22  ;;  %10598 = vst [vmem:[#allocation245_spill] sm:$0xff] %v8479_v4 }
 0x267   :  { %3562 = vrot.lane.b32.xlu0 %v8469_v40, %s5796_s25 }
 0x268   :  { %v8481_v17 = vpop.permute.xlu1 %3180 }
 0x269   :  { %10599 = vst [vmem:[#allocation246_spill] sm:$0xff] %v8481_v17  ;;  %v8489_v62 = vpop.permute.xlu0 %3534  ;;  %v3494_v17 = vrot.slane %v10604_v9, %v6147_v5 }
 0x26a   :  { %2464 = vrot.lane.b32.xlu1 %v8449_v32, %s5795_s24  ;;  %10600 = vst [vmem:[#allocation247_spill] sm:$0xff] %v8489_v62 }
 0x26b   :  { %3210 = vrot.lane.b32.xlu0 %v7713_v61, %s5794_s23  ;;  %v3495_v9 = vcombine.low %v7828_v10, %v3494_v17  ;;  %v3499_v10 = vrot.slane %v7489_v49, 1  ;;  %v10619_v49 = vld [vmem:[#allocation46_spill] sm:$0xff]  ;;  %v1479_v61 = vld [vmem:[%s9935_s3 + $0x20] sm:$0xff] }
 0x26c   :  { %v8491_v47 = vpop.permute.xlu1 %2436 }
 0x26d   :  { %10601 = vst [vmem:[#allocation248_spill] sm:$0xff] %v8491_v47  ;;  %v8499_v46 = vpop.permute.xlu0 %3182  ;;  %v8514_v47 = vsel %vm2325_vm3, %v2377_v56, %v10607_v37 }
 0x26e   :  { %3564 = vrot.lane.b32.xlu1 %v8449_v32, %s5796_s25  ;;  %10603 = vst [vmem:[#allocation250_spill] sm:$0xff] %v8499_v46  ;;  %10608 = vst [vmem:[#allocation253_spill] sm:$0xff] %v8514_v47  ;;  %v1458_v32 = vcombine.high %v8018_v42, %v8018_v42  ;;  %v10642_v42 = vld [vmem:[#allocation55_spill] sm:$0xff] }
 0x26f   :  { %3400 = vrot.lane.b32.xlu0 %v8493_v8, %s5793_s22 }
 0x270   :  { %v8503_v34 = vpop.permute.xlu1 %3536  ;;  %v8617_v37 = vrot.slane %v1458_v32, %v6147_v5 }
 0x271   :  { %10605 = vst [vmem:[#allocation251_spill] sm:$0xff] %v8503_v34  ;;  %v8510_v7 = vpop.permute.xlu0 %3372 }
 0x272   :  { %3588 = vrot.lane.b32.xlu1 %v7524_v50, %s5796_s25  ;;  %10606 = vst [vmem:[#allocation252_spill] sm:$0xff] %v8510_v7  ;;  %v8527_v50 = vrot.slane %v3495_v9, 1  ;;  %10641 = vst [vmem:[#allocation268_spill] sm:$0xff] %v8617_v37  ;;  %v8645_v62 = vcombine.high %v8617_v37, %v8617_v37 }
 0x273   :  { %2466 = vrot.lane.b32.xlu0 %v8514_v47, %s5795_s24 }
 0x274   :  { %v8516_v46 = vpop.permute.xlu1 %3184  ;;  %10612 = vst [vmem:[#allocation257_spill] sm:$0xff] %v8527_v50  ;;  %10645 = vst [vmem:[#allocation270_spill] sm:$0xff] %v8645_v62 }
 0x275   :  { %10609 = vst [vmem:[#allocation254_spill] sm:$0xff] %v8516_v46  ;;  %v8523_v34 = vpop.permute.xlu0 %2438  ;;  %v8546_v46 = vsel %vm2325_vm3, %v3499_v10, %v8527_v50 }
 0x276   :  { %3592 = vrot.lane.b32.xlu1 %v7751_v33, %s5796_s25  ;;  %10610 = vst [vmem:[#allocation255_spill] sm:$0xff] %v8523_v34  ;;  %v10615_v33 = vld [vmem:[#allocation25_spill] sm:$0xff]  ;;  %10617 = vst [vmem:[#allocation260_spill] sm:$0xff] %v8546_v46 }
 0x277   :  { %3566 = vrot.lane.b32.xlu0 %v8514_v47, %s5796_s25 }
 0x278   :  { %v8525_v4 = vpop.permute.xlu1 %3374 }
 0x279   :  { %10611 = vst [vmem:[#allocation256_spill] sm:$0xff] %v8525_v4  ;;  %v8533_v56 = vpop.permute.xlu0 %3538 }
 0x27a   :  { %3596 = vrot.lane.b32.xlu1 %v8527_v50, %s5796_s25  ;;  %10613 = vst [vmem:[#allocation258_spill] sm:$0xff] %v8533_v56 }
 0x27b   :  { %3590 = vrot.lane.b32.xlu0 %v7770_v55, %s5796_s25 }
 0x27c   :  { %v8535_v17 = vpop.permute.xlu1 %2440 }
 0x27d   :  { %10614 = vst [vmem:[#allocation259_spill] sm:$0xff] %v8535_v17  ;;  %v8542_v9 = vpop.permute.xlu0 %3376 }
 0x27e   :  { %3698 = vrot.lane.b32.xlu1 %v10615_v33, %s5797_s2  ;;  %10616 = vst [vmem:[#allocation25_spill] sm:$0xff] %v8542_v9  ;;  %v10622_v33 = vld [vmem:[#allocation20_spill] sm:$0xff] }
 0x27f   :  { %3594 = vrot.lane.b32.xlu0 %v8546_v46, %s5796_s25  ;;  %v10623_v9 = vld [vmem:[#allocation76_spill] sm:$0xff]  ;;  %v10627_v46 = vld [vmem:[#allocation114_spill] sm:$0xff] }
 0x280   :  { %v8548_v4 = vpop.permute.xlu1 %3540 }
 0x281   :  { %10618 = vst [vmem:[#allocation261_spill] sm:$0xff] %v8548_v4  ;;  %v8554_v17 = vpop.permute.xlu0 %3186  ;;  %v10626_v4 = vld [vmem:[#allocation18_spill] sm:$0xff] }
 0x282   :  { %3702 = vrot.lane.b32.xlu1 %v10619_v49, %s5797_s2  ;;  %10620 = vst [vmem:[#allocation46_spill] sm:$0xff] %v8554_v17 }
 0x283   :  { %3696 = vrot.lane.b32.xlu0 %v10622_v33, %s5797_s2 }
 0x284   :  { %v8556_v55 = vpop.permute.xlu1 %3378 }
 0x285   :  { %10621 = vst [vmem:[#allocation262_spill] sm:$0xff] %v8556_v55  ;;  %v8562_v10 = vpop.permute.xlu0 %2442  ;;  %v10630_v55 = vld [vmem:[#allocation45_spill] sm:$0xff] }
 0x286   :  { %3706 = vrot.lane.b32.xlu1 %v10623_v9, %s5797_s2  ;;  %10624 = vst [vmem:[#allocation20_spill] sm:$0xff] %v8562_v10 }
 0x287   :  { %3700 = vrot.lane.b32.xlu0 %v10626_v4, %s5797_s2 }
 0x288   :  { %v8564_v50 = vpop.permute.xlu1 %3188 }
 0x289   :  { %10625 = vst [vmem:[#allocation76_spill] sm:$0xff] %v8564_v50  ;;  %v8570_v34 = vpop.permute.xlu0 %3542  ;;  %v10633_v50 = vld [vmem:[#allocation93_spill] sm:$0xff] }
 0x28a   :  { %3710 = vrot.lane.b32.xlu1 %v10627_v46, %s5797_s2  ;;  %10628 = vst [vmem:[#allocation18_spill] sm:$0xff] %v8570_v34 }
 0x28b   :  { %3704 = vrot.lane.b32.xlu0 %v10630_v55, %s5797_s2 }
 0x28c   :  { %v8572_v17 = vpop.permute.xlu1 %2444 }
 0x28d   :  { %10629 = vst [vmem:[#allocation114_spill] sm:$0xff] %v8572_v17  ;;  %v8578_v33 = vpop.permute.xlu0 %3380  ;;  %v10636_v17 = vld [vmem:[#allocation34_spill] sm:$0xff] }
 0x28e   :  { %3714 = vrot.lane.b32.xlu1 %v7625_v27, %s5797_s2  ;;  %10631 = vst [vmem:[#allocation45_spill] sm:$0xff] %v8578_v33 }
 0x28f   :  { %3708 = vrot.lane.b32.xlu0 %v10633_v50, %s5797_s2 }
 0x290   :  { %v8580_v10 = vpop.permute.xlu1 %3544 }
 0x291   :  { %10632 = vst [vmem:[#allocation263_spill] sm:$0xff] %v8580_v10  ;;  %v8586_v56 = vpop.permute.xlu0 %3546  ;;  %v1475_v10 = vld [vmem:[%s9935_s3] sm:$0xff] }
 0x292   :  { %3718 = vrot.lane.b32.xlu1 %v7776_v43, %s5797_s2  ;;  %10634 = vst [vmem:[#allocation93_spill] sm:$0xff] %v8586_v56  ;;  %v1476_v56 = vld [vmem:[%s9935_s3 + $0x8] sm:$0xff] }
 0x293   :  { %3712 = vrot.lane.b32.xlu0 %v10636_v17, %s5797_s2 }
 0x294   :  { %v8588_v34 = vpop.permute.xlu1 %3382 }
 0x295   :  { %10635 = vst [vmem:[#allocation264_spill] sm:$0xff] %v8588_v34  ;;  %v8594_v7 = vpop.permute.xlu0 %3190  ;;  %v5728_v34 = vpack.c.bf16 %v1476_v56, %v1475_v10  ;;  %v1473_v56 = vcombine.high %v8026_v54, %v8026_v54 }
 0x296   :  { %3722 = vrot.lane.b32.xlu1 %v7874_v31, %s5797_s2  ;;  %10637 = vst [vmem:[#allocation34_spill] sm:$0xff] %v8594_v7 }
 0x297   :  { %3716 = vrot.lane.b32.xlu0 %v7450_v51, %s5797_s2  ;;  %5729 = vmatprep.subr.bf16.mxu1 %v5728_v34 }
 0x298   :  { %v8596_v33 = vpop.permute.xlu1 %3548  ;;  %5731 = vmatpush3.bf16.msra.mxu1 %v5728_v34  ;;  %v1478_v34 = vld [vmem:[%s9935_s3 + $0x18] sm:$0xff] }
 0x299   :  { %10638 = vst [vmem:[#allocation265_spill] sm:$0xff] %v8596_v33  ;;  %v8610_v7 = vpop.permute.xlu0 %2446 }
 0x29a   :  { %3726 = vrot.lane.b32.xlu1 %v7922_v25, %s5797_s2  ;;  %10639 = vst [vmem:[#allocation266_spill] sm:$0xff] %v8610_v7 }
 0x29b   :  { %3720 = vrot.lane.b32.xlu0 %v7519_v15, %s5797_s2 }
 0x29c   :  { %v8612_v33 = vpop.permute.xlu1 %3192 }
 0x29d   :  { %10640 = vst [vmem:[#allocation267_spill] sm:$0xff] %v8612_v33  ;;  %v8623_v10 = vpop.permute.xlu0 %3384  ;;  %v1477_v33 = vld [vmem:[%s9935_s3 + $0x10] sm:$0xff] }
 0x29e   :  { %4056 = vrot.lane.b32.xlu1 %v10642_v42, %s5798_s7  ;;  %10643 = vst [vmem:[#allocation55_spill] sm:$0xff] %v8623_v10  ;;  %v5732_v32 = vpack.c.bf16 %v1478_v34, %v1477_v33  ;;  %v1480_v42 = vld [vmem:[%s9935_s3 + $0x28] sm:$0xff]  ;;  %v4225_v10 = vcombine.low %v10492_v36, %v8007_v30  ;;  %v3882_v33 = vcombine.low %v1473_v56, %v8617_v37  ;;  %v10648_v36 = vld [vmem:[#allocation131_spill] sm:$0xff]  ;;  %v1482_v37 = vld [vmem:[%s9935_s3 + $0x38] sm:$0xff] }
 0x29f   :  { %3724 = vrot.lane.b32.xlu0 %v7526_v59, %s5797_s2  ;;  %v5736_v39 = vpack.c.bf16 %v1480_v42, %v1479_v61  ;;  %v4226_v34 = vcombine.low %v8026_v54, %v1473_v56  ;;  %v3873_v47 = vrot.slane %v10648_v36, %v6147_v5  ;;  %v10649_v61 = vcombine.low %v8007_v30, %v8026_v54  ;;  %v1481_v56 = vld [vmem:[%s9935_s3 + $0x30] sm:$0xff] }
 0x2a0   :  { %v8631_v7 = vpop.permute.xlu1 %2448  ;;  %5733 = vmatprep.subr.bf16.mxu1 %v5732_v32  ;;  %v5740_v36 = vpack.c.bf16 %v1482_v37, %v1481_v56  ;;  %v8672_v30 = vrot.slane %v3882_v33, %v6147_v5  ;;  %v4048_v54 = vrot.slane %v8645_v62, %v6147_v5  ;;  %v10677_v62 = vld [vmem:[#allocation74_spill] sm:$0xff] }
 0x2a1   :  { %10644 = vst [vmem:[#allocation269_spill] sm:$0xff] %v8631_v7  ;;  %v10646_v7 = vld [vmem:[#allocation41_spill] sm:$0xff]  ;;  %v8651_v8 = vpop.permute.xlu0 %3194  ;;  %5735 = vmatpush3.bf16.msra.mxu1 %v5732_v32  ;;  %v3880_v42 = vrot.slane %v10649_v61, %v6147_v5  ;;  %v10651_v32 = vld [vmem:[#allocation19_spill] sm:$0xff]  ;;  %v8677_v61 = vrot.slane %v4225_v10, %v6147_v5 }
 0x2a2   :  { %3892 = vrot.lane.b32.xlu1 %v10646_v7, %s5799_s16  ;;  %10647 = vst [vmem:[#allocation41_spill] sm:$0xff] %v8651_v8  ;;  %5737 = vmatprep.subr.bf16.mxu1 %v5736_v39  ;;  %v10652_v8 = vld [vmem:[#allocation51_spill] sm:$0xff]  ;;  %10653 = vst [vmem:[#allocation19_spill] sm:$0xff] %v8672_v30  ;;  %v1483_v10 = vld [vmem:[%s9935_s3 + $0x40] sm:$0xff] }
 0x2a3   :  { %3890 = vrot.lane.b32.xlu0 %v10651_v32, %s5799_s16  ;;  %10654 = vst [vmem:[#allocation51_spill] sm:$0xff] %v8677_v61  ;;  %v8686_v37 = vcombine.low %v3873_v47, %v3880_v42  ;;  %v10668_v61 = vld [vmem:[#allocation129_spill] sm:$0xff] }
 0x2a4   :  { %v8659_v60 = vpop.permute.xlu1 %3386 }
 0x2a5   :  { %10650 = vst [vmem:[#allocation131_spill] sm:$0xff] %v8659_v60  ;;  %v8680_v60 = vrot.slane %v4226_v34, %v6147_v5  ;;  %v8682_v40 = vpop.permute.xlu0 %2450  ;;  %5739 = vmatpush3.bf16.msra.mxu1 %v5736_v39  ;;  %10658 = vst [vmem:[#allocation274_spill] sm:$0xff] %v8686_v37  ;;  %v10660_v39 = vld [vmem:[#allocation99_spill] sm:$0xff]  ;;  %v4053_v47 = vrot.slane %v8686_v37, 1  ;;  %v10681_v37 = vld [vmem:[#allocation124_spill] sm:$0xff] }
 0x2a6   :  { %4058 = vrot.lane.b32.xlu1 %v10652_v8, %s5798_s7  ;;  %10656 = vst [vmem:[#allocation272_spill] sm:$0xff] %v8682_v40  ;;  %5741 = vmatprep.subr.bf16.mxu1 %v5740_v36  ;;  %v8689_v8 = vcombine.low %v8672_v30, %v4048_v54  ;;  %v10664_v54 = vld [vmem:[#allocation36_spill] sm:$0xff] }
 0x2a7   :  { %10655 = vst [vmem:[#allocation271_spill] sm:$0xff] %v8680_v60  ;;  %4250 = vrot.lane.b32.xlu0 %v10626_v4, %s5800_s21 }
 0x2a8   :  { %v8684_v52 = vpop.permute.xlu1 %3196  ;;  %10659 = vst [vmem:[#allocation275_spill] sm:$0xff] %v8689_v8  ;;  %v10215_v34 = vrot.slane %v8689_v8, 1 }
 0x2a9   :  { %10657 = vst [vmem:[#allocation273_spill] sm:$0xff] %v8684_v52  ;;  %v8702_v42 = vpop.permute.xlu0 %3550  ;;  %5743 = vmatpush3.bf16.msra.mxu1 %v5740_v36  ;;  %v10667_v36 = vld [vmem:[#allocation78_spill] sm:$0xff] }
 0x2aa   :  { %3898 = vrot.lane.b32.xlu1 %v10660_v39, %s5799_s16  ;;  %10661 = vst [vmem:[#allocation99_spill] sm:$0xff] %v8702_v42  ;;  %5666 = vmatprep.subr.mxu1 %v1483_v10  ;;  %v8709_v4 = vsel %vm2325_vm3, %v4053_v47, %v10215_v34  ;;  %v10673_v34 = vld [vmem:[#allocation71_spill] sm:$0xff] }
 0x2ab   :  { %10663 = vst [vmem:[#allocation277_spill] sm:$0xff] %v8709_v4  ;;  %3894 = vrot.lane.b32.xlu0 %v10664_v54, %s5799_s16 }
 0x2ac   :  { %v8704_v56 = vpop.permute.xlu1 %2452 }
 0x2ad   :  { %10662 = vst [vmem:[#allocation276_spill] sm:$0xff] %v8704_v56  ;;  %v8715_v33 = vpop.permute.xlu0 %3198  ;;  %5667 = vmatpush3.msra.mxu1 %v1483_v10  ;;  %v10725_v56 = vld [vmem:[#allocation183_spill] sm:$0xff] }
 0x2ae   :  { %4254 = vrot.lane.b32.xlu1 %v10630_v55, %s5800_s21  ;;  %10665 = vst [vmem:[#allocation36_spill] sm:$0xff] %v8715_v33  ;;  %v10726_v33 = vld [vmem:[#allocation199_spill] sm:$0xff] }
 0x2af   :  { %4060 = vrot.lane.b32.xlu0 %v10667_v36, %s5798_s7  ;;  %v10674_v36 = vld [vmem:[#allocation116_spill] sm:$0xff] }
 0x2b0   :  { %v8717_v60 = vpop.permute.xlu1 %3552 }
 0x2b1   :  { %10666 = vst [vmem:[#allocation278_spill] sm:$0xff] %v8717_v60  ;;  %v8723_v30 = vpop.permute.xlu0 %3388  ;;  %v10727_v60 = vld [vmem:[#allocation147_spill] sm:$0xff] }
 0x2b2   :  { %4064 = vrot.lane.b32.xlu1 %v10668_v61, %s5798_s7  ;;  %10669 = vst [vmem:[#allocation78_spill] sm:$0xff] %v8723_v30 }
 0x2b3   :  { %4252 = vrot.lane.b32.xlu0 %v10619_v49, %s5800_s21  ;;  %v10678_v49 = vld [vmem:[#allocation155_spill] sm:$0xff] }
 0x2b4   :  { %v8725_v47 = vpop.permute.xlu1 %3200 }
 0x2b5   :  { %10670 = vst [vmem:[#allocation129_spill] sm:$0xff] %v8725_v47  ;;  %v8731_v55 = vpop.permute.xlu0 %2454 }
 0x2b6   :  { %4258 = vrot.lane.b32.xlu1 %v10633_v50, %s5800_s21  ;;  %10671 = vst [vmem:[#allocation279_spill] sm:$0xff] %v8731_v55 }
 0x2b7   :  { %3896 = vrot.lane.b32.xlu0 %v10673_v34, %s5799_s16 }
 0x2b8   :  { %v8733_v10 = vpop.permute.xlu1 %3390 }
 0x2b9   :  { %10672 = vst [vmem:[#allocation280_spill] sm:$0xff] %v8733_v10  ;;  %v8739_v61 = vpop.permute.xlu0 %3554 }
 0x2ba   :  { %3902 = vrot.lane.b32.xlu1 %v10674_v36, %s5799_s16  ;;  %10675 = vst [vmem:[#allocation71_spill] sm:$0xff] %v8739_v61 }
 0x2bb   :  { %4062 = vrot.lane.b32.xlu0 %v10677_v62, %s5798_s7  ;;  %v10685_v62 = vld [vmem:[#allocation134_spill] sm:$0xff] }
 0x2bc   :  { %v8741_v8 = vpop.permute.xlu1 %2456 }
 0x2bd   :  { %10676 = vst [vmem:[#allocation116_spill] sm:$0xff] %v8741_v8  ;;  %v8747_v50 = vpop.permute.xlu0 %3392  ;;  %v10684_v8 = vld [vmem:[#allocation115_spill] sm:$0xff] }
 0x2be   :  { %4068 = vrot.lane.b32.xlu1 %v10678_v49, %s5798_s7  ;;  %10679 = vst [vmem:[#allocation74_spill] sm:$0xff] %v8747_v50 }
 0x2bf   :  { %4256 = vrot.lane.b32.xlu0 %v10623_v9, %s5800_s21 }
 0x2c0   :  { %v8749_v47 = vpop.permute.xlu1 %3556 }
 0x2c1   :  { %10680 = vst [vmem:[#allocation155_spill] sm:$0xff] %v8749_v47  ;;  %v8755_v4 = vpop.permute.xlu0 %3202  ;;  %v10688_v47 = vld [vmem:[#allocation143_spill] sm:$0xff] }
 0x2c2   :  { %4066 = vrot.lane.b32.xlu1 %v10681_v37, %s5798_s7  ;;  %10682 = vst [vmem:[#allocation124_spill] sm:$0xff] %v8755_v4 }
 0x2c3   :  { %3900 = vrot.lane.b32.xlu0 %v10684_v8, %s5799_s16 }
 0x2c4   :  { %v8757_v10 = vpop.permute.xlu1 %3394 }
 0x2c5   :  { %10683 = vst [vmem:[#allocation281_spill] sm:$0xff] %v8757_v10  ;;  %v8763_v49 = vpop.permute.xlu0 %2458 }
 0x2c6   :  { %3906 = vrot.lane.b32.xlu1 %v10685_v62, %s5799_s16  ;;  %10686 = vst [vmem:[#allocation115_spill] sm:$0xff] %v8763_v49  ;;  %v10694_v49 = vld [vmem:[#allocation167_spill] sm:$0xff] }
 0x2c7   :  { %3904 = vrot.lane.b32.xlu0 %v10688_v47, %s5799_s16 }
 0x2c8   :  { %v8765_v52 = vpop.permute.xlu1 %3204 }
 0x2c9   :  { %10687 = vst [vmem:[#allocation134_spill] sm:$0xff] %v8765_v52  ;;  %v8771_v9 = vpop.permute.xlu0 %3558  ;;  %v10693_v52 = vld [vmem:[#allocation151_spill] sm:$0xff] }
 0x2ca   :  { %4260 = vrot.lane.b32.xlu1 %v10627_v46, %s5800_s21  ;;  %10689 = vst [vmem:[#allocation282_spill] sm:$0xff] %v8771_v9 }
 0x2cb   :  { %4262 = vrot.lane.b32.xlu0 %v10636_v17, %s5800_s21  ;;  %v10698_v17 = vld [vmem:[#allocation170_spill] sm:$0xff] }
 0x2cc   :  { %v8773_v37 = vpop.permute.xlu1 %2460 }
 0x2cd   :  { %10690 = vst [vmem:[#allocation283_spill] sm:$0xff] %v8773_v37  ;;  %v8779_v10 = vpop.permute.xlu0 %3206  ;;  %v10697_v37 = vld [vmem:[#allocation84_spill] sm:$0xff] }
 0x2ce   :  { %4264 = vrot.lane.b32.xlu1 %v7625_v27, %s5800_s21  ;;  %10691 = vst [vmem:[#allocation284_spill] sm:$0xff] %v8779_v10 }
 0x2cf   :  { %4070 = vrot.lane.b32.xlu0 %v10693_v52, %s5798_s7  ;;  %v10701_v52 = vld [vmem:[#allocation95_spill] sm:$0xff] }
 0x2d0   :  { %v8781_v4 = vpop.permute.xlu1 %3560 }
 0x2d1   :  { %10692 = vst [vmem:[#allocation285_spill] sm:$0xff] %v8781_v4  ;;  %v8787_v46 = vpop.permute.xlu0 %3396 }
 0x2d2   :  { %3908 = vrot.lane.b32.xlu1 %v10694_v49, %s5799_s16  ;;  %10695 = vst [vmem:[#allocation151_spill] sm:$0xff] %v8787_v46  ;;  %v10741_v49 = vld [vmem:[#allocation113_spill] sm:$0xff] }
 0x2d3   :  { %4072 = vrot.lane.b32.xlu0 %v10697_v37, %s5798_s7 }
 0x2d4   :  { %v8789_v9 = vpop.permute.xlu1 %3208 }
 0x2d5   :  { %10696 = vst [vmem:[#allocation286_spill] sm:$0xff] %v8789_v9  ;;  %v8795_v27 = vpop.permute.xlu0 %2462  ;;  %v10704_v9 = vld [vmem:[#allocation139_spill] sm:$0xff] }
 0x2d6   :  { %4074 = vrot.lane.b32.xlu1 %v10698_v17, %s5798_s7  ;;  %10699 = vst [vmem:[#allocation84_spill] sm:$0xff] %v8795_v27 }
 0x2d7   :  { %4266 = vrot.lane.b32.xlu0 %v7450_v51, %s5800_s21  ;;  %v10708_v51 = vld [vmem:[#allocation44_spill] sm:$0xff] }
 0x2d8   :  { %v8797_v10 = vpop.permute.xlu1 %3398 }
 0x2d9   :  { %10700 = vst [vmem:[#allocation170_spill] sm:$0xff] %v8797_v10  ;;  %v8803_v4 = vpop.permute.xlu0 %3562  ;;  %v10707_v10 = vld [vmem:[#allocation180_spill] sm:$0xff] }
 0x2da   :  { %3914 = vrot.lane.b32.xlu1 %v10701_v52, %s5799_s16  ;;  %10702 = vst [vmem:[#allocation287_spill] sm:$0xff] %v8803_v4 }
 0x2db   :  { %3910 = vrot.lane.b32.xlu0 %v10704_v9, %s5799_s16 }
 0x2dc   :  { %v8805_v46 = vpop.permute.xlu1 %2464 }
 0x2dd   :  { %10703 = vst [vmem:[#allocation288_spill] sm:$0xff] %v8805_v46  ;;  %v8811_v37 = vpop.permute.xlu0 %3210  ;;  %v10713_v46 = vld [vmem:[#allocation175_spill] sm:$0xff] }
 0x2de   :  { %4270 = vrot.lane.b32.xlu1 %v7519_v15, %s5800_s21  ;;  %10705 = vst [vmem:[#allocation289_spill] sm:$0xff] %v8811_v37 }
 0x2df   :  { %4076 = vrot.lane.b32.xlu0 %v10707_v10, %s5798_s7  ;;  %v10714_v10 = vld [vmem:[#allocation144_spill] sm:$0xff] }
 0x2e0   :  { %v8813_v17 = vpop.permute.xlu1 %3564 }
 0x2e1   :  { %10706 = vst [vmem:[#allocation290_spill] sm:$0xff] %v8813_v17  ;;  %v8819_v27 = vpop.permute.xlu0 %3400 }
 0x2e2   :  { %4080 = vrot.lane.b32.xlu1 %v10708_v51, %s5798_s7  ;;  %10709 = vst [vmem:[#allocation180_spill] sm:$0xff] %v8819_v27 }
 0x2e3   :  { %4268 = vrot.lane.b32.xlu0 %v7776_v43, %s5800_s21  ;;  %v10718_v43 = vld [vmem:[#allocation49_spill] sm:$0xff] }
 0x2e4   :  { %v8821_v4 = vpop.permute.xlu1 %3588 }
 0x2e5   :  { %10710 = vst [vmem:[#allocation44_spill] sm:$0xff] %v8821_v4  ;;  %v8827_v15 = vpop.permute.xlu0 %2466  ;;  %v10717_v4 = vld [vmem:[#allocation178_spill] sm:$0xff] }
 0x2e6   :  { %4274 = vrot.lane.b32.xlu1 %v7526_v59, %s5800_s21  ;;  %10711 = vst [vmem:[#allocation291_spill] sm:$0xff] %v8827_v15 }
 0x2e7   :  { %3912 = vrot.lane.b32.xlu0 %v10713_v46, %s5799_s16  ;;  %v10740_v46 = vld [vmem:[#allocation91_spill] sm:$0xff] }
 0x2e8   :  { %v8829_v37 = vpop.permute.xlu1 %3592 }
 0x2e9   :  { %10712 = vst [vmem:[#allocation292_spill] sm:$0xff] %v8829_v37  ;;  %v8835_v51 = vpop.permute.xlu0 %3566  ;;  %v10720_v37 = vld [vmem:[#allocation135_spill] sm:$0xff] }
 0x2ea   :  { %3918 = vrot.lane.b32.xlu1 %v10714_v10, %s5799_s16  ;;  %10715 = vst [vmem:[#allocation293_spill] sm:$0xff] %v8835_v51 }
 0x2eb   :  { %4078 = vrot.lane.b32.xlu0 %v10717_v4, %s5798_s7  ;;  %v10723_v4 = vld [vmem:[#allocation188_spill] sm:$0xff] }
 0x2ec   :  { %v8837_v17 = vpop.permute.xlu1 %3596 }
 0x2ed   :  { %10716 = vst [vmem:[#allocation294_spill] sm:$0xff] %v8837_v17  ;;  %v8843_v59 = vpop.permute.xlu0 %3590  ;;  %v10722_v17 = vld [vmem:[#allocation96_spill] sm:$0xff] }
 0x2ee   :  { %4084 = vrot.lane.b32.xlu1 %v10718_v43, %s5798_s7  ;;  %10719 = vst [vmem:[#allocation178_spill] sm:$0xff] %v8843_v59 }
 0x2ef   :  { %4272 = vrot.lane.b32.xlu0 %v7874_v31, %s5800_s21  ;;  %v10724_v31 = vld [vmem:[#allocation190_spill] sm:$0xff] }
 0x2f0   :  { %v8845_v15 = vpop.permute.xlu1 %3698 }
 0x2f1   :  { %v8851_v27 = vpop.permute.xlu0 %3594 }
 0x2f2   :  { %3920 = vrot.lane.b32.xlu1 %v10720_v37, %s5799_s16  ;;  %10721 = vst [vmem:[#allocation49_spill] sm:$0xff] %v8851_v27 }
 0x2f3   :  { %3916 = vrot.lane.b32.xlu0 %v10722_v17, %s5799_s16  ;;  %v10735_v17 = vld [vmem:[#allocation109_spill] sm:$0xff] }
 0x2f4   :  { %v8853_v51 = vpop.permute.xlu1 %3702 }
 0x2f5   :  { %v3697_v43 = vpop.permute.xlu0 %3696 }
 0x2f6   :  { %4278 = vrot.lane.b32.xlu1 %v10723_v4, %s5800_s21 }
 0x2f7   :  { %3728 = vrot.lane.b32.xlu0 %v10723_v4, %s5797_s2  ;;  %v10728_v4 = vld [vmem:[#allocation128_spill] sm:$0xff] }
 0x2f8   :  { %v8859_v59 = vpop.permute.xlu1 %3706 }
 0x2f9   :  { %v8865_v50 = vpop.permute.xlu0 %3700 }
 0x2fa   :  { %4086 = vrot.lane.b32.xlu1 %v10724_v31, %s5798_s7 }
 0x2fb   :  { %4082 = vrot.lane.b32.xlu0 %v10725_v56, %s5798_s7  ;;  %v10730_v56 = vld [vmem:[#allocation146_spill] sm:$0xff] }
 0x2fc   :  { %v8867_v27 = vpop.permute.xlu1 %3710 }
 0x2fd   :  { %v8873_v55 = vpop.permute.xlu0 %3704 }
 0x2fe   :  { %4088 = vrot.lane.b32.xlu1 %v10726_v33, %s5798_s7 }
 0x2ff   :  { %3922 = vrot.lane.b32.xlu0 %v10727_v60, %s5799_s16 }
 0x300   :  { %v8875_v61 = vpop.permute.xlu1 %3714 }
 0x301   :  { %v8881_v31 = vpop.permute.xlu0 %3708 }
 0x302   :  { %3730 = vrot.lane.b32.xlu1 %v10728_v4, %s5797_s2 }
 0x303   :  { %4276 = vrot.lane.b32.xlu0 %v7922_v25, %s5800_s21  ;;  %v10733_v25 = vld [vmem:[#allocation195_spill] sm:$0xff] }
 0x304   :  { %v8883_v30 = vpop.permute.xlu1 %3718 }
 0x305   :  { %10729 = vst [vmem:[#allocation188_spill] sm:$0xff] %v8883_v30  ;;  %v8889_v33 = vpop.permute.xlu0 %3712 }
 0x306   :  { %4282 = vrot.lane.b32.xlu1 %v10730_v56, %s5800_s21 }
 0x307   :  { %4280 = vrot.lane.b32.xlu0 %v10728_v4, %s5800_s21 }
 0x308   :  { %v8891_v40 = vpop.permute.xlu1 %3722 }
 0x309   :  { %10731 = vst [vmem:[#allocation190_spill] sm:$0xff] %v8891_v40  ;;  %v8897_v42 = vpop.permute.xlu0 %3716  ;;  %v10736_v40 = vld [vmem:[#allocation13_spill] sm:$0xff] }
 0x30a   :  { %3926 = vrot.lane.b32.xlu1 %v7610_v53, %s5799_s16  ;;  %v4395_v4 = vsel %vm4394_vm4, %v10736_v40, %v10735_v17  ;;  %v10737_v53 = vld [vmem:[#allocation192_spill] sm:$0xff]  ;;  %v10742_v40 = vld [vmem:[#allocation137_spill] sm:$0xff] }
 0x30b   :  { %3732 = vrot.lane.b32.xlu0 %v10730_v56, %s5797_s2 }
 0x30c   :  { %v8899_v37 = vpop.permute.xlu1 %3726 }
 0x30d   :  { %10732 = vst [vmem:[#allocation183_spill] sm:$0xff] %v8899_v37  ;;  %v8905_v60 = vpop.permute.xlu0 %3720  ;;  %v10738_v37 = vld [vmem:[#allocation197_spill] sm:$0xff] }
 0x30e   :  { %4090 = vrot.lane.b32.xlu1 %v10733_v25, %s5798_s7  ;;  %10734 = vst [vmem:[#allocation199_spill] sm:$0xff] %v8905_v60  ;;  %v4444_v25 = vsel %vm4443_vm6, %v4395_v4, %v10740_v46  ;;  %v10748_v60 = vld [vmem:[#allocation61_spill] sm:$0xff] }
 0x30f   :  { %3924 = vrot.lane.b32.xlu0 %v10737_v53, %s5799_s16  ;;  %v4493_v52 = vsel %vm4492_vm5, %v4444_v25, %v10741_v49  ;;  %v10743_v49 = vld [vmem:[#allocation202_spill] sm:$0xff]  ;;  %v10744_v25 = vld [vmem:[#allocation53_spill] sm:$0xff] }
 0x310   :  { %v4057_v10 = vpop.permute.xlu1 %4056  ;;  %v4542_v17 = vsel %vm4541_vm7, %v4493_v52, %v10742_v40  ;;  %v10745_v52 = vld [vmem:[#allocation12_spill] sm:$0xff] }
 0x311   :  { %v8914_v56 = vpop.permute.xlu0 %3724  ;;  %v4591_v53 = vsel %vm4590_vm9, %v4542_v17, %v3697_v43  ;;  %v4397_v40 = vsel %vm4394_vm4, %v10745_v52, %v10744_v25  ;;  %v10749_v52 = vld [vmem:[#allocation97_spill] sm:$0xff] }
 0x312   :  { %3734 = vrot.lane.b32.xlu1 %v10738_v37, %s5797_s2  ;;  %10739 = vst [vmem:[#allocation128_spill] sm:$0xff] %v8914_v56 }
 0x313   :  { %3736 = vrot.lane.b32.xlu0 %v7620_v19, %s5797_s2 }
 0x314   :  { %v3893_v9 = vpop.permute.xlu1 %3892 }
 0x315   :  { %v3891_v56 = vpop.permute.xlu0 %3890 }
 0x316   :  { %4284 = vrot.lane.b32.xlu1 %v10738_v37, %s5800_s21  ;;  %v4640_v46 = vsel %vm4639_vm8, %v4591_v53, %v3891_v56  ;;  %v10746_v56 = vld [vmem:[#allocation207_spill] sm:$0xff] }
 0x317   :  { %4092 = vrot.lane.b32.xlu0 %v8142_v29, %s5798_s7  ;;  %v4689_v37 = vsel %vm4688_vm10, %v4640_v46, %v4057_v10  ;;  %v4446_v29 = vsel %vm4443_vm6, %v4397_v40, %v10747_v44  ;;  %v10750_v10 = vld [vmem:[#allocation9_spill] sm:$0xff]  ;;  %v10752_v44 = vld [vmem:[#allocation100_spill] sm:$0xff] }
 0x318   :  { %v4059_v4 = vpop.permute.xlu1 %4058  ;;  %v4396_v46 = vsel %vm4394_vm4, %v10750_v10, %v10749_v52  ;;  %v10755_v10 = vld [vmem:[#allocation43_spill] sm:$0xff] }
 0x319   :  { %v4251_v30 = vpop.permute.xlu0 %4250  ;;  %v4445_v40 = vsel %vm4443_vm6, %v4396_v46, %v10752_v44  ;;  %v10756_v46 = vld [vmem:[#allocation62_spill] sm:$0xff] }
 0x31a   :  { %3928 = vrot.lane.b32.xlu1 %v10743_v49, %s5799_s16  ;;  %v4738_v43 = vsel %vm4737_vm11, %v4689_v37, %v4251_v30  ;;  %v10751_v30 = vld [vmem:[#allocation145_spill] sm:$0xff]  ;;  %v3663_v44 = vcombine.low %v10756_v46, %v8117_v26  ;;  %v10763_v46 = vld [vmem:[#allocation38_spill] sm:$0xff] }
 0x31b   :  { %v4834_v53 = vcombine.high %v4738_v43, %v4738_v43  ;;  %3930 = vrot.lane.b32.xlu0 %v10746_v56, %s5799_s16  ;;  %v4495_v37 = vsel %vm4492_vm5, %v4446_v29, %v10751_v30 }
 0x31c   :  { %v3899_v17 = vpop.permute.xlu1 %3898 }
 0x31d   :  { %v4864_v49 = vcombine.low %v4738_v43, %v4834_v53  ;;  %v3895_v47 = vpop.permute.xlu0 %3894  ;;  %v10754_v53 = vld [vmem:[#allocation117_spill] sm:$0xff] }
 0x31e   :  { %4094 = vrot.lane.b32.xlu1 %v10748_v60, %s5798_s7  ;;  %v10753_v60 = vld [vmem:[#allocation165_spill] sm:$0xff]  ;;  %v4494_v56 = vsel %vm4492_vm5, %v4445_v40, %v10754_v53  ;;  %v10757_v40 = vld [vmem:[#allocation163_spill] sm:$0xff] }
 0x31f   :  { %4286 = vrot.lane.b32.xlu0 %v7620_v19, %s5800_s21  ;;  %5668 = vmatprep.mubr.msk.f32.mxu1 %vm4900_vm12, %v4864_v49  ;;  %v4544_v43 = vsel %vm4541_vm7, %v4495_v37, %v10753_v60  ;;  %v4543_v19 = vsel %vm4541_vm7, %v4494_v56, %v10755_v10 }
 0x320   :  { %v4255_v25 = vpop.permute.xlu1 %4254  ;;  %v4593_v29 = vsel %vm4590_vm9, %v4544_v43, %v8865_v50  ;;  %v4592_v37 = vsel %vm4590_vm9, %v4543_v19, %v8845_v15  ;;  %v4399_v50 = vsel %vm4394_vm4, %v10651_v32, %v10757_v40 }
 0x321   :  { %v4061_v52 = vpop.permute.xlu0 %4060  ;;  %v4642_v49 = vsel %vm4639_vm8, %v4593_v29, %v3895_v47  ;;  %v4641_v43 = vsel %vm4639_vm8, %v4592_v37, %v3893_v9  ;;  %v10758_v47 = vld [vmem:[#allocation205_spill] sm:$0xff]  ;;  %v10760_v9 = vld [vmem:[#allocation31_spill] sm:$0xff] }
 0x322   :  { %3740 = vrot.lane.b32.xlu1 %v8299_v2, %s5797_s2  ;;  %v4691_v60 = vsel %vm4688_vm10, %v4642_v49, %v4061_v52  ;;  %v4690_v53 = vsel %vm4688_vm10, %v4641_v43, %v4059_v4  ;;  %v8981_v52 = vrot.slane %v3663_v44, %v6147_v5  ;;  %v10761_v4 = vld [vmem:[#allocation136_spill] sm:$0xff] }
 0x323   :  { %4096 = vrot.lane.b32.xlu0 %v8190_v48, %s5798_s7  ;;  %v4740_v56 = vsel %vm4737_vm11, %v4691_v60, %v4255_v25  ;;  %v10759_v48 = vld [vmem:[#allocation52_spill] sm:$0xff]  ;;  %v10762_v25 = vld [vmem:[#allocation21_spill] sm:$0xff]  ;;  %v4200_v60 = vcombine.low %v8236_v38, %v8253_v16 }
 0x324   :  { %v4065_v30 = vpop.permute.xlu1 %4064  ;;  %v4448_v10 = vsel %vm4443_vm6, %v4399_v50, %v10759_v48  ;;  %v4398_v49 = vsel %vm4394_vm4, %v10762_v25, %v10761_v4  ;;  %v10765_v38 = vld [vmem:[#allocation157_spill] sm:$0xff]  ;;  %v4835_v4 = vcombine.high %v4740_v56, %v4740_v56 }
 0x325   :  { %v4253_v26 = vpop.permute.xlu0 %4252  ;;  %v4497_v19 = vsel %vm4492_vm5, %v4448_v10, %v10760_v9 }
 0x326   :  { %3738 = vrot.lane.b32.xlu1 %v10758_v47, %s5797_s2  ;;  %v4739_v15 = vsel %vm4737_vm11, %v4690_v53, %v4253_v26  ;;  %v4546_v44 = vsel %vm4541_vm7, %v4497_v19, %v10763_v46  ;;  %v10764_v53 = vld [vmem:[#allocation126_spill] sm:$0xff] }
 0x327   :  { %v4865_v32 = vcombine.low %v4739_v15, %v4740_v56  ;;  %4290 = vrot.lane.b32.xlu0 %v8299_v2, %s5800_s21  ;;  %v4201_v2 = vcombine.low %v10556_v12, %v10562_v28  ;;  %v4595_v40 = vsel %vm4590_vm9, %v4546_v44, %v8873_v55  ;;  %v4447_v26 = vsel %vm4443_vm6, %v4398_v49, %v10764_v53  ;;  %v10766_v55 = vld [vmem:[#allocation171_spill] sm:$0xff] }
 0x328   :  { %v4259_v29 = vpop.permute.xlu1 %4258  ;;  %v4644_v43 = vsel %vm4639_vm8, %v4595_v40, %v3899_v17  ;;  %v4496_v16 = vsel %vm4492_vm5, %v4447_v26, %v10765_v38 }
 0x329   :  { %5669 = vmatmul.mubr.msk.f32.vlgmr.msra.gmra.mrb[30].mxu1 %vm4900_vm12, %v4865_v32  ;;  %v3897_v37 = vpop.permute.xlu0 %3896  ;;  %v4693_v15 = vsel %vm4688_vm10, %v4644_v43, %v4065_v30  ;;  %v4545_v17 = vsel %vm4541_vm7, %v4496_v16, %v10766_v55  ;;  %v4215_v10 = vrot.slane %v4201_v2, %v6147_v5  ;;  %v10770_v2 = vld [vmem:[#allocation179_spill] sm:$0xff]  ;;  %v10773_v16 = vrot.slane %v8335_v23, 1 }
 0x32a   :  { %3742 = vrot.lane.b32.xlu1 %v8981_v52, %s5797_s2  ;;  %v4742_v12 = vsel %vm4737_vm11, %v4693_v15, %v4259_v29  ;;  %v4594_v30 = vsel %vm4590_vm9, %v4545_v17, %v8853_v51  ;;  %v10767_v29 = vld [vmem:[#allocation77_spill] sm:$0xff]  ;;  %v4401_v56 = vsel %vm4394_vm4, %v10664_v54, %v10770_v2  ;;  %v10771_v43 = vld [vmem:[#allocation187_spill] sm:$0xff]  ;;  %v10772_v15 = vld [vmem:[#allocation80_spill] sm:$0xff] }
 0x32b   :  { %4288 = vrot.lane.b32.xlu0 %v10758_v47, %s5800_s21  ;;  %v4208_v47 = vrot.slane %v4200_v60, %v6147_v5  ;;  %v4643_v32 = vsel %vm4639_vm8, %v4594_v30, %v3897_v37  ;;  %v4400_v9 = vsel %vm4394_vm4, %v10646_v7, %v10767_v29  ;;  %v10769_v60 = vld [vmem:[#allocation173_spill] sm:$0xff]  ;;  %v4450_v38 = vsel %vm4443_vm6, %v4401_v56, %v10772_v15  ;;  %v10775_v17 = vld [vmem:[#allocation98_spill] sm:$0xff] }
 0x32c   :  { %v3903_v50 = vpop.permute.xlu1 %3902  ;;  %v10782_v56 = vld [vmem:[#allocation186_spill] sm:$0xff] }
 0x32d   :  { %v4063_v28 = vpop.permute.xlu0 %4062  ;;  %v4216_v46 = vcombine.low %v4208_v47, %v4215_v10  ;;  %v10776_v47 = vld [vmem:[#allocation198_spill] sm:$0xff] }
 0x32e   :  { %4100 = vrot.lane.b32.xlu1 %v8356_v58, %s5798_s7  ;;  %v4836_v58 = vcombine.high %v4742_v12, %v4742_v12  ;;  %v4692_v19 = vsel %vm4688_vm10, %v4643_v32, %v4063_v28 }
 0x32f   :  { %3934 = vrot.lane.b32.xlu0 %v8332_v21, %s5799_s16  ;;  %v10768_v21 = vld [vmem:[#allocation6_spill] sm:$0xff] }
 0x330   :  { %v4069_v48 = vpop.permute.xlu1 %4068  ;;  %v4449_v37 = vsel %vm4443_vm6, %v4400_v9, %v10768_v21 }
 0x331   :  { %v4257_v25 = vpop.permute.xlu0 %4256  ;;  %v4498_v7 = vsel %vm4492_vm5, %v4449_v37, %v10769_v60 }
 0x332   :  { %3936 = vrot.lane.b32.xlu1 %v8310_v35, %s5799_s16  ;;  %v4741_v49 = vsel %vm4737_vm11, %v4692_v19, %v4257_v25  ;;  %v4867_v35 = vcombine.low %v4742_v12, %v4836_v58  ;;  %v4547_v53 = vsel %vm4541_vm7, %v4498_v7, %v10771_v43  ;;  %v10774_v12 = vld [vmem:[#allocation40_spill] sm:$0xff] }
 0x333   :  { %v4866_v44 = vcombine.low %v4835_v4, %v4741_v49  ;;  %3932 = vrot.lane.b32.xlu0 %v8138_v20, %s5799_s16  ;;  %v4596_v26 = vsel %vm4590_vm9, %v4547_v53, %v8859_v59  ;;  %v4499_v28 = vsel %vm4492_vm5, %v4450_v38, %v10774_v12  ;;  %v4402_v59 = vsel %vm4394_vm4, %v10673_v34, %v10775_v17  ;;  %v10777_v34 = vld [vmem:[#allocation86_spill] sm:$0xff]  ;;  %v10779_v49 = vld [vmem:[#allocation203_spill] sm:$0xff]  ;;  %v10785_v17 = vld [vmem:[#allocation208_spill] sm:$0xff] }
 0x334   :  { %v4067_v51 = vpop.permute.xlu1 %4066  ;;  %v4451_v29 = vsel %vm4443_vm6, %v4402_v59, %v10777_v34  ;;  %v10778_v4 = vld [vmem:[#allocation50_spill] sm:$0xff]  ;;  %v4405_v59 = vsel %vm4394_vm4, %v10674_v36, %v10785_v17  ;;  %v10790_v34 = vld [vmem:[#allocation224_spill] sm:$0xff] }
 0x335   :  { %5671 = vmatprep.mubr.msk.f32.mxu1 %vm4900_vm12, %v4866_v44  ;;  %v3901_v40 = vpop.permute.xlu0 %3900  ;;  %v10781_v44 = vld [vmem:[#allocation194_spill] sm:$0xff] }
 0x336   :  { %4294 = vrot.lane.b32.xlu1 %v4216_v46, %s5800_s21  ;;  %5672 = vmatmul.mubr.msk.f32.gmra.mrb[32].mxu1 %vm4900_vm12, %v4867_v35  ;;  %v4645_v54 = vsel %vm4639_vm8, %v4596_v26, %v3901_v40  ;;  %v10780_v46 = vld [vmem:[#allocation222_spill] sm:$0xff]  ;;  %v4403_v21 = vsel %vm4394_vm4, %v10660_v39, %v10781_v44  ;;  %v10783_v39 = vld [vmem:[#allocation141_spill] sm:$0xff] }
 0x337   :  { %3744 = vrot.lane.b32.xlu0 %v7725_v18, %s5797_s2  ;;  %v4548_v18 = vsel %vm4541_vm7, %v4499_v28, %v10776_v47  ;;  %v4694_v23 = vsel %vm4688_vm10, %v4645_v54, %v4067_v51  ;;  %v10784_v26 = vld [vmem:[#allocation210_spill] sm:$0xff] }
 0x338   :  { %v3907_v20 = vpop.permute.xlu1 %3906  ;;  %v4597_v30 = vsel %vm4590_vm9, %v4548_v18, %v8881_v31  ;;  %v4500_v31 = vsel %vm4492_vm5, %v4451_v29, %v10778_v4  ;;  %v10791_v29 = vld [vmem:[#allocation56_spill] sm:$0xff] }
 0x339   :  { %v3905_v55 = vpop.permute.xlu0 %3904  ;;  %v4646_v58 = vsel %vm4639_vm8, %v4597_v30, %v3903_v50  ;;  %v4549_v50 = vsel %vm4541_vm7, %v4500_v31, %v10779_v49  ;;  %v10787_v30 = vld [vmem:[#allocation57_spill] sm:$0xff] }
 0x33a   :  { %4102 = vrot.lane.b32.xlu1 %v10773_v16, %s5798_s7  ;;  %v4695_v9 = vsel %vm4688_vm10, %v4646_v58, %v4069_v48  ;;  %v4217_v48 = vcombine.low %v10559_v57, %v8287_v11  ;;  %v4452_v57 = vsel %vm4443_vm6, %v4403_v21, %v10782_v56  ;;  %v10792_v31 = vld [vmem:[#allocation213_spill] sm:$0xff] }
 0x33b   :  { %4098 = vrot.lane.b32.xlu0 %v8176_v6, %s5798_s7  ;;  %v4501_v40 = vsel %vm4492_vm5, %v4452_v57, %v10783_v39  ;;  %v10798_v57 = vld [vmem:[#allocation227_spill] sm:$0xff] }
 0x33c   :  { %v4261_v10 = vpop.permute.xlu1 %4260  ;;  %v4224_v53 = vrot.slane %v4217_v48, %v6147_v5  ;;  %v4550_v15 = vsel %vm4541_vm7, %v4501_v40, %v10784_v26  ;;  %v10799_v40 = vld [vmem:[#allocation199_spill] sm:$0xff]  ;;  %v10800_v26 = vld [vmem:[#allocation121_spill] sm:$0xff] }
 0x33d   :  { %v4743_v32 = vsel %vm4737_vm11, %v4694_v23, %v4261_v10  ;;  %v4263_v19 = vpop.permute.xlu0 %4262  ;;  %v4454_v23 = vsel %vm4443_vm6, %v4405_v59, %v10787_v30  ;;  %v10804_v59 = vld [vmem:[#allocation223_spill] sm:$0xff]  ;;  %v10806_v30 = vld [vmem:[#allocation182_spill] sm:$0xff] }
 0x33e   :  { %4104 = vrot.lane.b32.xlu1 %v8349_v14, %s5798_s7  ;;  %v4744_v6 = vsel %vm4737_vm11, %v4695_v9, %v4263_v19  ;;  %v4598_v14 = vsel %vm4590_vm9, %v4549_v50, %v8867_v27 }
 0x33f   :  { %v4868_v51 = vcombine.low %v4743_v32, %v4744_v6  ;;  %3938 = vrot.lane.b32.xlu0 %v8316_v1, %s5799_s16  ;;  %v4647_v37 = vsel %vm4639_vm8, %v4598_v14, %v3905_v55  ;;  %v4837_v60 = vcombine.high %v4744_v6, %v4744_v6  ;;  %v10788_v32 = vld [vmem:[#allocation217_spill] sm:$0xff] }
 0x340   :  { %v4265_v25 = vpop.permute.xlu1 %4264  ;;  %v4503_v36 = vsel %vm4492_vm5, %v4454_v23, %v10788_v32 }
 0x341   :  { %5674 = vmatprep.mubr.msk.f32.mxu1 %vm4900_vm12, %v4868_v51  ;;  %v4071_v35 = vpop.permute.xlu0 %4070  ;;  %v10793_v51 = vld [vmem:[#allocation65_spill] sm:$0xff] }
 0x342   :  { %3746 = vrot.lane.b32.xlu1 %v10780_v46, %s5797_s2  ;;  %v4696_v7 = vsel %vm4688_vm10, %v4647_v37, %v4071_v35  ;;  %v4407_v14 = vsel %vm4394_vm4, %v10685_v62, %v10793_v51  ;;  %v10794_v37 = vld [vmem:[#allocation214_spill] sm:$0xff]  ;;  %v10795_v62 = vld [vmem:[#allocation68_spill] sm:$0xff]  ;;  %v10814_v51 = vld [vmem:[#allocation167_spill] sm:$0xff] }
 0x343   :  { %v4745_v27 = vsel %vm4737_vm11, %v4696_v7, %v4265_v25  ;;  %4292 = vrot.lane.b32.xlu0 %v8981_v52, %s5800_s21  ;;  %v4599_v52 = vsel %vm4590_vm9, %v4550_v15, %v8889_v33  ;;  %v10786_v33 = vld [vmem:[#allocation196_spill] sm:$0xff]  ;;  %v4456_v35 = vsel %vm4443_vm6, %v4407_v14, %v10794_v37 }
 0x344   :  { %v3909_v2 = vpop.permute.xlu1 %3908  ;;  %v4869_v11 = vcombine.low %v4837_v60, %v4745_v27  ;;  %v4648_v54 = vsel %vm4639_vm8, %v4599_v52, %v3907_v20  ;;  %v4404_v20 = vsel %vm4394_vm4, %v10684_v8, %v10786_v33  ;;  %v4552_v8 = vsel %vm4541_vm7, %v4503_v36, %v8304_v3  ;;  %v10797_v27 = vld [vmem:[#allocation143_spill] sm:$0xff]  ;;  %v10801_v15 = vld [vmem:[#allocation72_spill] sm:$0xff] }
 0x345   :  { %v4073_v43 = vpop.permute.xlu0 %4072  ;;  %v4601_v19 = vsel %vm4590_vm9, %v4552_v8, %v8897_v42  ;;  %v4505_v7 = vsel %vm4492_vm5, %v4456_v35, %v10795_v62  ;;  %v10805_v33 = vld [vmem:[#allocation188_spill] sm:$0xff]  ;;  %v10807_v8 = vld [vmem:[#allocation243_spill] sm:$0xff]  ;;  %v10818_v35 = vld [vmem:[#allocation249_spill] sm:$0xff] }
 0x346   :  { %4298 = vrot.lane.b32.xlu1 %v7789_v0, %s5800_s21  ;;  %5675 = vmatmul.mubr.msk.f32.gmra.mrb[34].mxu1 %vm4900_vm12, %v4869_v11  ;;  %v4697_v16 = vsel %vm4688_vm10, %v4648_v54, %v4073_v43  ;;  %v4554_v11 = vsel %vm4541_vm7, %v4505_v7, %v10798_v57  ;;  %v10802_v54 = vld [vmem:[#allocation231_spill] sm:$0xff]  ;;  %v10820_v7 = vld [vmem:[#allocation225_spill] sm:$0xff] }
 0x347   :  { %4296 = vrot.lane.b32.xlu0 %v4224_v53, %s5800_s21  ;;  %v4603_v43 = vsel %vm4590_vm9, %v4554_v11, %v10799_v40  ;;  %v10822_v57 = vld [vmem:[#allocation7_spill] sm:$0xff]  ;;  %v10824_v40 = vld [vmem:[#allocation228_spill] sm:$0xff] }
 0x348   :  { %v4075_v38 = vpop.permute.xlu1 %4074  ;;  %v10823_v11 = vld [vmem:[#allocation87_spill] sm:$0xff] }
 0x349   :  { %v4267_v12 = vpop.permute.xlu0 %4266 }
 0x34a   :  { %3942 = vrot.lane.b32.xlu1 %v7851_v63, %s5799_s16  ;;  %v4746_v28 = vsel %vm4737_vm11, %v4697_v16, %v4267_v12  ;;  %v10803_v16 = vld [vmem:[#allocation221_spill] sm:$0xff] }
 0x34b   :  { %v4838_v47 = vcombine.high %v4746_v28, %v4746_v28  ;;  %3748 = vrot.lane.b32.xlu0 %v7789_v0, %s5797_s2  ;;  %v10789_v0 = vld [vmem:[#allocation48_spill] sm:$0xff] }
 0x34c   :  { %v3915_v55 = vpop.permute.xlu1 %3914 }
 0x34d   :  { %v4870_v18 = vcombine.low %v4746_v28, %v4838_v47  ;;  %v3911_v10 = vpop.permute.xlu0 %3910  ;;  %v4652_v53 = vsel %vm4639_vm8, %v4603_v43, %v3915_v55  ;;  %v10825_v43 = vld [vmem:[#allocation175_spill] sm:$0xff] }
 0x34e   :  { %4106 = vrot.lane.b32.xlu1 %v8324_v45, %s5798_s7  ;;  %v4453_v45 = vsel %vm4443_vm6, %v4404_v20, %v10789_v0  ;;  %v4650_v25 = vsel %vm4639_vm8, %v4601_v19, %v3911_v10  ;;  %v10809_v19 = vld [vmem:[#allocation241_spill] sm:$0xff] }
 0x34f   :  { %3940 = vrot.lane.b32.xlu0 %v8279_v24, %s5799_s16  ;;  %5677 = vmatprep.mubr.msk.f32.mxu1 %vm4900_vm12, %v4870_v18  ;;  %v4502_v9 = vsel %vm4492_vm5, %v4453_v45, %v10791_v29 }
 0x350   :  { %v4271_v58 = vpop.permute.xlu1 %4270  ;;  %v4551_v6 = vsel %vm4541_vm7, %v4502_v9, %v10792_v31 }
 0x351   :  { %v4077_v4 = vpop.permute.xlu0 %4076  ;;  %v4600_v50 = vsel %vm4590_vm9, %v4551_v6, %v8875_v61  ;;  %v10810_v6 = vld [vmem:[#allocation234_spill] sm:$0xff] }
 0x352   :  { %3750 = vrot.lane.b32.xlu1 %v10790_v34, %s5797_s2  ;;  %v4699_v3 = vsel %vm4688_vm10, %v4650_v25, %v4077_v4  ;;  %v4649_v42 = vsel %vm4639_vm8, %v4600_v50, %v3909_v2  ;;  %v10796_v2 = vld [vmem:[#allocation73_spill] sm:$0xff]  ;;  %v10811_v25 = vld [vmem:[#allocation95_spill] sm:$0xff] }
 0x353   :  { %3752 = vrot.lane.b32.xlu0 %v8394_v13, %s5797_s2  ;;  %v4698_v46 = vsel %vm4688_vm10, %v4649_v42, %v4075_v38  ;;  %v4748_v44 = vsel %vm4737_vm11, %v4699_v3, %v4271_v58  ;;  %v4406_v56 = vsel %vm4394_vm4, %v10797_v27, %v10796_v2  ;;  %v10812_v50 = vld [vmem:[#allocation253_spill] sm:$0xff]  ;;  %v10815_v42 = vld [vmem:[#allocation88_spill] sm:$0xff]  ;;  %v10821_v27 = vld [vmem:[#allocation238_spill] sm:$0xff] }
 0x354   :  { %v4081_v49 = vpop.permute.xlu1 %4080  ;;  %v4455_v38 = vsel %vm4443_vm6, %v4406_v56, %v10801_v15  ;;  %v4839_v58 = vcombine.high %v4748_v44, %v4748_v44  ;;  %v10813_v3 = vld [vmem:[#allocation81_spill] sm:$0xff]  ;;  %v10826_v15 = vld [vmem:[#allocation232_spill] sm:$0xff] }
 0x355   :  { %v4269_v48 = vpop.permute.xlu0 %4268  ;;  %v4701_v52 = vsel %vm4688_vm10, %v4652_v53, %v4081_v49  ;;  %v4504_v12 = vsel %vm4492_vm5, %v4455_v38, %v10803_v16  ;;  %v4411_v49 = vsel %vm4394_vm4, %v10811_v25, %v10810_v6  ;;  %v4408_v14 = vsel %vm4394_vm4, %v10814_v51, %v10813_v3 }
 0x356   :  { %4300 = vrot.lane.b32.xlu1 %v10790_v34, %s5800_s21  ;;  %v4747_v61 = vsel %vm4737_vm11, %v4698_v46, %v4269_v48  ;;  %v4553_v55 = vsel %vm4541_vm7, %v4504_v12, %v10804_v59  ;;  %v10816_v46 = vld [vmem:[#allocation139_spill] sm:$0xff]  ;;  %v4410_v53 = vsel %vm4394_vm4, %v10825_v43, %v10824_v40  ;;  %v10828_v12 = vld [vmem:[#allocation230_spill] sm:$0xff]  ;;  %v10842_v40 = vld [vmem:[#allocation8_spill] sm:$0xff] }
 0x357   :  { %v4871_v60 = vcombine.low %v4747_v61, %v4748_v44  ;;  %4108 = vrot.lane.b32.xlu0 %v8412_v22, %s5798_s7  ;;  %v4602_v20 = vsel %vm4590_vm9, %v4553_v55, %v10805_v33  ;;  %v4409_v48 = vsel %vm4394_vm4, %v10816_v46, %v10815_v42  ;;  %v10837_v42 = vld [vmem:[#allocation183_spill] sm:$0xff] }
 0x358   :  { %v4275_v21 = vpop.permute.xlu1 %4274  ;;  %v4458_v2 = vsel %vm4443_vm6, %v4409_v48, %v10820_v7 }
 0x359   :  { %5678 = vmatmul.mubr.msk.f32.gmra.mrb[36].mxu1 %vm4900_vm12, %v4871_v60  ;;  %v3913_v39 = vpop.permute.xlu0 %3912  ;;  %v4750_v28 = vsel %vm4737_vm11, %v4701_v52, %v4275_v21  ;;  %v10817_v21 = vld [vmem:[#allocation229_spill] sm:$0xff]  ;;  %v10819_v60 = vld [vmem:[#allocation219_spill] sm:$0xff]  ;;  %v4507_v38 = vsel %vm4492_vm5, %v4458_v2, %v10826_v15 }
 0x35a   :  { %3944 = vrot.lane.b32.xlu1 %v8375_v41, %s5799_s16  ;;  %v4840_v18 = vcombine.high %v4750_v28, %v4750_v28  ;;  %v4651_v10 = vsel %vm4639_vm8, %v4602_v20, %v3913_v39  ;;  %v4460_v37 = vsel %vm4443_vm6, %v4411_v49, %v10817_v21  ;;  %v4457_v62 = vsel %vm4443_vm6, %v4408_v14, %v10819_v60  ;;  %v10827_v52 = vld [vmem:[#allocation247_spill] sm:$0xff]  ;;  %v10830_v20 = vld [vmem:[#allocation190_spill] sm:$0xff] }
 0x35b   :  { %3946 = vrot.lane.b32.xlu0 %v10800_v26, %s5799_s16  ;;  %v4509_v56 = vsel %vm4492_vm5, %v4460_v37, %v10821_v27  ;;  %v4506_v39 = vsel %vm4492_vm5, %v4457_v62, %v10823_v11  ;;  %v10838_v37 = vld [vmem:[#allocation10_spill] sm:$0xff]  ;;  %v10843_v15 = vld [vmem:[#allocation11_spill] sm:$0xff] }
 0x35c   :  { %v3919_v22 = vpop.permute.xlu1 %3918  ;;  %v4873_v34 = vcombine.low %v4750_v28, %v4840_v18  ;;  %v4555_v28 = vsel %vm4541_vm7, %v4506_v39, %v10828_v12  ;;  %v10841_v39 = vld [vmem:[#allocation14_spill] sm:$0xff] }
 0x35d   :  { %v4079_v17 = vpop.permute.xlu0 %4078  ;;  %v4604_v18 = vsel %vm4590_vm9, %v4555_v28, %v10830_v20  ;;  %v10846_v28 = vld [vmem:[#allocation245_spill] sm:$0xff] }
 0x35e   :  { %4110 = vrot.lane.b32.xlu1 %v10802_v54, %s5798_s7  ;;  %v4700_v23 = vsel %vm4688_vm10, %v4651_v10, %v4079_v17  ;;  %v4558_v54 = vsel %vm4541_vm7, %v4509_v56, %v10827_v52  ;;  %v10829_v17 = vld [vmem:[#allocation236_spill] sm:$0xff]  ;;  %v10839_v56 = vld [vmem:[#allocation239_spill] sm:$0xff]  ;;  %v10849_v20 = vld [vmem:[#allocation101_spill] sm:$0xff] }
 0x35f   :  { %4302 = vrot.lane.b32.xlu0 %v8394_v13, %s5800_s21  ;;  %v10808_v13 = vld [vmem:[#allocation233_spill] sm:$0xff]  ;;  %v4556_v59 = vsel %vm4541_vm7, %v4507_v38, %v10829_v17  ;;  %v10831_v10 = vld [vmem:[#allocation128_spill] sm:$0xff] }
 0x360   :  { %v4085_v47 = vpop.permute.xlu1 %4084  ;;  %v10847_v17 = vld [vmem:[#allocation144_spill] sm:$0xff] }
 0x361   :  { %v4273_v32 = vpop.permute.xlu0 %4272 }
 0x362   :  { %3756 = vrot.lane.b32.xlu1 %v10806_v30, %s5797_s2  ;;  %v4749_v36 = vsel %vm4737_vm11, %v4700_v23, %v4273_v32  ;;  %v10833_v32 = vld [vmem:[#allocation226_spill] sm:$0xff] }
 0x363   :  { %v4872_v45 = vcombine.low %v4839_v58, %v4749_v36  ;;  %4112 = vrot.lane.b32.xlu0 %v10807_v8, %s5798_s7  ;;  %v10832_v58 = vld [vmem:[#allocation235_spill] sm:$0xff]  ;;  %v4459_v36 = vsel %vm4443_vm6, %v4410_v53, %v10833_v32  ;;  %v10851_v32 = vld [vmem:[#allocation244_spill] sm:$0xff] }
 0x364   :  { %v3921_v0 = vpop.permute.xlu1 %3920 }
 0x365   :  { %5680 = vmatprep.mubr.msk.f32.mxu1 %vm4900_vm12, %v4872_v45  ;;  %v3917_v29 = vpop.permute.xlu0 %3916 }
 0x366   :  { %3754 = vrot.lane.b32.xlu1 %v10808_v13, %s5797_s2  ;;  %5681 = vmatmul.mubr.msk.f32.gmra.mrb[38].mxu1 %vm4900_vm12, %v4873_v34  ;;  %v4653_v8 = vsel %vm4639_vm8, %v4604_v18, %v3917_v29  ;;  %v10834_v34 = vld [vmem:[#allocation161_spill] sm:$0xff] }
 0x367   :  { %4306 = vrot.lane.b32.xlu0 %v10806_v30, %s5800_s21  ;;  %v4605_v30 = vsel %vm4590_vm9, %v4556_v59, %v10831_v10  ;;  %v4413_v59 = vsel %vm4394_vm4, %v10847_v17, %v10846_v28  ;;  %v10850_v10 = vld [vmem:[#allocation242_spill] sm:$0xff] }
 0x368   :  { %v4279_v9 = vpop.permute.xlu1 %4278  ;;  %v4654_v45 = vsel %vm4639_vm8, %v4605_v30, %v3919_v22  ;;  %v4462_v30 = vsel %vm4443_vm6, %v4413_v59, %v10850_v10  ;;  %v10868_v59 = vld [vmem:[#allocation29_spill] sm:$0xff] }
 0x369   :  { %v3729_v4 = vpop.permute.xlu0 %3728  ;;  %v4703_v6 = vsel %vm4688_vm10, %v4654_v45, %v4085_v47  ;;  %v10852_v45 = vld [vmem:[#allocation252_spill] sm:$0xff] }
 0x36a   :  { %3758 = vrot.lane.b32.xlu1 %v10809_v19, %s5797_s2  ;;  %v4607_v55 = vsel %vm4590_vm9, %v4558_v54, %v3729_v4  ;;  %v4752_v51 = vsel %vm4737_vm11, %v4703_v6, %v4279_v9  ;;  %v10844_v54 = vld [vmem:[#allocation237_spill] sm:$0xff] }
 0x36b   :  { %4304 = vrot.lane.b32.xlu0 %v10808_v13, %s5800_s21  ;;  %v10835_v13 = vld [vmem:[#allocation102_spill] sm:$0xff]  ;;  %v4841_v9 = vcombine.high %v4752_v51, %v4752_v51 }
 0x36c   :  { %v4087_v31 = vpop.permute.xlu1 %4086  ;;  %v4508_v4 = vsel %vm4492_vm5, %v4459_v36, %v10835_v13 }
 0x36d   :  { %v4083_v44 = vpop.permute.xlu0 %4082 }
 0x36e   :  { %4116 = vrot.lane.b32.xlu1 %v10812_v50, %s5798_s7  ;;  %v4702_v25 = vsel %vm4688_vm10, %v4653_v8, %v4083_v44  ;;  %v10836_v50 = vld [vmem:[#allocation240_spill] sm:$0xff]  ;;  %v4511_v8 = vsel %vm4492_vm5, %v4462_v30, %v10852_v45  ;;  %v10870_v30 = vld [vmem:[#allocation261_spill] sm:$0xff] }
 0x36f   :  { %3950 = vrot.lane.b32.xlu0 %v10818_v35, %s5799_s16  ;;  %v4557_v3 = vsel %vm4541_vm7, %v4508_v4, %v10836_v50  ;;  %v10854_v4 = vld [vmem:[#allocation258_spill] sm:$0xff] }
 0x370   :  { %v4089_v61 = vpop.permute.xlu1 %4088  ;;  %v4606_v46 = vsel %vm4590_vm9, %v4557_v3, %v10837_v42  ;;  %v4560_v6 = vsel %vm4541_vm7, %v4511_v8, %v10854_v4  ;;  %v10857_v42 = vld [vmem:[#allocation15_spill] sm:$0xff]  ;;  %v10871_v8 = vld [vmem:[#allocation26_spill] sm:$0xff]  ;;  %v10872_v4 = vld [vmem:[#allocation33_spill] sm:$0xff] }
 0x371   :  { %v3923_v16 = vpop.permute.xlu0 %3922  ;;  %v4655_v44 = vsel %vm4639_vm8, %v4606_v46, %v3921_v0  ;;  %v10840_v0 = vld [vmem:[#allocation24_spill] sm:$0xff]  ;;  %v10858_v46 = vld [vmem:[#allocation255_spill] sm:$0xff] }
 0x372   :  { %3952 = vrot.lane.b32.xlu1 %v10822_v57, %s5799_s16  ;;  %v4656_v23 = vsel %vm4639_vm8, %v4607_v55, %v3923_v16  ;;  %v4704_v60 = vsel %vm4688_vm10, %v4655_v44, %v4087_v31  ;;  %v10845_v16 = vld [vmem:[#allocation96_spill] sm:$0xff]  ;;  %v10848_v55 = vld [vmem:[#allocation17_spill] sm:$0xff] }
 0x373   :  { %3948 = vrot.lane.b32.xlu0 %v10832_v58, %s5799_s16  ;;  %v4705_v29 = vsel %vm4688_vm10, %v4656_v23, %v4089_v61  ;;  %v4412_v12 = vsel %vm4394_vm4, %v10845_v16, %v10844_v54  ;;  %v10866_v16 = vld [vmem:[#allocation39_spill] sm:$0xff] }
 0x374   :  { %v3731_v33 = vpop.permute.xlu1 %3730  ;;  %v4461_v18 = vsel %vm4443_vm6, %v4412_v12, %v10849_v20  ;;  %v10867_v12 = vld [vmem:[#allocation246_spill] sm:$0xff] }
 0x375   :  { %v4277_v49 = vpop.permute.xlu0 %4276  ;;  %v4510_v36 = vsel %vm4492_vm5, %v4461_v18, %v10851_v32 }
 0x376   :  { %4310 = vrot.lane.b32.xlu1 %v10834_v34, %s5800_s21  ;;  %v4751_v22 = vsel %vm4737_vm11, %v4702_v25, %v4277_v49  ;;  %v10855_v25 = vld [vmem:[#allocation22_spill] sm:$0xff] }
 0x377   :  { %v4874_v48 = vcombine.low %v4751_v22, %v4752_v51  ;;  %3760 = vrot.lane.b32.xlu0 %v10834_v34, %s5797_s2  ;;  %v10853_v34 = vld [vmem:[#allocation251_spill] sm:$0xff] }
 0x378   :  { %v4283_v14 = vpop.permute.xlu1 %4282  ;;  %v4559_v13 = vsel %vm4541_vm7, %v4510_v36, %v10853_v34 }
 0x379   :  { %v4754_v47 = vsel %vm4737_vm11, %v4705_v29, %v4283_v14  ;;  %5683 = vmatprep.mubr.msk.f32.mxu1 %vm4900_vm12, %v4874_v48  ;;  %v4281_v61 = vpop.permute.xlu0 %4280  ;;  %v4608_v49 = vsel %vm4590_vm9, %v4559_v13, %v3731_v33  ;;  %v10856_v14 = vld [vmem:[#allocation16_spill] sm:$0xff]  ;;  %v10859_v48 = vld [vmem:[#allocation147_spill] sm:$0xff] }
 0x37a   :  { %v4842_v21 = vcombine.high %v4754_v47, %v4754_v47  ;;  %4118 = vrot.lane.b32.xlu1 %v10838_v37, %s5798_s7  ;;  %v4753_v7 = vsel %vm4737_vm11, %v4704_v60, %v4281_v61 }
 0x37b   :  { %v4875_v27 = vcombine.low %v4841_v9, %v4753_v7  ;;  %4114 = vrot.lane.b32.xlu0 %v10839_v56, %s5798_s7  ;;  %v10861_v7 = vld [vmem:[#allocation250_spill] sm:$0xff]  ;;  %v10863_v56 = vld [vmem:[#allocation135_spill] sm:$0xff] }
 0x37c   :  { %v4876_v62 = vcombine.low %v4754_v47, %v4842_v21  ;;  %v3927_v2 = vpop.permute.xlu1 %3926  ;;  %v4415_v47 = vsel %vm4394_vm4, %v10859_v48, %v10858_v46  ;;  %v10875_v46 = vld [vmem:[#allocation37_spill] sm:$0xff] }
 0x37d   :  { %5684 = vmatmul.mubr.msk.f32.gmra.mrb[40].mxu1 %vm4900_vm12, %v4875_v27  ;;  %v3733_v11 = vpop.permute.xlu0 %3732  ;;  %v10862_v27 = vld [vmem:[#allocation248_spill] sm:$0xff] }
 0x37e   :  { %4120 = vrot.lane.b32.xlu1 %v10840_v0, %s5798_s7  ;;  %5686 = vmatprep.mubr.msk.f32.mxu1 %vm4900_vm12, %v4876_v62  ;;  %v4609_v50 = vsel %vm4590_vm9, %v4560_v6, %v3733_v11  ;;  %v10860_v62 = vld [vmem:[#allocation30_spill] sm:$0xff]  ;;  %v4414_v0 = vsel %vm4394_vm4, %v10863_v56, %v10862_v27  ;;  %v10864_v11 = vld [vmem:[#allocation25_spill] sm:$0xff]  ;;  %v10882_v56 = vld [vmem:[#allocation259_spill] sm:$0xff] }
 0x37f   :  { %3954 = vrot.lane.b32.xlu0 %v10841_v39, %s5799_s16  ;;  %v4658_v29 = vsel %vm4639_vm8, %v4609_v50, %v3927_v2  ;;  %v4464_v2 = vsel %vm4443_vm6, %v4415_v47, %v10861_v7  ;;  %v4463_v28 = vsel %vm4443_vm6, %v4414_v0, %v10867_v12  ;;  %v10880_v7 = vld [vmem:[#allocation154_spill] sm:$0xff]  ;;  %v10883_v0 = vld [vmem:[#allocation192_spill] sm:$0xff] }
 0x380   :  { %v4091_v31 = vpop.permute.xlu1 %4090  ;;  %v10881_v27 = vld [vmem:[#allocation110_spill] sm:$0xff] }
 0x381   :  { %v3925_v43 = vpop.permute.xlu0 %3924  ;;  %v10886_v12 = vld [vmem:[#allocation34_spill] sm:$0xff] }
 0x382   :  { %3762 = vrot.lane.b32.xlu1 %v10842_v40, %s5797_s2  ;;  %v4657_v51 = vsel %vm4639_vm8, %v4608_v49, %v3925_v43  ;;  %v10865_v43 = vld [vmem:[#allocation18_spill] sm:$0xff] }
 0x383   :  { %4308 = vrot.lane.b32.xlu0 %v10809_v19, %s5800_s21  ;;  %v4706_v33 = vsel %vm4688_vm10, %v4657_v51, %v4091_v31  ;;  %v4513_v31 = vsel %vm4492_vm5, %v4464_v2, %v10864_v11  ;;  %v4416_v11 = vsel %vm4394_vm4, %v10883_v0, %v10882_v56 }
 0x384   :  { %v3735_v53 = vpop.permute.xlu1 %3734 }
 0x385   :  { %v3737_v38 = vpop.permute.xlu0 %3736 }
 0x386   :  { %4314 = vrot.lane.b32.xlu1 %v10843_v15, %s5800_s21 }
 0x387   :  { %4312 = vrot.lane.b32.xlu0 %v10842_v40, %s5800_s21 }
 0x388   :  { %v4285_v52 = vpop.permute.xlu1 %4284 }
 0x389   :  { %v4093_v19 = vpop.permute.xlu0 %4092  ;;  %v4755_v37 = vsel %vm4737_vm11, %v4706_v33, %v4285_v52  ;;  %v10876_v33 = vld [vmem:[#allocation63_spill] sm:$0xff] }
 0x38a   :  { %3958 = vrot.lane.b32.xlu1 %v10848_v55, %s5799_s16  ;;  %v4707_v44 = vsel %vm4688_vm10, %v4658_v29, %v4093_v19  ;;  %v10869_v19 = vld [vmem:[#allocation256_spill] sm:$0xff]  ;;  %v10873_v29 = vld [vmem:[#allocation23_spill] sm:$0xff] }
 0x38b   :  { %3764 = vrot.lane.b32.xlu0 %v10843_v15, %s5797_s2  ;;  %v4562_v15 = vsel %vm4541_vm7, %v4513_v31, %v10865_v43  ;;  %v4512_v20 = vsel %vm4492_vm5, %v4463_v28, %v10869_v19  ;;  %v10888_v19 = vld [vmem:[#allocation254_spill] sm:$0xff] }
 0x38c   :  { %v3929_v23 = vpop.permute.xlu1 %3928  ;;  %v4611_v54 = vsel %vm4590_vm9, %v4562_v15, %v3737_v38  ;;  %v4561_v38 = vsel %vm4541_vm7, %v4512_v20, %v10870_v30  ;;  %v4465_v20 = vsel %vm4443_vm6, %v4416_v11, %v10888_v19  ;;  %v10890_v30 = vld [vmem:[#allocation55_spill] sm:$0xff]  ;;  %v10901_v11 = vld [vmem:[#allocation265_spill] sm:$0xff] }
 0x38d   :  { %v3931_v3 = vpop.permute.xlu0 %3930  ;;  %v4610_v45 = vsel %vm4590_vm9, %v4561_v38, %v3735_v53 }
 0x38e   :  { %4122 = vrot.lane.b32.xlu1 %v10855_v25, %s5798_s7  ;;  %v4660_v17 = vsel %vm4639_vm8, %v4611_v54, %v3931_v3  ;;  %v4659_v34 = vsel %vm4639_vm8, %v4610_v45, %v3929_v23  ;;  %v10885_v54 = vld [vmem:[#allocation45_spill] sm:$0xff]  ;;  %v10892_v45 = vld [vmem:[#allocation262_spill] sm:$0xff] }
 0x38f   :  { %3956 = vrot.lane.b32.xlu0 %v10856_v14, %s5799_s16 }
 0x390   :  { %v4095_v22 = vpop.permute.xlu1 %4094 }
 0x391   :  { %v4287_v21 = vpop.permute.xlu0 %4286  ;;  %v4708_v6 = vsel %vm4688_vm10, %v4659_v34, %v4095_v22  ;;  %v10874_v22 = vld [vmem:[#allocation70_spill] sm:$0xff]  ;;  %v4514_v34 = vsel %vm4492_vm5, %v4465_v20, %v10892_v45  ;;  %v10902_v20 = vld [vmem:[#allocation107_spill] sm:$0xff] }
 0x392   :  { %3766 = vrot.lane.b32.xlu1 %v10857_v42, %s5797_s2  ;;  %v4756_v9 = vsel %vm4737_vm11, %v4707_v44, %v4287_v21  ;;  %v10903_v45 = vld [vmem:[#allocation67_spill] sm:$0xff] }
 0x393   :  { %v4877_v61 = vcombine.low %v4755_v37, %v4756_v9  ;;  %3768 = vrot.lane.b32.xlu0 %v10860_v62, %s5797_s2  ;;  %v4843_v25 = vcombine.high %v4756_v9, %v4756_v9  ;;  %v10877_v37 = vld [vmem:[#allocation20_spill] sm:$0xff]  ;;  %v10878_v9 = vld [vmem:[#allocation149_spill] sm:$0xff] }
 0x394   :  { %v9332_v60 = vpop.permute.xlu1 %3740 }
 0x395   :  { %5687 = vmatmul.mubr.msk.f32.gmra.mrb[42].mxu1 %vm4900_vm12, %v4877_v61  ;;  %v4097_v40 = vpop.permute.xlu0 %4096  ;;  %v4417_v61 = vsel %vm4394_vm4, %v10878_v9, %v10877_v37 }
 0x396   :  { %4316 = vrot.lane.b32.xlu1 %v10857_v42, %s5800_s21  ;;  %v4709_v18 = vsel %vm4688_vm10, %v4660_v17, %v4097_v40  ;;  %v10884_v40 = vld [vmem:[#allocation46_spill] sm:$0xff] }
 0x397   :  { %4124 = vrot.lane.b32.xlu0 %v10866_v16, %s5798_s7  ;;  %v4466_v43 = vsel %vm4443_vm6, %v4417_v61, %v10884_v40  ;;  %v10887_v17 = vld [vmem:[#allocation66_spill] sm:$0xff] }
 0x398   :  { %v9348_v52 = vpop.permute.xlu1 %3738  ;;  %v4515_v16 = vsel %vm4492_vm5, %v4466_v43, %v10885_v54 }
 0x399   :  { %v4291_v10 = vpop.permute.xlu0 %4290 }
 0x39a   :  { %3960 = vrot.lane.b32.xlu1 %v10868_v59, %s5799_s16  ;;  %v4758_v32 = vsel %vm4737_vm11, %v4709_v18, %v4291_v10  ;;  %v10889_v18 = vld [vmem:[#allocation93_spill] sm:$0xff] }
 0x39b   :  { %3962 = vrot.lane.b32.xlu0 %v10871_v8, %s5799_s16  ;;  %v4844_v13 = vcombine.high %v4758_v32, %v4758_v32  ;;  %v4564_v10 = vsel %vm4541_vm7, %v4515_v16, %v10889_v18 }
 0x39c   :  { %v9364_v36 = vpop.permute.xlu1 %3742 }
 0x39d   :  { %v4289_v49 = vpop.permute.xlu0 %4288  ;;  %v4879_v53 = vcombine.low %v4758_v32, %v4844_v13  ;;  %v10891_v32 = vld [vmem:[#allocation90_spill] sm:$0xff] }
 0x39e   :  { %4126 = vrot.lane.b32.xlu1 %v10872_v4, %s5798_s7  ;;  %v4757_v50 = vsel %vm4737_vm11, %v4708_v6, %v4289_v49  ;;  %v10893_v13 = vld [vmem:[#allocation114_spill] sm:$0xff] }
 0x39f   :  { %v4878_v51 = vcombine.low %v4843_v25, %v4757_v50  ;;  %4318 = vrot.lane.b32.xlu0 %v10860_v62, %s5800_s21  ;;  %v10879_v62 = vld [vmem:[#allocation266_spill] sm:$0xff]  ;;  %v10895_v25 = vld [vmem:[#allocation99_spill] sm:$0xff]  ;;  %v4613_v50 = vsel %vm4590_vm9, %v4564_v10, %v9332_v60 }
 0x3a0   :  { %v4101_v3 = vpop.permute.xlu1 %4100  ;;  %v4419_v2 = vsel %vm4394_vm4, %v10880_v7, %v10879_v62  ;;  %v10894_v4 = vld [vmem:[#allocation202_spill] sm:$0xff]  ;;  %v10897_v62 = vld [vmem:[#allocation60_spill] sm:$0xff] }
 0x3a1   :  { %5689 = vmatprep.mubr.msk.f32.mxu1 %vm4900_vm12, %v4878_v51  ;;  %v3935_v23 = vpop.permute.xlu0 %3934  ;;  %v4468_v28 = vsel %vm4443_vm6, %v4419_v2, %v10886_v12  ;;  %v4418_v6 = vsel %vm4394_vm4, %v10894_v4, %v10893_v13  ;;  %v10898_v7 = vld [vmem:[#allocation76_spill] sm:$0xff]  ;;  %v10905_v13 = vld [vmem:[#allocation122_spill] sm:$0xff] }
 0x3a2   :  { %3772 = vrot.lane.b32.xlu1 %v10873_v29, %s5797_s2  ;;  %5690 = vmatmul.mubr.msk.f32.gmra.mrb[44].mxu1 %vm4900_vm12, %v4879_v53  ;;  %v4517_v38 = vsel %vm4492_vm5, %v4468_v28, %v10890_v30  ;;  %v10896_v53 = vld [vmem:[#allocation263_spill] sm:$0xff]  ;;  %v4467_v60 = vsel %vm4443_vm6, %v4418_v6, %v10898_v7  ;;  %v10906_v4 = vld [vmem:[#allocation106_spill] sm:$0xff] }
 0x3a3   :  { %4128 = vrot.lane.b32.xlu0 %v10874_v22, %s5798_s7  ;;  %v4566_v49 = vsel %vm4541_vm7, %v4517_v38, %v10895_v25  ;;  %v4662_v22 = vsel %vm4639_vm8, %v4613_v50, %v3935_v23  ;;  %v10900_v23 = vld [vmem:[#allocation264_spill] sm:$0xff]  ;;  %v10912_v7 = vld [vmem:[#allocation119_spill] sm:$0xff] }
 0x3a4   :  { %v3937_v42 = vpop.permute.xlu1 %3936  ;;  %v4711_v56 = vsel %vm4688_vm10, %v4662_v22, %v4101_v3 }
 0x3a5   :  { %v3933_v48 = vpop.permute.xlu0 %3932 }
 0x3a6   :  { %3770 = vrot.lane.b32.xlu1 %v10875_v46, %s5797_s2 }
 0x3a7   :  { %4322 = vrot.lane.b32.xlu0 %v10873_v29, %s5800_s21  ;;  %v4563_v29 = vsel %vm4541_vm7, %v4514_v34, %v10896_v53  ;;  %v10908_v53 = vld [vmem:[#allocation269_spill] sm:$0xff] }
 0x3a8   :  { %v4295_v47 = vpop.permute.xlu1 %4294  ;;  %v4612_v9 = vsel %vm4590_vm9, %v4563_v29, %v9348_v52  ;;  %v10909_v29 = vld [vmem:[#allocation209_spill] sm:$0xff] }
 0x3a9   :  { %v3745_v44 = vpop.permute.xlu0 %3744  ;;  %v4661_v2 = vsel %vm4639_vm8, %v4612_v9, %v3933_v48  ;;  %v4760_v43 = vsel %vm4737_vm11, %v4711_v56, %v4295_v47  ;;  %v4420_v22 = vsel %vm4394_vm4, %v10909_v29, %v10908_v53  ;;  %v10911_v9 = vld [vmem:[#allocation158_spill] sm:$0xff]  ;;  %v10915_v56 = vld [vmem:[#allocation131_spill] sm:$0xff] }
 0x3aa   :  { %3774 = vrot.lane.b32.xlu1 %v10876_v33, %s5797_s2  ;;  %v4845_v47 = vcombine.high %v4760_v43, %v4760_v43  ;;  %v10927_v29 = vld [vmem:[#allocation74_spill] sm:$0xff] }
 0x3ab   :  { %4320 = vrot.lane.b32.xlu0 %v10875_v46, %s5800_s21  ;;  %v4615_v46 = vsel %vm4590_vm9, %v4566_v49, %v3745_v44  ;;  %v4516_v44 = vsel %vm4492_vm5, %v4467_v60, %v10900_v23  ;;  %v10907_v49 = vld [vmem:[#allocation111_spill] sm:$0xff] }
 0x3ac   :  { %v4103_v21 = vpop.permute.xlu1 %4102  ;;  %v4565_v40 = vsel %vm4541_vm7, %v4516_v44, %v10901_v11  ;;  %v10913_v60 = vld [vmem:[#allocation267_spill] sm:$0xff] }
 0x3ad   :  { %v4099_v31 = vpop.permute.xlu0 %4098  ;;  %v4614_v12 = vsel %vm4590_vm9, %v4565_v40, %v9364_v36  ;;  %v10917_v40 = vld [vmem:[#allocation278_spill] sm:$0xff] }
 0x3ae   :  { %4132 = vrot.lane.b32.xlu1 %v10881_v27, %s5798_s7  ;;  %v10899_v27 = vld [vmem:[#allocation82_spill] sm:$0xff]  ;;  %v4710_v52 = vsel %vm4688_vm10, %v4661_v2, %v4099_v31  ;;  %v4663_v31 = vsel %vm4639_vm8, %v4614_v12, %v3937_v42  ;;  %v4469_v2 = vsel %vm4443_vm6, %v4420_v22, %v10913_v60  ;;  %v10929_v60 = vld [vmem:[#allocation169_spill] sm:$0xff] }
 0x3af   :  { %3966 = vrot.lane.b32.xlu0 %v10887_v17, %s5799_s16  ;;  %v4712_v18 = vsel %vm4688_vm10, %v4663_v31, %v4103_v21  ;;  %v10904_v42 = vld [vmem:[#allocation142_spill] sm:$0xff] }
 0x3b0   :  { %v4105_v15 = vpop.permute.xlu1 %4104 }
 0x3b1   :  { %v3939_v51 = vpop.permute.xlu0 %3938 }
 0x3b2   :  { %3968 = vrot.lane.b32.xlu1 %v10891_v32, %s5799_s16  ;;  %v4664_v61 = vsel %vm4639_vm8, %v4615_v46, %v3939_v51  ;;  %v10910_v46 = vld [vmem:[#allocation272_spill] sm:$0xff] }
 0x3b3   :  { %3964 = vrot.lane.b32.xlu0 %v10897_v62, %s5799_s16  ;;  %v4713_v48 = vsel %vm4688_vm10, %v4664_v61, %v4105_v15  ;;  %v4421_v61 = vsel %vm4394_vm4, %v10911_v9, %v10910_v46  ;;  %v10928_v46 = vld [vmem:[#allocation282_spill] sm:$0xff] }
 0x3b4   :  { %v3747_v37 = vpop.permute.xlu1 %3746 }
 0x3b5   :  { %v4293_v0 = vpop.permute.xlu0 %4292 }
 0x3b6   :  { %4326 = vrot.lane.b32.xlu1 %v10899_v27, %s5800_s21  ;;  %v4759_v54 = vsel %vm4737_vm11, %v4710_v52, %v4293_v0  ;;  %v4518_v52 = vsel %vm4492_vm5, %v4469_v2, %v10915_v56  ;;  %v10916_v0 = vld [vmem:[#allocation78_spill] sm:$0xff]  ;;  %v10930_v2 = vld [vmem:[#allocation273_spill] sm:$0xff]  ;;  %v10931_v56 = vld [vmem:[#allocation156_spill] sm:$0xff] }
 0x3b7   :  { %v4880_v28 = vcombine.low %v4759_v54, %v4760_v43  ;;  %3776 = vrot.lane.b32.xlu0 %v10899_v27, %s5797_s2  ;;  %v10914_v27 = vld [vmem:[#allocation41_spill] sm:$0xff]  ;;  %v4567_v43 = vsel %vm4541_vm7, %v4518_v52, %v10917_v40  ;;  %v10918_v54 = vld [vmem:[#allocation71_spill] sm:$0xff]  ;;  %v10932_v52 = vld [vmem:[#allocation280_spill] sm:$0xff] }
 0x3b8   :  { %v4299_v16 = vpop.permute.xlu1 %4298  ;;  %v4470_v23 = vsel %vm4443_vm6, %v4421_v61, %v10914_v27  ;;  %v4616_v12 = vsel %vm4590_vm9, %v4567_v43, %v3747_v37  ;;  %v10933_v43 = vld [vmem:[#allocation155_spill] sm:$0xff] }
 0x3b9   :  { %v4762_v3 = vsel %vm4737_vm11, %v4713_v48, %v4299_v16  ;;  %5692 = vmatprep.mubr.msk.f32.mxu1 %vm4900_vm12, %v4880_v28  ;;  %v4297_v15 = vpop.permute.xlu0 %4296  ;;  %v4519_v11 = vsel %vm4492_vm5, %v4470_v23, %v10916_v0  ;;  %v10919_v48 = vld [vmem:[#allocation28_spill] sm:$0xff] }
 0x3ba   :  { %v4846_v19 = vcombine.high %v4762_v3, %v4762_v3  ;;  %4134 = vrot.lane.b32.xlu1 %v10902_v20, %s5798_s7  ;;  %v4761_v36 = vsel %vm4737_vm11, %v4712_v18, %v4297_v15  ;;  %v4568_v16 = vsel %vm4541_vm7, %v4519_v11, %v10918_v54  ;;  %v10920_v20 = vld [vmem:[#allocation133_spill] sm:$0xff]  ;;  %v10921_v18 = vld [vmem:[#allocation27_spill] sm:$0xff] }
 0x3bb   :  { %v4881_v38 = vcombine.low %v4845_v47, %v4761_v36  ;;  %4130 = vrot.lane.b32.xlu0 %v10903_v45, %s5798_s7  ;;  %v10922_v15 = vld [vmem:[#allocation279_spill] sm:$0xff] }
 0x3bc   :  { %v4882_v10 = vcombine.low %v4762_v3, %v4846_v19  ;;  %v3943_v30 = vpop.permute.xlu1 %3942 }
 0x3bd   :  { %5693 = vmatmul.mubr.msk.f32.gmra.mrb[46].mxu1 %vm4900_vm12, %v4881_v38  ;;  %v3749_v34 = vpop.permute.xlu0 %3748 }
 0x3be   :  { %4136 = vrot.lane.b32.xlu1 %v10904_v42, %s5798_s7  ;;  %5695 = vmatprep.mubr.msk.f32.mxu1 %vm4900_vm12, %v4882_v10  ;;  %v4617_v28 = vsel %vm4590_vm9, %v4568_v16, %v3749_v34  ;;  %v4423_v10 = vsel %vm4394_vm4, %v8316_v1, %v10922_v15  ;;  %v10925_v1 = vld [vmem:[#allocation276_spill] sm:$0xff] }
 0x3bf   :  { %3970 = vrot.lane.b32.xlu0 %v10905_v13, %s5799_s16  ;;  %v4666_v47 = vsel %vm4639_vm8, %v4617_v28, %v3943_v30  ;;  %v10923_v30 = vld [vmem:[#allocation159_spill] sm:$0xff] }
 0x3c0   :  { %v4107_v21 = vpop.permute.xlu1 %4106 }
 0x3c1   :  { %v3941_v6 = vpop.permute.xlu0 %3940 }
 0x3c2   :  { %3778 = vrot.lane.b32.xlu1 %v10906_v4, %s5797_s2  ;;  %v4665_v31 = vsel %vm4639_vm8, %v4616_v12, %v3941_v6  ;;  %v10924_v6 = vld [vmem:[#allocation36_spill] sm:$0xff]  ;;  %v10934_v12 = vld [vmem:[#allocation138_spill] sm:$0xff] }
 0x3c3   :  { %4324 = vrot.lane.b32.xlu0 %v10876_v33, %s5800_s21  ;;  %v4714_v37 = vsel %vm4688_vm10, %v4665_v31, %v4107_v21  ;;  %v10926_v21 = vld [vmem:[#allocation216_spill] sm:$0xff]  ;;  %v10935_v31 = vld [vmem:[#allocation166_spill] sm:$0xff] }
 0x3c4   :  { %v3751_v25 = vpop.permute.xlu1 %3750  ;;  %v4422_v53 = vsel %vm4394_vm4, %v10926_v21, %v10925_v1 }
 0x3c5   :  { %v3753_v50 = vpop.permute.xlu0 %3752  ;;  %v4471_v27 = vsel %vm4443_vm6, %v4422_v53, %v10930_v2 }
 0x3c6   :  { %4330 = vrot.lane.b32.xlu1 %v10907_v49, %s5800_s21  ;;  %v4520_v0 = vsel %vm4492_vm5, %v4471_v27, %v10932_v52 }
 0x3c7   :  { %4328 = vrot.lane.b32.xlu0 %v10906_v4, %s5800_s21 }
 0x3c8   :  { %v4301_v51 = vpop.permute.xlu1 %4300 }
 0x3c9   :  { %v4109_v33 = vpop.permute.xlu0 %4108  ;;  %v4763_v45 = vsel %vm4737_vm11, %v4714_v37, %v4301_v51 }
 0x3ca   :  { %3974 = vrot.lane.b32.xlu1 %v10912_v7, %s5799_s16  ;;  %v4715_v36 = vsel %vm4688_vm10, %v4666_v47, %v4109_v33 }
 0x3cb   :  { %3780 = vrot.lane.b32.xlu0 %v10907_v49, %s5797_s2  ;;  %v4472_v49 = vsel %vm4443_vm6, %v4423_v10, %v10924_v6 }
 0x3cc   :  { %v3945_v44 = vpop.permute.xlu1 %3944  ;;  %v4521_v51 = vsel %vm4492_vm5, %v4472_v49, %v10927_v29  ;;  %v10940_v49 = vld [vmem:[#allocation125_spill] sm:$0xff] }
 0x3cd   :  { %v3947_v3 = vpop.permute.xlu0 %3946  ;;  %v4570_v9 = vsel %vm4541_vm7, %v4521_v51, %v10928_v46  ;;  %v10942_v51 = vld [vmem:[#allocation115_spill] sm:$0xff]  ;;  %v10943_v46 = vld [vmem:[#allocation84_spill] sm:$0xff] }
 0x3ce   :  { %4138 = vrot.lane.b32.xlu1 %v10919_v48, %s5798_s7  ;;  %v4619_v33 = vsel %vm4590_vm9, %v4570_v9, %v3753_v50  ;;  %v4569_v50 = vsel %vm4541_vm7, %v4520_v0, %v10933_v43  ;;  %v4427_v9 = vsel %vm4394_vm4, %v10800_v26, %v10943_v46  ;;  %v10949_v26 = vld [vmem:[#allocation274_spill] sm:$0xff] }
 0x3cf   :  { %3972 = vrot.lane.b32.xlu0 %v10920_v20, %s5799_s16  ;;  %v4668_v23 = vsel %vm4639_vm8, %v4619_v33, %v3947_v3  ;;  %v4618_v48 = vsel %vm4590_vm9, %v4569_v50, %v3751_v25  ;;  %v10944_v33 = vld [vmem:[#allocation277_spill] sm:$0xff]  ;;  %v10960_v46 = vld [vmem:[#allocation134_spill] sm:$0xff] }
 0x3d0   :  { %v4111_v19 = vpop.permute.xlu1 %4110  ;;  %v4667_v28 = vsel %vm4639_vm8, %v4618_v48, %v3945_v44  ;;  %v10950_v50 = vld [vmem:[#allocation129_spill] sm:$0xff]  ;;  %v10951_v48 = vld [vmem:[#allocation283_spill] sm:$0xff] }
 0x3d1   :  { %v4303_v38 = vpop.permute.xlu0 %4302  ;;  %v4716_v47 = vsel %vm4688_vm10, %v4667_v28, %v4111_v19  ;;  %v10937_v19 = vld [vmem:[#allocation260_spill] sm:$0xff] }
 0x3d2   :  { %3782 = vrot.lane.b32.xlu1 %v10921_v18, %s5797_s2  ;;  %v4764_v42 = vsel %vm4737_vm11, %v4715_v36, %v4303_v38  ;;  %v10936_v38 = vld [vmem:[#allocation185_spill] sm:$0xff] }
 0x3d3   :  { %v4883_v4 = vcombine.low %v4763_v45, %v4764_v42  ;;  %3784 = vrot.lane.b32.xlu0 %v10923_v30, %s5797_s2 }
 0x3d4   :  { %v9515_v34 = vpop.permute.xlu1 %3756 }
 0x3d5   :  { %5696 = vmatmul.mubr.msk.f32.gmra.mrb[48].mxu1 %vm4900_vm12, %v4883_v4  ;;  %v4113_v22 = vpop.permute.xlu0 %4112 }
 0x3d6   :  { %4332 = vrot.lane.b32.xlu1 %v10921_v18, %s5800_s21  ;;  %v4717_v11 = vsel %vm4688_vm10, %v4668_v23, %v4113_v22  ;;  %v4847_v18 = vcombine.high %v4764_v42, %v4764_v42  ;;  %v10938_v42 = vld [vmem:[#allocation164_spill] sm:$0xff]  ;;  %v4425_v22 = vsel %vm4394_vm4, %v7851_v63, %v10942_v51  ;;  %v10947_v63 = vld [vmem:[#allocation151_spill] sm:$0xff] }
 0x3d7   :  { %4140 = vrot.lane.b32.xlu0 %v10929_v60, %s5798_s7  ;;  %v10945_v60 = vld [vmem:[#allocation116_spill] sm:$0xff] }
 0x3d8   :  { %v9531_v61 = vpop.permute.xlu1 %3754  ;;  %v4424_v2 = vsel %vm4394_vm4, %v8279_v24, %v10945_v60  ;;  %v10946_v23 = vld [vmem:[#allocation124_spill] sm:$0xff]  ;;  %v4426_v24 = vsel %vm4394_vm4, %v8375_v41, %v10951_v48  ;;  %v10957_v41 = vld [vmem:[#allocation285_spill] sm:$0xff] }
 0x3d9   :  { %v4307_v40 = vpop.permute.xlu0 %4306  ;;  %v4474_v52 = vsel %vm4443_vm6, %v4425_v22, %v10946_v23  ;;  %v10959_v51 = vld [vmem:[#allocation268_spill] sm:$0xff]  ;;  %v10961_v60 = vld [vmem:[#allocation85_spill] sm:$0xff]  ;;  %v10963_v23 = vld [vmem:[#allocation275_spill] sm:$0xff] }
 0x3da   :  { %3976 = vrot.lane.b32.xlu1 %v10931_v56, %s5799_s16  ;;  %v4766_v54 = vsel %vm4737_vm11, %v4717_v11, %v4307_v40  ;;  %v4523_v11 = vsel %vm4492_vm5, %v4474_v52, %v10947_v63  ;;  %v10948_v40 = vld [vmem:[#allocation284_spill] sm:$0xff]  ;;  %v10964_v52 = vrot.slane %v10963_v23, 1  ;;  %v10965_v63 = vld [vmem:[#allocation290_spill] sm:$0xff] }
 0x3db   :  { %3978 = vrot.lane.b32.xlu0 %v10934_v12, %s5799_s16  ;;  %v4848_v3 = vcombine.high %v4766_v54, %v4766_v54  ;;  %v4476_v43 = vsel %vm4443_vm6, %v4427_v9, %v10948_v40  ;;  %v10952_v12 = vld [vmem:[#allocation287_spill] sm:$0xff]  ;;  %v4475_v9 = vsel %vm4443_vm6, %v4426_v24, %v10960_v46  ;;  %v10970_v46 = vld [vmem:[#allocation288_spill] sm:$0xff] }
 0x3dc   :  { %v9547_v16 = vpop.permute.xlu1 %3758  ;;  %v4572_v28 = vsel %vm4541_vm7, %v4523_v11, %v10952_v12 }
 0x3dd   :  { %v4305_v15 = vpop.permute.xlu0 %4304  ;;  %v4885_v25 = vcombine.low %v4766_v54, %v4848_v3  ;;  %v4473_v54 = vsel %vm4443_vm6, %v4424_v2, %v10950_v50  ;;  %v10953_v3 = vld [vmem:[#allocation180_spill] sm:$0xff]  ;;  %v10962_v2 = vld [vmem:[#allocation170_spill] sm:$0xff] }
 0x3de   :  { %4142 = vrot.lane.b32.xlu1 %v10935_v31, %s5798_s7  ;;  %v4765_v10 = vsel %vm4737_vm11, %v4716_v47, %v4305_v15  ;;  %v4525_v31 = vsel %vm4492_vm5, %v4476_v43, %v10953_v3  ;;  %v10954_v47 = vld [vmem:[#allocation257_spill] sm:$0xff] }
 0x3df   :  { %v4884_v36 = vcombine.low %v4847_v18, %v4765_v10  ;;  %4334 = vrot.lane.b32.xlu0 %v10923_v30, %s5800_s21  ;;  %v10939_v30 = vld [vmem:[#allocation130_spill] sm:$0xff]  ;;  %v10955_v18 = vld [vmem:[#allocation281_spill] sm:$0xff] }
 0x3e0   :  { %v4117_v37 = vpop.permute.xlu1 %4116  ;;  %v10941_v1 = vcombine.low %v10939_v30, %v10940_v49  ;;  %v4522_v15 = vsel %vm4492_vm5, %v4473_v54, %v10955_v18  ;;  %v10956_v10 = vld [vmem:[#allocation293_spill] sm:$0xff] }
 0x3e1   :  { %5698 = vmatprep.mubr.msk.f32.mxu1 %vm4900_vm12, %v4884_v36  ;;  %v3951_v44 = vpop.permute.xlu0 %3950  ;;  %v4574_v36 = vsel %vm4541_vm7, %v4525_v31, %v10956_v10  ;;  %v10968_v10 = vld [vmem:[#allocation271_spill] sm:$0xff] }
 0x3e2   :  { %3788 = vrot.lane.b32.xlu1 %v10936_v38, %s5797_s2  ;;  %5699 = vmatmul.mubr.msk.f32.gmra.mrb[50].mxu1 %vm4900_vm12, %v4885_v25  ;;  %v9571_v21 = vrot.slane %v10941_v1, %v6147_v5  ;;  %v4621_v25 = vsel %vm4590_vm9, %v4572_v28, %v9515_v34  ;;  %v10958_v1 = vld [vmem:[#allocation270_spill] sm:$0xff]  ;;  %v10966_v28 = vld [vmem:[#allocation19_spill] sm:$0xff] }
 0x3e3   :  { %4144 = vrot.lane.b32.xlu0 %v10937_v19, %s5798_s7  ;;  %v4571_v19 = vsel %vm4541_vm7, %v4522_v15, %v10957_v41  ;;  %v4242_v22 = vcombine.low %v10959_v51, %v10958_v1 }
 0x3e4   :  { %v3953_v45 = vpop.permute.xlu1 %3952 }
 0x3e5   :  { %v3949_v4 = vpop.permute.xlu0 %3948 }
 0x3e6   :  { %3786 = vrot.lane.b32.xlu1 %v10938_v42, %s5797_s2 }
 0x3e7   :  { %4338 = vrot.lane.b32.xlu0 %v10936_v38, %s5800_s21 }
 0x3e8   :  { %v4311_v6 = vpop.permute.xlu1 %4310 }
 0x3e9   :  { %v3761_v53 = vpop.permute.xlu0 %3760 }
 0x3ea   :  { %3790 = vrot.lane.b32.xlu1 %v9571_v21, %s5797_s2  ;;  %v4623_v30 = vsel %vm4590_vm9, %v4574_v36, %v3761_v53 }
 0x3eb   :  { %4336 = vrot.lane.b32.xlu0 %v10938_v42, %s5800_s21  ;;  %v4670_v42 = vsel %vm4639_vm8, %v4621_v25, %v3951_v44  ;;  %v4524_v44 = vsel %vm4492_vm5, %v4475_v9, %v10962_v2  ;;  %v4428_v9 = vsel %vm4394_vm4, %v10832_v58, %v10970_v46  ;;  %v10972_v2 = vld [vmem:[#allocation286_spill] sm:$0xff] }
 0x3ec   :  { %v4119_v29 = vpop.permute.xlu1 %4118  ;;  %v4573_v11 = vsel %vm4541_vm7, %v4524_v44, %v10965_v63  ;;  %v4719_v40 = vsel %vm4688_vm10, %v4670_v42, %v4117_v37  ;;  %v4477_v44 = vsel %vm4443_vm6, %v4428_v9, %v10972_v2 }
 0x3ed   :  { %v4115_v27 = vpop.permute.xlu0 %4114  ;;  %v4622_v24 = vsel %vm4590_vm9, %v4573_v11, %v9547_v16  ;;  %v10975_v11 = vld [vmem:[#allocation105_spill] sm:$0xff] }
 0x3ee   :  { %4148 = vrot.lane.b32.xlu1 %v10944_v33, %s5798_s7  ;;  %v4620_v33 = vsel %vm4590_vm9, %v4571_v19, %v9531_v61 }
 0x3ef   :  { %3982 = vrot.lane.b32.xlu0 %v10949_v26, %s5799_s16  ;;  %v4669_v53 = vsel %vm4639_vm8, %v4620_v33, %v3949_v4  ;;  %v4768_v26 = vsel %vm4737_vm11, %v4719_v40, %v4311_v6  ;;  %v4249_v4 = vrot.slane %v4242_v22, %v6147_v5  ;;  %v10971_v33 = vld [vmem:[#allocation291_spill] sm:$0xff] }
 0x3f0   :  { %v4121_v0 = vpop.permute.xlu1 %4120  ;;  %v4718_v61 = vsel %vm4688_vm10, %v4669_v53, %v4115_v27  ;;  %v4671_v27 = vsel %vm4639_vm8, %v4622_v24, %v3953_v45  ;;  %v4849_v6 = vcombine.high %v4768_v26, %v4768_v26  ;;  %v10967_v45 = vld [vmem:[#allocation51_spill] sm:$0xff]  ;;  %v10973_v53 = vld [vmem:[#allocation289_spill] sm:$0xff] }
 0x3f1   :  { %v3955_v38 = vpop.permute.xlu0 %3954  ;;  %v4720_v31 = vsel %vm4688_vm10, %v4671_v27, %v4119_v29  ;;  %v10969_v36 = vcombine.low %v10967_v45, %v10968_v10 }
 0x3f2   :  { %4146 = vrot.lane.b32.xlu1 %v10954_v47, %s5798_s7  ;;  %v4672_v34 = vsel %vm4639_vm8, %v4623_v30, %v3955_v38  ;;  %v9657_v47 = vld [vmem:[%s9936_s4] ss:$0 sm:$0xff]  ;;  %s5801_s4 = smov [#allocation2]  }
 0x3f3   :  { %3980 = vrot.lane.b32.xlu0 %v10961_v60, %s5799_s16  ;;  %v4721_v48 = vsel %vm4688_vm10, %v4672_v34, %v4121_v0  ;;  %v4429_v34 = vsel %vm4394_vm4, %v10818_v35, %v10971_v33  ;;  %v10983_v33 = vld [vmem:[#allocation89_spill] sm:$0xff]  ;;  %s5295_s26 = sshll.u32 %s5801_s4, 4  ;;  %s5296_s26 = int_to_ptr.vmem [resolvable:$true] %s5295_s26 }
 0x3f4   :  { %v9619_v49 = vpop.permute.xlu1 %3762  ;;  %s5765_s27 = scalar_lea.vmem %s5296_s26, 4608  ;;  %p5770_p1 = scmp.lt.s32.totalorder %s5296_s26, %s5296_s26 }
 0x3f5   :  { %v4309_v43 = vpop.permute.xlu0 %4308  ;;  %p5766_p0 = scmp.ne.s32.totalorder %s5296_s26, %s5765_s27  ;;  %p5771_p2 = scmp.lt.s32.totalorder %s5765_s27, %s5765_s27 }
 0x3f6   :  { %4150 = vrot.lane.b32.xlu1 %v10964_v52, %s5798_s7  ;;  %v4767_v50 = vsel %vm4737_vm11, %v4718_v61, %v4309_v43  ;;  %v10974_v52 = vld [vmem:[#allocation83_spill] sm:$0xff] }
 0x3f7   :  { %v4886_v12 = vcombine.low %v4767_v50, %v4768_v26  ;;  %3984 = vrot.lane.b32.xlu0 %v10966_v28, %s5799_s16  ;;  %v4526_v63 = vsel %vm4492_vm5, %v4477_v44, %v10974_v52  ;;  %v10984_v44 = vld [vmem:[#allocation112_spill] sm:$0xff]  ;;  %p5772_p3 = por %p5771_p2, %p5770_p1 }
 0x3f8   :  { %v4315_v54 = vpop.permute.xlu1 %4314  ;;  %v10985_v52 = vld [vmem:[#allocation132_spill] sm:$0xff] }
 0x3f9   :  { %v4770_v37 = vsel %vm4737_vm11, %v4721_v48, %v4315_v54  ;;  %5701 = vmatprep.mubr.msk.f32.mxu1 %vm4900_vm12, %v4886_v12  ;;  %v4313_v5 = vpop.permute.xlu0 %4312  ;;  %v10976_v54 = vld [vmem:[#allocation104_spill] sm:$0xff]  ;;  %p5773_p4 = pnand %p5772_p3, %p5766_p0 }
 0x3fa   :  { %v4850_v3 = vcombine.high %v4770_v37, %v4770_v37  ;;  %4344 = vrot.lane.b32.xlu1 %v4249_v4, %s5800_s21  ;;  %v4769_v16 = vsel %vm4737_vm11, %v4720_v31, %v4313_v5  ;;  %v4575_v48 = vsel %vm4541_vm7, %v4526_v63, %v10976_v54  ;;  %v10977_v4 = vld [vmem:[#allocation127_spill] sm:$0xff] }
 0x3fb   :  { %v4887_v15 = vcombine.low %v4849_v6, %v4769_v16  ;;  %4342 = vrot.lane.b32.xlu0 %v10969_v36, %s5800_s21  ;;  %v4624_v28 = vsel %vm4590_vm9, %v4575_v48, %v9619_v49 }
 0x3fc   :  { %v4888_v0 = vcombine.low %v4770_v37, %v4850_v3  ;;  %v3959_v18 = vpop.permute.xlu1 %3958  ;;  %v5670_v25 = vpop.f32.mrb[30].mxu1 }
 0x3fd   :  { %v5045_v29 = vadd.f32 %v5670_v25, %v9657_v47  ;;  %v5039_v38 = vpop.f32.mrb[31].mxu1  ;;  %5702 = vmatmul.mubr.msk.f32.gmra.mrb[52].mxu1 %vm4900_vm12, %v4887_v15  ;;  %v3765_v41 = vpop.permute.xlu0 %3764 }
 0x3fe   :  { %v5040_v19 = vadd.f32 %v9657_v47, %v5039_v38  ;;  %5704 = vmatprep.mubr.msk.f32.mxu1 %vm4900_vm12, %v4888_v0  ;;  %v10978_v0 = vld [vmem:[#allocation123_spill] sm:$0xff] }
 0x3ff   :  { %v5219_v30 = vmax.f32 %v5045_v29, 0.0  ;;  %4340 = vrot.lane.b32.xlu0 %v9571_v21, %s5800_s21  ;;  %v4478_v21 = vsel %vm4443_vm6, %v4429_v34, %v10973_v53  ;;  %v4431_v16 = vsel %vm4394_vm4, %v10841_v39, %v10978_v0  ;;  %v10979_v38 = vld [vmem:[#allocation103_spill] sm:$0xff]  ;;  %v10981_v39 = vld [vmem:[#allocation32_spill] sm:$0xff] }
 0x400   :  { %v4123_v42 = vpop.permute.xlu1 %4122  ;;  %v5218_v1 = vmax.f32 %v5040_v19, 0.0  ;;  %v4527_v40 = vsel %vm4492_vm5, %v4478_v21, %v10975_v11 }
 0x401   :  { %5255 = vst [vmem:[#allocation2 + $0x8] sm:$0xff] %v5219_v30  ;;  %v3957_v51 = vpop.permute.xlu0 %3956  ;;  %v4576_v24 = vsel %vm4541_vm7, %v4527_v40, %v10977_v4 }
 0x402   :  { %5254 = vst [vmem:[#allocation2] sm:$0xff] %v5218_v1  ;;  %v4625_v37 = vsel %vm4590_vm9, %v4576_v24, %v3765_v41  ;;  %v4673_v6 = vsel %vm4639_vm8, %v4624_v28, %v3957_v51  ;;  %v4480_v41 = vsel %vm4443_vm6, %v4431_v16, %v10979_v38  ;;  %v10982_v1 = vld [vmem:[#allocation153_spill] sm:$0xff]  ;;  %v10986_v16 = vld [vmem:[#allocation150_spill] sm:$0xff] }
 0x403   :  { %v4674_v5 = vsel %vm4639_vm8, %v4625_v37, %v3959_v18  ;;  %v4722_v15 = vsel %vm4688_vm10, %v4673_v6, %v4123_v42  ;;  %v10980_v18 = vld [vmem:[#allocation94_spill] sm:$0xff]  ;;  %v4529_v42 = vsel %vm4492_vm5, %v4480_v41, %v10981_v39 }
 0x404   :  { %v3767_v22 = vpop.permute.xlu1 %3766  ;;  %v4430_v19 = vsel %vm4394_vm4, %v10822_v57, %v10980_v18  ;;  %v4578_v51 = vsel %vm4541_vm7, %v4529_v42, %v10982_v1 }
 0x405   :  { %v3769_v60 = vpop.permute.xlu0 %3768  ;;  %v4479_v34 = vsel %vm4443_vm6, %v4430_v19, %v10983_v33  ;;  %v10989_v19 = vld [vmem:[#allocation35_spill] sm:$0xff]  ;;  %v10992_v33 = vld [vmem:[#allocation108_spill] sm:$0xff] }
 0x406   :  { %v4627_v9 = vsel %vm4590_vm9, %v4578_v51, %v3769_v60  ;;  %v4528_v57 = vsel %vm4492_vm5, %v4479_v34, %v10984_v44  ;;  %v10991_v51 = vld [vmem:[#allocation5_spill] sm:$0xff]  ;;  %v10993_v34 = vld [vmem:[#allocation174_spill] sm:$0xff] }
 0x407   :  { %v4577_v63 = vsel %vm4541_vm7, %v4528_v57, %v10985_v52  ;;  %v10994_v44 = vld [vmem:[#allocation177_spill] sm:$0xff]  ;;  %v10996_v52 = vld [vmem:[#allocation152_spill] sm:$0xff] }
 0x408   :  { %v4317_v23 = vpop.permute.xlu1 %4316 }
 0x409   :  { %v5673_v61 = vpop.f32.mrb[32].mxu1  ;;  %v4125_v58 = vpop.permute.xlu0 %4124  ;;  %v4771_v10 = vsel %vm4737_vm11, %v4722_v15, %v4317_v23  ;;  %v4433_v15 = vsel %vm4394_vm4, %v10848_v55, %v10986_v16  ;;  %v10990_v55 = vld [vmem:[#allocation160_spill] sm:$0xff]  ;;  %v11001_v16 = vld [vmem:[#allocation181_spill] sm:$0xff] }
 0x40a   :  { %v5055_v43 = vadd.f32 %v5673_v61, %v9657_v47  ;;  %v5049_v26 = vpop.f32.mrb[33].mxu1  ;;  %v4723_v45 = vsel %vm4688_vm10, %v4674_v5, %v4125_v58  ;;  %v4626_v58 = vsel %vm4590_vm9, %v4577_v63, %v3767_v22  ;;  %v4482_v39 = vsel %vm4443_vm6, %v4433_v15, %v10989_v19 }
 0x40b   :  { %v5050_v50 = vadd.f32 %v9657_v47, %v5049_v26  ;;  %v4531_v1 = vsel %vm4492_vm5, %v4482_v39, %v10990_v55  ;;  %v4434_v63 = vsel %vm4394_vm4, %v10868_v59, %v10996_v52  ;;  %v11004_v52 = vld [vmem:[#allocation168_spill] sm:$0xff] }
 0x40c   :  { %v3961_v35 = vpop.permute.xlu1 %3960  ;;  %v5221_v12 = vmax.f32 %v5055_v43, 0.0 }
 0x40d   :  { %v5220_v27 = vmax.f32 %v5050_v50, 0.0  ;;  %v3963_v3 = vpop.permute.xlu0 %3962  ;;  %v4675_v26 = vsel %vm4639_vm8, %v4626_v58, %v3961_v35 }
 0x40e   :  { %5257 = vst [vmem:[#allocation2 + $0x18] sm:$0xff] %v5221_v12  ;;  %v4676_v2 = vsel %vm4639_vm8, %v4627_v9, %v3963_v3 }
 0x40f   :  { %5256 = vst [vmem:[#allocation2 + $0x10] sm:$0xff] %v5220_v27 }
 0x410   :  { %v4127_v31 = vpop.permute.xlu1 %4126 }
 0x411   :  { %v4319_v49 = vpop.permute.xlu0 %4318  ;;  %v4724_v48 = vsel %vm4688_vm10, %v4675_v26, %v4127_v31 }
 0x412   :  { %v4772_v36 = vsel %vm4737_vm11, %v4723_v45, %v4319_v49  ;;  %v10987_v45 = vld [vmem:[#allocation172_spill] sm:$0xff] }
 0x413   :  { %v4889_v29 = vcombine.low %v4771_v10, %v4772_v36  ;;  %v4851_v4 = vcombine.high %v4772_v36, %v4772_v36  ;;  %v4435_v49 = vsel %vm4394_vm4, %v10871_v8, %v10987_v45  ;;  %v10988_v36 = vld [vmem:[#allocation120_spill] sm:$0xff] }
 0x414   :  { %v9701_v25 = vpop.permute.xlu1 %3772  ;;  %v4484_v8 = vsel %vm4443_vm6, %v4435_v49, %v10991_v51 }
 0x415   :  { %5705 = vmatmul.mubr.msk.f32.gmra.mrb[54].mxu1 %vm4900_vm12, %v4889_v29  ;;  %v4129_v30 = vpop.permute.xlu0 %4128  ;;  %v4432_v29 = vsel %vm4394_vm4, %v10856_v14, %v10988_v36  ;;  %v4533_v57 = vsel %vm4492_vm5, %v4484_v8, %v10994_v44  ;;  %v11002_v44 = vld [vmem:[#allocation176_spill] sm:$0xff] }
 0x416   :  { %v4725_v53 = vsel %vm4688_vm10, %v4676_v2, %v4129_v30  ;;  %v4481_v14 = vsel %vm4443_vm6, %v4432_v29, %v10992_v33  ;;  %v4580_v2 = vsel %vm4541_vm7, %v4531_v1, %v10993_v34 }
 0x418   :  { %v9713_v46 = vpop.permute.xlu1 %3770 }
 0x419   :  { %v5676_v21 = vpop.f32.mrb[34].mxu1  ;;  %v4323_v23 = vpop.permute.xlu0 %4322 }
 0x41a   :  { %v5065_v11 = vadd.f32 %v5676_v21, %v9657_v47  ;;  %v4774_v40 = vsel %vm4737_vm11, %v4725_v53, %v4323_v23  ;;  %v5059_v60 = vpop.f32.mrb[35].mxu1  ;;  %v10995_v21 = vld [vmem:[#allocation140_spill] sm:$0xff] }
 0x41b   :  { %v5060_v43 = vadd.f32 %v9657_v47, %v5059_v60  ;;  %v4852_v54 = vcombine.high %v4774_v40, %v4774_v40  ;;  %v4530_v23 = vsel %vm4492_vm5, %v4481_v14, %v10995_v21  ;;  %v4629_v60 = vsel %vm4590_vm9, %v4580_v2, %v9701_v25 }
 0x41c   :  { %v9726_v61 = vpop.permute.xlu1 %3774  ;;  %v5223_v50 = vmax.f32 %v5065_v11, 0.0  ;;  %v10997_v11 = vld [vmem:[#allocation75_spill] sm:$0xff] }
 0x41d   :  { %v5222_v24 = vmax.f32 %v5060_v43, 0.0  ;;  %v4321_v12 = vpop.permute.xlu0 %4320  ;;  %v4891_v3 = vcombine.low %v4774_v40, %v4852_v54  ;;  %v4582_v40 = vsel %vm4541_vm7, %v4533_v57, %v10997_v11  ;;  %v10998_v43 = vld [vmem:[#allocation162_spill] sm:$0xff]  ;;  %v4436_v57 = vsel %vm4394_vm4, %v10897_v62, %v11002_v44  ;;  %v11005_v11 = vld [vmem:[#allocation92_spill] sm:$0xff] }
 0x41e   :  { %5259 = vst [vmem:[#allocation2 + $0x28] sm:$0xff] %v5223_v50  ;;  %v4773_v28 = vsel %vm4737_vm11, %v4724_v48, %v4321_v12  ;;  %v4579_v26 = vsel %vm4541_vm7, %v4530_v23, %v10998_v43 }
 0x41f   :  { %5258 = vst [vmem:[#allocation2 + $0x20] sm:$0xff] %v5222_v24  ;;  %v4890_v27 = vcombine.low %v4851_v4, %v4773_v28  ;;  %v4628_v59 = vsel %vm4590_vm9, %v4579_v26, %v9713_v46  ;;  %v10999_v24 = vld [vmem:[#allocation148_spill] sm:$0xff]  ;;  %v11000_v28 = vld [vmem:[#allocation79_spill] sm:$0xff]  ;;  %v11007_v26 = vld [vmem:[#allocation193_spill] sm:$0xff] }
 0x420   :  { %v4133_v37 = vpop.permute.xlu1 %4132  ;;  %v4483_v12 = vsel %vm4443_vm6, %v4434_v63, %v10999_v24  ;;  %v4485_v63 = vsel %vm4443_vm6, %v4436_v57, %v11004_v52 }
 0x421   :  { %5707 = vmatprep.mubr.msk.f32.mxu1 %vm4900_vm12, %v4890_v27  ;;  %v3967_v22 = vpop.permute.xlu0 %3966  ;;  %v4532_v27 = vsel %vm4492_vm5, %v4483_v12, %v11000_v28 }
 0x422   :  { %5708 = vmatmul.mubr.msk.f32.gmra.mrb[56].mxu1 %vm4900_vm12, %v4891_v3  ;;  %v4678_v50 = vsel %vm4639_vm8, %v4629_v60, %v3967_v22  ;;  %v4581_v15 = vsel %vm4541_vm7, %v4532_v27, %v11001_v16 }
 0x423   :  { %v4727_v3 = vsel %vm4688_vm10, %v4678_v50, %v4133_v37 }
 0x424   :  { %v3969_v35 = vpop.permute.xlu1 %3968 }
 0x425   :  { %v3965_v6 = vpop.permute.xlu0 %3964 }
 0x426   :  { %v4677_v25 = vsel %vm4639_vm8, %v4628_v59, %v3965_v6  ;;  %v4630_v6 = vsel %vm4590_vm9, %v4581_v15, %v9726_v61  ;;  %v11009_v59 = vld [vmem:[#allocation58_spill] sm:$0xff] }
 0x427   :  { %v4679_v37 = vsel %vm4639_vm8, %v4630_v6, %v3969_v35 }
 0x428   :  { %v4327_v5 = vpop.permute.xlu1 %4326 }
 0x429   :  { %v3777_v0 = vpop.permute.xlu0 %3776  ;;  %v4776_v46 = vsel %vm4737_vm11, %v4727_v3, %v4327_v5 }
 0x42a   :  { %v4631_v54 = vsel %vm4590_vm9, %v4582_v40, %v3777_v0 }
 0x42c   :  { %v4135_v31 = vpop.permute.xlu1 %4134  ;;  %v5679_v10 = vpop.f32.mrb[36].mxu1 }
 0x42d   :  { %v5075_v38 = vadd.f32 %v5679_v10, %v9657_v47  ;;  %v5069_v41 = vpop.f32.mrb[37].mxu1  ;;  %v4131_v18 = vpop.permute.xlu0 %4130 }
 0x42e   :  { %v5070_v42 = vadd.f32 %v9657_v47, %v5069_v41  ;;  %v4726_v22 = vsel %vm4688_vm10, %v4677_v25, %v4131_v18  ;;  %v4853_v41 = vcombine.high %v4776_v46, %v4776_v46  ;;  %v4728_v18 = vsel %vm4688_vm10, %v4679_v37, %v4135_v31 }
 0x42f   :  { %v5225_v9 = vmax.f32 %v5075_v38, 0.0 }
 0x430   :  { %v4137_v30 = vpop.permute.xlu1 %4136  ;;  %v5224_v53 = vmax.f32 %v5070_v42, 0.0 }
 0x431   :  { %5261 = vst [vmem:[#allocation2 + $0x38] sm:$0xff] %v5225_v9  ;;  %v3971_v58 = vpop.permute.xlu0 %3970 }
 0x432   :  { %5260 = vst [vmem:[#allocation2 + $0x30] sm:$0xff] %v5224_v53  ;;  %v4680_v4 = vsel %vm4639_vm8, %v4631_v54, %v3971_v58  ;;  %v11003_v53 = vld [vmem:[#allocation42_spill] sm:$0xff]  ;;  %v11006_v58 = vld [vmem:[#allocation184_spill] sm:$0xff] }
 0x433   :  { %v4729_v10 = vsel %vm4688_vm10, %v4680_v4, %v4137_v30  ;;  %v4437_v21 = vsel %vm4394_vm4, %v10887_v17, %v11003_v53  ;;  %v4534_v43 = vsel %vm4492_vm5, %v4485_v63, %v11006_v58  ;;  %v11008_v54 = vld [vmem:[#allocation54_spill] sm:$0xff] }
 0x434   :  { %v3779_v48 = vpop.permute.xlu1 %3778  ;;  %v4486_v40 = vsel %vm4443_vm6, %v4437_v21, %v11005_v11  ;;  %v4583_v62 = vsel %vm4541_vm7, %v4534_v43, %v11008_v54  ;;  %v11018_v54 = vld [vmem:[#allocation64_spill] sm:$0xff] }
 0x435   :  { %v4325_v0 = vpop.permute.xlu0 %4324  ;;  %v4535_v50 = vsel %vm4492_vm5, %v4486_v40, %v11007_v26  ;;  %v4632_v4 = vsel %vm4590_vm9, %v4583_v62, %v3779_v48 }
 0x436   :  { %v4775_v45 = vsel %vm4737_vm11, %v4726_v22, %v4325_v0  ;;  %v4584_v17 = vsel %vm4541_vm7, %v4535_v50, %v11009_v59  ;;  %v11010_v22 = vld [vmem:[#allocation59_spill] sm:$0xff]  ;;  %v11019_v59 = vld [vmem:[#allocation212_spill] sm:$0xff] }
 0x437   :  { %v4892_v36 = vcombine.low %v4775_v45, %v4776_v46  ;;  %v4439_v0 = vsel %vm4394_vm4, %v10905_v13, %v11010_v22 }
 0x438   :  { %v4331_v49 = vpop.permute.xlu1 %4330 }
 0x439   :  { %v4778_v29 = vsel %vm4737_vm11, %v4729_v10, %v4331_v49  ;;  %v5682_v19 = vpop.f32.mrb[38].mxu1  ;;  %5710 = vmatprep.mubr.msk.f32.mxu1 %vm4900_vm12, %v4892_v36  ;;  %v4329_v5 = vpop.permute.xlu0 %4328 }
 0x43a   :  { %v4854_v38 = vcombine.high %v4778_v29, %v4778_v29  ;;  %v5085_v42 = vadd.f32 %v5682_v19, %v9657_v47  ;;  %v4777_v30 = vsel %vm4737_vm11, %v4728_v18, %v4329_v5  ;;  %v5079_v55 = vpop.f32.mrb[39].mxu1  ;;  %v11012_v18 = vld [vmem:[#allocation189_spill] sm:$0xff]  ;;  %v11013_v5 = vld [vmem:[#allocation206_spill] sm:$0xff] }
 0x43b   :  { %v4893_v1 = vcombine.low %v4853_v41, %v4777_v30  ;;  %v5080_v51 = vadd.f32 %v9657_v47, %v5079_v55  ;;  %v4438_v19 = vsel %vm4394_vm4, %v10891_v32, %v11012_v18  ;;  %v11014_v30 = vld [vmem:[#allocation178_spill] sm:$0xff]  ;;  %v11016_v32 = vld [vmem:[#allocation201_spill] sm:$0xff] }
 0x43c   :  { %v4894_v39 = vcombine.low %v4778_v29, %v4854_v38  ;;  %v3975_v61 = vpop.permute.xlu1 %3974  ;;  %v5227_v8 = vmax.f32 %v5085_v42, 0.0  ;;  %v11011_v38 = vld [vmem:[#allocation191_spill] sm:$0xff] }
 0x43d   :  { %v5226_v35 = vmax.f32 %v5080_v51, 0.0  ;;  %5711 = vmatmul.mubr.msk.f32.gmra.mrb[58].mxu1 %vm4900_vm12, %v4893_v1  ;;  %v3781_v9 = vpop.permute.xlu0 %3780  ;;  %v4488_v13 = vsel %vm4443_vm6, %v4439_v0, %v11011_v38  ;;  %v11015_v51 = vld [vmem:[#allocation47_spill] sm:$0xff] }
 0x43e   :  { %5263 = vst [vmem:[#allocation2 + $0x48] sm:$0xff] %v5227_v8  ;;  %5713 = vmatprep.mubr.msk.f32.mxu1 %vm4900_vm12, %v4894_v39  ;;  %v4633_v24 = vsel %vm4590_vm9, %v4584_v17, %v3781_v9  ;;  %v4537_v39 = vsel %vm4492_vm5, %v4488_v13, %v11013_v5  ;;  %v4487_v8 = vsel %vm4443_vm6, %v4438_v19, %v11015_v51  ;;  %v11029_v5 = vld [vmem:[#allocation294_spill] sm:$0xff] }
 0x43f   :  { %5262 = vst [vmem:[#allocation2 + $0x40] sm:$0xff] %v5226_v35  ;;  %v4682_v27 = vsel %vm4639_vm8, %v4633_v24, %v3975_v61  ;;  %v4586_v55 = vsel %vm4541_vm7, %v4537_v39, %v11014_v30  ;;  %v4536_v9 = vsel %vm4492_vm5, %v4487_v8, %v11016_v32 }
 0x440   :  { %v4139_v31 = vpop.permute.xlu1 %4138 }
 0x441   :  { %v3973_v33 = vpop.permute.xlu0 %3972 }
 0x442   :  { %v4681_v25 = vsel %vm4639_vm8, %v4632_v4, %v3973_v33  ;;  %v11020_v4 = vld [vmem:[#allocation204_spill] sm:$0xff] }
 0x443   :  { %v4730_v16 = vsel %vm4688_vm10, %v4681_v25, %v4139_v31  ;;  %v4440_v24 = vsel %vm4394_vm4, %v10920_v20, %v11020_v4 }
 0x444   :  { %v3783_v14 = vpop.permute.xlu1 %3782 }
 0x445   :  { %v3785_v34 = vpop.permute.xlu0 %3784 }
 0x446   :  { %v4635_v1 = vsel %vm4590_vm9, %v4586_v55, %v3785_v34 }
 0x448   :  { %v4333_v2 = vpop.permute.xlu1 %4332 }
 0x449   :  { %v4141_v23 = vpop.permute.xlu0 %4140  ;;  %v4779_v49 = vsel %vm4737_vm11, %v4730_v16, %v4333_v2  ;;  %v11017_v2 = vld [vmem:[#allocation44_spill] sm:$0xff] }
 0x44a   :  { %v4731_v15 = vsel %vm4688_vm10, %v4682_v27, %v4141_v23  ;;  %v4585_v44 = vsel %vm4541_vm7, %v4536_v9, %v11017_v2 }
 0x44b   :  { %v4634_v21 = vsel %vm4590_vm9, %v4585_v44, %v3783_v14  ;;  %v4441_v14 = vsel %vm4394_vm4, %v10912_v7, %v11018_v54 }
 0x44c   :  { %v3977_v60 = vpop.permute.xlu1 %3976  ;;  %v4490_v17 = vsel %vm4443_vm6, %v4441_v14, %v11019_v59 }
 0x44d   :  { %v3979_v12 = vpop.permute.xlu0 %3978  ;;  %v4683_v34 = vsel %vm4639_vm8, %v4634_v21, %v3977_v60 }
 0x44e   :  { %v4684_v35 = vsel %vm4639_vm8, %v4635_v1, %v3979_v12  ;;  %v11021_v12 = vld [vmem:[#allocation220_spill] sm:$0xff] }
 0x44f   :  { %v4539_v25 = vsel %vm4492_vm5, %v4490_v17, %v11021_v12 }
 0x450   :  { %v4143_v28 = vpop.permute.xlu1 %4142  ;;  %v5685_v3 = vpop.f32.mrb[40].mxu1 }
 0x451   :  { %v5095_v46 = vadd.f32 %v5685_v3, %v9657_v47  ;;  %v5089_v48 = vpop.f32.mrb[41].mxu1  ;;  %v4335_v45 = vpop.permute.xlu0 %4334  ;;  %v4732_v52 = vsel %vm4688_vm10, %v4683_v34, %v4143_v28  ;;  %v11022_v28 = vld [vmem:[#allocation218_spill] sm:$0xff]  ;;  %v11023_v3 = vld [vmem:[#allocation49_spill] sm:$0xff] }
 0x452   :  { %v5090_v10 = vadd.f32 %v9657_v47, %v5089_v48  ;;  %v4780_v6 = vsel %vm4737_vm11, %v4731_v15, %v4335_v45  ;;  %v4442_v27 = vsel %vm4394_vm4, %v10931_v56, %v11022_v28  ;;  %v4588_v22 = vsel %vm4541_vm7, %v4539_v25, %v11023_v3  ;;  %v11024_v48 = vld [vmem:[#allocation200_spill] sm:$0xff] }
 0x453   :  { %v5229_v29 = vmax.f32 %v5095_v46, 0.0  ;;  %v4895_v37 = vcombine.low %v4779_v49, %v4780_v6  ;;  %v4855_v63 = vcombine.high %v4780_v6, %v4780_v6  ;;  %v4489_v20 = vsel %vm4443_vm6, %v4440_v24, %v11024_v48  ;;  %v11025_v6 = vld [vmem:[#allocation211_spill] sm:$0xff] }
 0x454   :  { %v3789_v36 = vpop.permute.xlu1 %3788  ;;  %v5228_v41 = vmax.f32 %v5090_v10, 0.0  ;;  %v4538_v56 = vsel %vm4492_vm5, %v4489_v20, %v11025_v6 }
 0x455   :  { %5265 = vst [vmem:[#allocation2 + $0x58] sm:$0xff] %v5229_v29  ;;  %5714 = vmatmul.mubr.msk.f32.gmra.mrb[60].mxu1 %vm4900_vm12, %v4895_v37  ;;  %v4145_v42 = vpop.permute.xlu0 %4144  ;;  %v4637_v0 = vsel %vm4590_vm9, %v4588_v22, %v3789_v36  ;;  %v11026_v29 = vld [vmem:[#allocation215_spill] sm:$0xff]  ;;  %v11027_v36 = vld [vmem:[#allocation69_spill] sm:$0xff] }
 0x456   :  { %5264 = vst [vmem:[#allocation2 + $0x50] sm:$0xff] %v5228_v41  ;;  %v4733_v31 = vsel %vm4688_vm10, %v4684_v35, %v4145_v42  ;;  %v4491_v37 = vsel %vm4443_vm6, %v4442_v27, %v11026_v29  ;;  %v11028_v41 = vld [vmem:[#allocation292_spill] sm:$0xff] }
 0x457   :  { %v4540_v13 = vsel %vm4492_vm5, %v4491_v37, %v11027_v36  ;;  %v4587_v18 = vsel %vm4541_vm7, %v4538_v56, %v11028_v41 }
 0x458   :  { %v3787_v61 = vpop.permute.xlu1 %3786  ;;  %v4589_v39 = vsel %vm4541_vm7, %v4540_v13, %v11029_v5 }
 0x459   :  { %v4339_v33 = vpop.permute.xlu0 %4338  ;;  %v4636_v42 = vsel %vm4590_vm9, %v4587_v18, %v3787_v61 }
 0x45a   :  { %v4782_v57 = vsel %vm4737_vm11, %v4733_v31, %v4339_v33 }
 0x45b   :  { %v4856_v23 = vcombine.high %v4782_v57, %v4782_v57 }
 0x45c   :  { %v3791_v53 = vpop.permute.xlu1 %3790 }
 0x45d   :  { %v4337_v11 = vpop.permute.xlu0 %4336  ;;  %v4897_v26 = vcombine.low %v4782_v57, %v4856_v23  ;;  %v4638_v1 = vsel %vm4590_vm9, %v4589_v39, %v3791_v53 }
 0x45e   :  { %v4781_v40 = vsel %vm4737_vm11, %v4732_v52, %v4337_v11 }
 0x45f   :  { %v4896_v43 = vcombine.low %v4855_v63, %v4781_v40 }
 0x460   :  { %v4149_v58 = vpop.permute.xlu1 %4148 }
 0x461   :  { %5716 = vmatprep.mubr.msk.f32.mxu1 %vm4900_vm12, %v4896_v43  ;;  %v3983_v50 = vpop.permute.xlu0 %3982 }
 0x462   :  { %5717 = vmatmul.mubr.msk.f32.gmra.mrb[62].mxu1 %vm4900_vm12, %v4897_v26  ;;  %v4686_v45 = vsel %vm4639_vm8, %v4637_v0, %v3983_v50 }
 0x463   :  { %v4735_v30 = vsel %vm4688_vm10, %v4686_v45, %v4149_v58 }
 0x464   :  { %v4147_v60 = vpop.permute.xlu1 %4146 }
 0x465   :  { %v3981_v62 = vpop.permute.xlu0 %3980 }
 0x466   :  { %v4685_v51 = vsel %vm4639_vm8, %v4636_v42, %v3981_v62 }
 0x467   :  { %v4734_v31 = vsel %vm4688_vm10, %v4685_v51, %v4147_v60 }
 0x468   :  { %v5688_v7 = vpop.f32.mrb[42].mxu1  ;;  %v4151_v49 = vpop.permute.xlu1 %4150 }
 0x469   :  { %v5105_v16 = vadd.f32 %v5688_v7, %v9657_v47  ;;  %v5099_v15 = vpop.f32.mrb[43].mxu1  ;;  %v3985_v46 = vpop.permute.xlu0 %3984 }
 0x46a   :  { %v5100_v10 = vadd.f32 %v9657_v47, %v5099_v15  ;;  %v4687_v35 = vsel %vm4639_vm8, %v4638_v1, %v3985_v46 }
 0x46b   :  { %v5231_v38 = vmax.f32 %v5105_v16, 0.0  ;;  %v4736_v61 = vsel %vm4688_vm10, %v4687_v35, %v4151_v49 }
 0x46c   :  { %v5230_v19 = vmax.f32 %v5100_v10, 0.0  ;;  %v4345_v32 = vpop.permute.xlu1 %4344 }
 0x46d   :  { %5267 = vst [vmem:[#allocation2 + $0x68] sm:$0xff] %v5231_v38  ;;  %v4343_v55 = vpop.permute.xlu0 %4342  ;;  %v4785_v44 = vsel %vm4737_vm11, %v4736_v61, %v4345_v32 }
 0x46e   :  { %5266 = vst [vmem:[#allocation2 + $0x60] sm:$0xff] %v5230_v19  ;;  %v4784_v8 = vsel %vm4737_vm11, %v4735_v30, %v4343_v55 }
 0x46f   :  { %v4857_v9 = vcombine.high %v4784_v8, %v4784_v8 }
 0x471   :  { %v4341_v33 = vpop.permute.xlu0 %4340  ;;  %v4899_v53 = vcombine.low %v4857_v9, %v4785_v44 }
 0x472   :  { %v4783_v2 = vsel %vm4737_vm11, %v4734_v31, %v4341_v33 }
 0x473   :  { %v4898_v57 = vcombine.low %v4783_v2, %v4784_v8 }
 0x475   :  { %v5691_v21 = vpop.f32.mrb[44].mxu1  ;;  %5719 = vmatprep.mubr.msk.f32.mxu1 %vm4900_vm12, %v4898_v57 }
 0x476   :  { %v5115_v34 = vadd.f32 %v5691_v21, %v9657_v47  ;;  %v5109_v23 = vpop.f32.mrb[45].mxu1  ;;  %5720 = vmatmul.mubr.msk.f32.gmra.mrb[64].mxu1 %vm4900_vm12, %v4899_v53 }
 0x477   :  { %v5110_v52 = vadd.f32 %v9657_v47, %v5109_v23 }
 0x478   :  { %v5233_v63 = vmax.f32 %v5115_v34, 0.0 }
 0x479   :  { %v5232_v11 = vmax.f32 %v5110_v52, 0.0 }
 0x47a   :  { %5269 = vst [vmem:[#allocation2 + $0x78] sm:$0xff] %v5233_v63 }
 0x47b   :  { %5268 = vst [vmem:[#allocation2 + $0x70] sm:$0xff] %v5232_v11 }
 0x490   :  { %v5694_v40 = vpop.f32.mrb[46].mxu1 }
 0x491   :  { %v5125_v58 = vadd.f32 %v5694_v40, %v9657_v47  ;;  %v5119_v43 = vpop.f32.mrb[47].mxu1 }
 0x492   :  { %v5120_v26 = vadd.f32 %v9657_v47, %v5119_v43 }
 0x493   :  { %v5235_v50 = vmax.f32 %v5125_v58, 0.0 }
 0x494   :  { %v5234_v54 = vmax.f32 %v5120_v26, 0.0 }
 0x495   :  { %5271 = vst [vmem:[#allocation2 + $0x88] sm:$0xff] %v5235_v50 }
 0x496   :  { %5270 = vst [vmem:[#allocation2 + $0x80] sm:$0xff] %v5234_v54 }
 0x4a8   :  { %v5697_v14 = vpop.f32.mrb[48].mxu1 }
 0x4a9   :  { %v5135_v60 = vadd.f32 %v5697_v14, %v9657_v47  ;;  %v5129_v62 = vpop.f32.mrb[49].mxu1 }
 0x4aa   :  { %v5130_v59 = vadd.f32 %v9657_v47, %v5129_v62 }
 0x4ab   :  { %v5237_v17 = vmax.f32 %v5135_v60, 0.0 }
 0x4ac   :  { %v5236_v4 = vmax.f32 %v5130_v59, 0.0 }
 0x4ad   :  { %5273 = vst [vmem:[#allocation2 + $0x98] sm:$0xff] %v5237_v17 }
 0x4ae   :  { %5272 = vst [vmem:[#allocation2 + $0x90] sm:$0xff] %v5236_v4 }
 0x4b5   :  { %v5700_v24 = vpop.f32.mrb[50].mxu1 }
 0x4b6   :  { %v5145_v12 = vadd.f32 %v5700_v24, %v9657_v47  ;;  %v5139_v25 = vpop.f32.mrb[51].mxu1 }
 0x4b7   :  { %v5140_v28 = vadd.f32 %v9657_v47, %v5139_v25 }
 0x4b8   :  { %v5239_v27 = vmax.f32 %v5145_v12, 0.0 }
 0x4b9   :  { %v5238_v3 = vmax.f32 %v5140_v28, 0.0 }
 0x4ba   :  { %5275 = vst [vmem:[#allocation2 + $0xa8] sm:$0xff] %v5239_v27 }
 0x4bb   :  { %5274 = vst [vmem:[#allocation2 + $0xa0] sm:$0xff] %v5238_v3 }
 0x4d0   :  { %v5703_v22 = vpop.f32.mrb[52].mxu1 }
 0x4d1   :  { %v5155_v7 = vadd.f32 %v5703_v22, %v9657_v47  ;;  %v5149_v0 = vpop.f32.mrb[53].mxu1 }
 0x4d2   :  { %v5150_v16 = vadd.f32 %v9657_v47, %v5149_v0 }
 0x4d3   :  { %v5241_v15 = vmax.f32 %v5155_v7, 0.0 }
 0x4d4   :  { %v5240_v46 = vmax.f32 %v5150_v16, 0.0 }
 0x4d5   :  { %5277 = vst [vmem:[#allocation2 + $0xb8] sm:$0xff] %v5241_v15 }
 0x4d6   :  { %5276 = vst [vmem:[#allocation2 + $0xb0] sm:$0xff] %v5240_v46 }
 0x4e8   :  { %v5706_v48 = vpop.f32.mrb[54].mxu1 }
 0x4e9   :  { %v5165_v20 = vadd.f32 %v5706_v48, %v9657_v47  ;;  %v5159_v45 = vpop.f32.mrb[55].mxu1 }
 0x4ea   :  { %v5160_v49 = vadd.f32 %v9657_v47, %v5159_v45 }
 0x4eb   :  { %v5243_v10 = vmax.f32 %v5165_v20, 0.0 }
 0x4ec   :  { %v5242_v6 = vmax.f32 %v5160_v49, 0.0 }
 0x4ed   :  { %5279 = vst [vmem:[#allocation2 + $0xc8] sm:$0xff] %v5243_v10 }
 0x4ee   :  { %5278 = vst [vmem:[#allocation2 + $0xc0] sm:$0xff] %v5242_v6 }
 0x4f5   :  { %v5709_v56 = vpop.f32.mrb[56].mxu1 }
 0x4f6   :  { %v5175_v29 = vadd.f32 %v5709_v56, %v9657_v47  ;;  %v5169_v37 = vpop.f32.mrb[57].mxu1 }
 0x4f7   :  { %v5170_v38 = vadd.f32 %v9657_v47, %v5169_v37 }
 0x4f8   :  { %v5245_v36 = vmax.f32 %v5175_v29, 0.0 }
 0x4f9   :  { %v5244_v13 = vmax.f32 %v5170_v38, 0.0 }
 0x4fa   :  { %5281 = vst [vmem:[#allocation2 + $0xd8] sm:$0xff] %v5245_v36 }
 0x4fb   :  { %5280 = vst [vmem:[#allocation2 + $0xd0] sm:$0xff] %v5244_v13 }
 0x510   :  { %v5712_v41 = vpop.f32.mrb[58].mxu1 }
 0x511   :  { %v5185_v18 = vadd.f32 %v5712_v41, %v9657_v47  ;;  %v5179_v19 = vpop.f32.mrb[59].mxu1 }
 0x512   :  { %v5180_v5 = vadd.f32 %v9657_v47, %v5179_v19 }
 0x513   :  { %v5247_v39 = vmax.f32 %v5185_v18, 0.0 }
 0x514   :  { %v5246_v42 = vmax.f32 %v5180_v5, 0.0 }
 0x515   :  { %5283 = vst [vmem:[#allocation2 + $0xe8] sm:$0xff] %v5247_v39 }
 0x516   :  { %5282 = vst [vmem:[#allocation2 + $0xe0] sm:$0xff] %v5246_v42 }
 0x528   :  { %v5715_v30 = vpop.f32.mrb[60].mxu1 }
 0x529   :  { %v5195_v55 = vadd.f32 %v5715_v30, %v9657_v47  ;;  %v5189_v1 = vpop.f32.mrb[61].mxu1 }
 0x52a   :  { %v5190_v51 = vadd.f32 %v9657_v47, %v5189_v1 }
 0x52b   :  { %v5249_v8 = vmax.f32 %v5195_v55, 0.0 }
 0x52c   :  { %v5248_v35 = vmax.f32 %v5190_v51, 0.0 }
 0x52d   :  { %5285 = vst [vmem:[#allocation2 + $0xf8] sm:$0xff] %v5249_v8 }
 0x52e   :  { %5284 = vst [vmem:[#allocation2 + $0xf0] sm:$0xff] %v5248_v35 }
 0x535   :  { %v5718_v32 = vpop.f32.mrb[62].mxu1 }
 0x536   :  { %v5205_v9 = vadd.f32 %v5718_v32, %v9657_v47  ;;  %v5199_v31 = vpop.f32.mrb[63].mxu1 }
 0x537   :  { %v5200_v33 = vadd.f32 %v9657_v47, %v5199_v31 }
 0x538   :  { %v5251_v61 = vmax.f32 %v5205_v9, 0.0 }
 0x539   :  { %v5250_v2 = vmax.f32 %v5200_v33, 0.0 }
 0x53a   :  { %5287 = vst [vmem:[#allocation2 + $0x108] sm:$0xff] %v5251_v61 }
 0x53b   :  { %5286 = vst [vmem:[#allocation2 + $0x100] sm:$0xff] %v5250_v2 }
 0x549   :  { %v5721_v44 = vpop.f32.mrb[64].mxu1 }
 0x54a   :  { %v5215_v57 = vadd.f32 %v5721_v44, %v9657_v47  ;;  %v5209_v53 = vpop.f32.mrb[65].mxu1 }
 0x54b   :  { %v5210_v21 = vadd.f32 %v9657_v47, %v5209_v53 }
 0x54c   :  { %v5253_v34 = vmax.f32 %v5215_v57, 0.0 }
 0x54d   :  { %v5252_v23 = vmax.f32 %v5210_v21, 0.0 }
 0x54e   :  { %5289 = vst [vmem:[#allocation2 + $0x118] sm:$0xff] %v5253_v34 }
 0x54f   :  { %5288 = vst [vmem:[#allocation2 + $0x110] sm:$0xff] %v5252_v23 }
 0x550   :  { %5776 = shalt.err (!%p5773_p4)
}
 0x551   :  { %s5777_s2 = scalar_lea.hbm %s9937_s5, 4608 }
 0x552   :  { %p5778_p5 = scmp.ne.s32.totalorder %s9937_s5, %s5777_s2  ;;  %p5781_p6 = scmp.lt.u32.totalorder %s5777_s2, %s9937_s5 }
 0x554   :  { %p5783_p7 = pnand %p5781_p6, %p5778_p5 }
 0x556   :  { %5786 = shalt.err (!%p5783_p7)
}
 0x557   :  { %s5802_s7 = smov 128  }
 0x558   :  { %5301 = dma.vmem_to_hbm [thread:$0]  %s5296_s26, 4608, %s9937_s5, [#allocation3], %s5802_s7, %s5802_s7, %s5795_s24  }
 0x559   :  { %5787 = dma.done.wait [#allocation3], 4608  }
 0x55a   :  { %5788 = vsyncadd [#allocation3], 4294962688 }
 0x55b   :  { %5305 = vsyncpa [#allocation3], 1 }

</bundles_post_ra>
